<compile_context>
chip_gen: v5e
topology: v5e:2x2
jax: 0.10.0
libtpu: 0.0.40
codegen_flags: <defaults>
</compile_context>

<pallas_src>
import math
from functools import partial

import numpy as np
import jax
import jax.numpy as jnp
from jax import lax
from jax.experimental import pallas as pl
from jax.experimental.pallas import tpu as pltpu


# ------------------------------ fused kernel --------------------------------

def _fused_encoder_kernel(agent_ref, depot_ref, node_ref,
                          wq_ref, wkv_ref, wcomb_ref, bcomb_ref,
                          w1_ref, b1_ref, w2_ref, b2_ref,
                          alphas_ref, cos_ref, sin_ref,
                          agent_out_ref, depot_out_ref, node_out_ref,
                          rot_scr, oc_scr, *, H):
    f32 = jnp.float32
    E = agent_ref.shape[-1]
    d = E // H
    hE = E // 2
    inv_sqrt_d = 1.0 / math.sqrt(d)

    def rope(x):
        # rotate-half (split-half convention) via a lane swizzle through VMEM
        # scratch: no MXU push, no rotation-matrix table.  sin_ref already has
        # the +/- sign of rotate_half folded in.
        n = x.shape[0]
        rot_scr[0:n, 0:hE] = x[:, hE:E]
        rot_scr[0:n, hE:E] = x[:, 0:hE]
        return x * cos_ref[0:n, :] + rot_scr[0:n, :] * sin_ref[0:n, :]

    def block(bi, x_q, x_kv, *, sharp, rope_q, rope_kv):
        # One full attention block (projections, H-head attention, combine,
        # add&scale, feed-forward).  Residual input is always x_q in this
        # module.  bi is a static index into the stacked weights.
        nq = x_q.shape[0]
        # fused projections: one (nq,E)x(E,E) for Q, one (nk,E)x(E,2E) for K|V
        q = jnp.dot(x_q, wq_ref[bi], preferred_element_type=f32)      # (nq, E)
        kv = jnp.dot(x_kv, wkv_ref[bi], preferred_element_type=f32)   # (nk, 2E)
        k = kv[:, :E]
        v = kv[:, E:]
        if rope_q:
            q = rope(q)
        if rope_kv:
            # NOTE: the reference module applies RoPE to V as well as K.
            k = rope(k)
            v = rope(v)
        scale = 1.0 if sharp else inv_sqrt_d
        contract = (((1,), (1,)), ((), ()))     # q @ k.T without transposing k
        for h in range(H):
            sl = slice(h * d, (h + 1) * d)
            s = lax.dot_general(q[:, sl], k[:, sl], contract,
                                preferred_element_type=f32) * scale
            m = jnp.max(s, axis=-1, keepdims=True)
            e = jnp.exp(s - m)
            w = e * pl.reciprocal(jnp.sum(e, axis=-1, keepdims=True), approx=True)
            # pack this head's output into the (nq, E) concat buffer
            oc_scr[0:nq, sl] = jnp.dot(w, v[:, sl], preferred_element_type=f32)
        # single output projection over the packed head outputs
        mh = jnp.dot(oc_scr[0:nq, :], wcomb_ref[bi],
                     preferred_element_type=f32) + bcomb_ref[bi]
        # Add_And_Normalization_Module: residual + mh * alpha
        hidden = x_q + mh * alphas_ref[bi, 0]
        # Feed_Forward_Module: hidden + W2(relu(W1(hidden))) * alpha
        h1 = jnp.maximum(
            jnp.dot(hidden, w1_ref[bi], preferred_element_type=f32) + b1_ref[bi],
            0.0)
        ffn = jnp.dot(h1, w2_ref[bi], preferred_element_type=f32) + b2_ref[bi]
        return hidden + ffn * alphas_ref[bi, 1]

    agent_emb = agent_ref[0]
    depot_emb = depot_ref[0]
    node_emb = node_ref[0]

    # The 7 attention blocks of the reference forward, fully VMEM resident.
    node_out_2 = block(0, node_emb, node_emb, sharp=False, rope_q=False, rope_kv=False)
    depot_out_ = block(1, depot_emb, node_out_2, sharp=False, rope_q=False, rope_kv=False)
    node_out_ = block(2, node_out_2, depot_out_, sharp=True, rope_q=False, rope_kv=False)
    agent_out_ = block(3, agent_emb, depot_out_, sharp=True, rope_q=True, rope_kv=False)
    depot_out = block(4, depot_out_, agent_out_, sharp=False, rope_q=False, rope_kv=True)
    agent_out = block(5, agent_out_, node_out_, sharp=False, rope_q=True, rope_kv=False)
    node_out = block(6, node_out_, agent_out, sharp=True, rope_q=False, rope_kv=True)

    agent_out_ref[0] = agent_out
    depot_out_ref[0] = depot_out
    node_out_ref[0] = node_out


# ------------------------------- forward -------------------------------------

@partial(jax.jit, static_argnames=("H",))
def forward(params, agent_emb, depot_emb, node_emb, rope_cos, rope_sin, H):
    B, A, E = agent_emb.shape
    Dp = depot_emb.shape[1]
    N = node_emb.shape[1]
    F = params['w1'].shape[-1]
    max_n = max(A, Dp, N)

    def const(shape):
        # whole array, constant block index -> DMA'd once across the grid
        return pl.BlockSpec(shape, lambda b, n=len(shape): (0,) * n)

    return pl.pallas_call(
        partial(_fused_encoder_kernel, H=H),
        grid=(B,),
        in_specs=[
            pl.BlockSpec((1, A, E), lambda b: (b, 0, 0)),
            pl.BlockSpec((1, Dp, E), lambda b: (b, 0, 0)),
            pl.BlockSpec((1, N, E), lambda b: (b, 0, 0)),
            const((7, E, E)),        # Wq, stacked over the 7 blocks
            const((7, E, 2 * E)),    # [Wk | Wv] fused
            const((7, E, E)),        # multi_head_combine weight
            const((7, 1, E)),        # multi_head_combine bias
            const((7, E, F)),        # FFN W1
            const((7, 1, F)),        # FFN b1
            const((7, F, E)),        # FFN W2
            const((7, 1, E)),        # FFN b2
            pl.BlockSpec(memory_space=pltpu.MemorySpace.SMEM),   # (7,2) alphas
            const((A, E)),           # RoPE cos table
            const((A, E)),           # RoPE sin table (rotate-half sign folded in)
        ],
        out_specs=(
            pl.BlockSpec((1, A, E), lambda b: (b, 0, 0)),
            pl.BlockSpec((1, Dp, E), lambda b: (b, 0, 0)),
            pl.BlockSpec((1, N, E), lambda b: (b, 0, 0)),
        ),
        out_shape=(
            jax.ShapeDtypeStruct((B, A, E), jnp.float32),
            jax.ShapeDtypeStruct((B, Dp, E), jnp.float32),
            jax.ShapeDtypeStruct((B, N, E), jnp.float32),
        ),
        scratch_shapes=[
            pltpu.VMEM((max_n, E), jnp.float32),   # rotate-half swizzle buffer
            pltpu.VMEM((max_n, E), jnp.float32),   # per-head output concat buffer
        ],
        compiler_params=pltpu.CompilerParams(
            dimension_semantics=("parallel",),
            vmem_limit_bytes=32 * 1024 * 1024),
    )(agent_emb, depot_emb, node_emb,
      params['wq'], params['wkv'], params['wcomb'], params['bcomb'],
      params['w1'], params['b1'], params['w2'], params['b2'],
      params['alphas'], rope_cos, rope_sin)


# ----------------------------- parameters / RoPE ------------------------------

def init_params(key, E, F):
    # weights stacked across the 7 attention blocks, in execution order
    # [s, dn1, dn2, ad1, ad2, an1, an2]
    keys = iter(jax.random.split(key, 128))

    def w(din, dout):
        s = 1.0 / math.sqrt(din)
        return jax.random.uniform(next(keys), (din, dout), jnp.float32, -s, s)

    def b(dout):
        s = 1.0 / math.sqrt(dout)
        return jax.random.uniform(next(keys), (1, dout), jnp.float32, -s, s)

    units = []
    for _ in range(7):
        units.append(dict(
            wq=w(E, E),
            wkv=jnp.concatenate([w(E, E), w(E, E)], axis=1),   # fused [Wk | Wv]
            wcomb=w(E, E), bcomb=b(E),
            w1=w(E, F), b1=b(F), w2=w(F, E), b2=b(E),
            alphas=jax.random.uniform(next(keys), (2,), jnp.float32, -1.0, 1.0),
        ))
    return {name: jnp.stack([u[name] for u in units]) for name in units[0]}


# TODO(synk): RotatePostionalEncoding source was not provided with the module;
# this reconstructs a standard RoPE over the full embed dim (split-half rotate,
# positions 0..n-1, base 10000), applied to the projected q/k/v exactly where
# the reference calls self.RoPE(...).  In this forward RoPE only ever touches
# agent-length sequences, so the tables only need AGENTS rows.
def make_rope_tables(E, n, base=10000.0):
    half = E // 2
    pos = np.arange(n, dtype=np.float32)[:, None]
    inv_freq = base ** (-np.arange(0, half, dtype=np.float32) * 2.0 / E)
    ang = pos * inv_freq[None, :]                               # (n, E/2)
    cos = np.concatenate([np.cos(ang), np.cos(ang)], axis=-1)   # (n, E)
    # rotate_half(x) = [-x[:, E/2:], x[:, :E/2]]; the kernel swizzle produces
    # [x[:, E/2:], x[:, :E/2]], so fold the sign into the sin table.
    sin = np.concatenate([-np.sin(ang), np.sin(ang)], axis=-1)  # (n, E)
    return jnp.asarray(cos), jnp.asarray(sin)


# --------------------------------- main ---------------------------------------

if __name__ == "__main__":
    B, AGENTS, DEPOTS, NODES = 2, 4, 3, 8
    EMBED, HIDDEN, HEADS = 32, 64, 4   # key_dim = val_dim = 32 // 4 = 8

    key = jax.random.PRNGKey(0)
    k1, k2, k3, k4 = jax.random.split(key, 4)
    agent_emb = jax.random.normal(k1, (B, AGENTS, EMBED), jnp.float32)
    depot_emb = jax.random.normal(k2, (B, DEPOTS, EMBED), jnp.float32)
    node_emb = jax.random.normal(k3, (B, NODES, EMBED), jnp.float32)

    params = init_params(k4, EMBED, HIDDEN)
    rope_cos, rope_sin = make_rope_tables(EMBED, AGENTS)

    agent_out, depot_out, node_out = forward(
        params, agent_emb, depot_emb, node_emb, rope_cos, rope_sin, H=HEADS)
    jax.block_until_ready((agent_out, depot_out, node_out))

    assert agent_out.shape == (B, AGENTS, EMBED)
    assert depot_out.shape == (B, DEPOTS, EMBED)
    assert node_out.shape == (B, NODES, EMBED)
    assert bool(jnp.isfinite(agent_out).all()
                & jnp.isfinite(depot_out).all()
                & jnp.isfinite(node_out).all())
    print("KERNEL_OK")
</pallas_src>

<mosaic_0001>
module attributes {stable_mosaic.version = 11 : i64} {
  func.func @_fused_encoder_kernel(%arg0: i32, %arg1: memref<1x4x32xf32, #tpu.memory_space<vmem>>, %arg2: memref<1x3x32xf32, #tpu.memory_space<vmem>>, %arg3: memref<1x8x32xf32, #tpu.memory_space<vmem>>, %arg4: memref<7x32x32xf32, #tpu.memory_space<vmem>>, %arg5: memref<7x32x64xf32, #tpu.memory_space<vmem>>, %arg6: memref<7x32x32xf32, #tpu.memory_space<vmem>>, %arg7: memref<7x1x32xf32, #tpu.memory_space<vmem>>, %arg8: memref<7x32x64xf32, #tpu.memory_space<vmem>>, %arg9: memref<7x1x64xf32, #tpu.memory_space<vmem>>, %arg10: memref<7x64x32xf32, #tpu.memory_space<vmem>>, %arg11: memref<7x1x32xf32, #tpu.memory_space<vmem>>, %arg12: memref<7x2xf32, #tpu.memory_space<smem>>, %arg13: memref<4x32xf32, #tpu.memory_space<vmem>>, %arg14: memref<4x32xf32, #tpu.memory_space<vmem>>, %arg15: memref<1x4x32xf32, #tpu.memory_space<vmem>>, %arg16: memref<1x3x32xf32, #tpu.memory_space<vmem>>, %arg17: memref<1x8x32xf32, #tpu.memory_space<vmem>>, %arg18: memref<8x32xf32, #tpu.memory_space<vmem>>, %arg19: memref<8x32xf32, #tpu.memory_space<vmem>>) attributes {dimension_semantics = [#tpu.dimension_semantics<parallel>], iteration_bounds = array<i64: 2>, scalar_prefetch = 0 : i64, scratch_operands = 2 : i64, tpu.core_type = #tpu.core_type<tc>, window_params = [{transform_indices = @transform_0, window_bounds = array<i64: 1, 4, 32>}, {transform_indices = @transform_1, window_bounds = array<i64: 1, 3, 32>}, {transform_indices = @transform_2, window_bounds = array<i64: 1, 8, 32>}, {pipeline_mode = #tpu.pipeline_mode<synchronous>, transform_indices = @transform_3, window_bounds = array<i64: 7, 32, 32>}, {pipeline_mode = #tpu.pipeline_mode<synchronous>, transform_indices = @transform_4, window_bounds = array<i64: 7, 32, 64>}, {pipeline_mode = #tpu.pipeline_mode<synchronous>, transform_indices = @transform_5, window_bounds = array<i64: 7, 32, 32>}, {pipeline_mode = #tpu.pipeline_mode<synchronous>, transform_indices = @transform_6, window_bounds = array<i64: 7, 1, 32>}, {pipeline_mode = #tpu.pipeline_mode<synchronous>, transform_indices = @transform_7, window_bounds = array<i64: 7, 32, 64>}, {pipeline_mode = #tpu.pipeline_mode<synchronous>, transform_indices = @transform_8, window_bounds = array<i64: 7, 1, 64>}, {pipeline_mode = #tpu.pipeline_mode<synchronous>, transform_indices = @transform_9, window_bounds = array<i64: 7, 64, 32>}, {pipeline_mode = #tpu.pipeline_mode<synchronous>, transform_indices = @transform_10, window_bounds = array<i64: 7, 1, 32>}, {transform_indices = @transform_11, window_bounds = array<i64: 7, 2>}, {pipeline_mode = #tpu.pipeline_mode<synchronous>, transform_indices = @transform_12, window_bounds = array<i64: 4, 32>}, {pipeline_mode = #tpu.pipeline_mode<synchronous>, transform_indices = @transform_13, window_bounds = array<i64: 4, 32>}, {transform_indices = @transform_14, window_bounds = array<i64: 1, 4, 32>}, {transform_indices = @transform_15, window_bounds = array<i64: 1, 3, 32>}, {transform_indices = @transform_16, window_bounds = array<i64: 1, 8, 32>}]} {
    %c0 = arith.constant 0 : index
    %c0_0 = arith.constant 0 : index
    %c0_1 = arith.constant 0 : index
    %0 = vector.load %arg1[%c0, %c0_0, %c0_1] : memref<1x4x32xf32, #tpu.memory_space<vmem>>, vector<1x4x32xf32>
    %1 = vector.shape_cast %0 : vector<1x4x32xf32> to vector<4x32xf32>
    %c0_2 = arith.constant 0 : index
    %c0_3 = arith.constant 0 : index
    %c0_4 = arith.constant 0 : index
    %2 = vector.load %arg2[%c0_2, %c0_3, %c0_4] : memref<1x3x32xf32, #tpu.memory_space<vmem>>, vector<1x3x32xf32>
    %3 = vector.shape_cast %2 : vector<1x3x32xf32> to vector<3x32xf32>
    %c0_5 = arith.constant 0 : index
    %c0_6 = arith.constant 0 : index
    %c0_7 = arith.constant 0 : index
    %4 = vector.load %arg3[%c0_5, %c0_6, %c0_7] : memref<1x8x32xf32, #tpu.memory_space<vmem>>, vector<1x8x32xf32>
    %5 = vector.shape_cast %4 : vector<1x8x32xf32> to vector<8x32xf32>
    %c0_8 = arith.constant 0 : index
    %c0_9 = arith.constant 0 : index
    %c0_10 = arith.constant 0 : index
    %6 = vector.load %arg4[%c0_8, %c0_9, %c0_10] : memref<7x32x32xf32, #tpu.memory_space<vmem>>, vector<1x32x32xf32>
    %7 = vector.shape_cast %6 : vector<1x32x32xf32> to vector<32x32xf32>
    %cst = arith.constant dense<0.000000e+00> : vector<8x32xf32>
    %8 = tpu.matmul %5, %7, %cst {dimension_numbers = #tpu.dot_dimension_numbers<[1], [0], [0], [1], [0, 0, 1, 1], [], []>} : vector<8x32xf32>, vector<32x32xf32>, vector<8x32xf32> -> vector<8x32xf32>
    %c0_11 = arith.constant 0 : index
    %c0_12 = arith.constant 0 : index
    %c0_13 = arith.constant 0 : index
    %9 = vector.load %arg5[%c0_11, %c0_12, %c0_13] : memref<7x32x64xf32, #tpu.memory_space<vmem>>, vector<1x32x64xf32>
    %10 = vector.shape_cast %9 : vector<1x32x64xf32> to vector<32x64xf32>
    %cst_14 = arith.constant dense<0.000000e+00> : vector<8x64xf32>
    %11 = tpu.matmul %5, %10, %cst_14 {dimension_numbers = #tpu.dot_dimension_numbers<[1], [0], [0], [1], [0, 0, 1, 1], [], []>} : vector<8x32xf32>, vector<32x64xf32>, vector<8x64xf32> -> vector<8x64xf32>
    %12 = vector.extract_strided_slice %11 {offsets = [0, 0], sizes = [8, 32], strides = [1, 1]} : vector<8x64xf32> to vector<8x32xf32>
    %13 = vector.extract_strided_slice %11 {offsets = [0, 32], sizes = [8, 32], strides = [1, 1]} : vector<8x64xf32> to vector<8x32xf32>
    %14 = vector.extract_strided_slice %8 {offsets = [0, 0], sizes = [8, 8], strides = [1, 1]} : vector<8x32xf32> to vector<8x8xf32>
    %15 = vector.extract_strided_slice %12 {offsets = [0, 0], sizes = [8, 8], strides = [1, 1]} : vector<8x32xf32> to vector<8x8xf32>
    %cst_15 = arith.constant dense<0.000000e+00> : vector<8x8xf32>
    %16 = tpu.matmul %14, %15, %cst_15 {dimension_numbers = #tpu.dot_dimension_numbers<[1], [1], [0], [0], [0, 0, 1, 0], [], []>} : vector<8x8xf32>, vector<8x8xf32>, vector<8x8xf32> -> vector<8x8xf32>
    %cst_16 = arith.constant 0.353553385 : f32
    %17 = vector.broadcast %cst_16 : f32 to vector<8x8xf32>
    %18 = arith.mulf %16, %17 : vector<8x8xf32>
    %cst_17 = arith.constant dense<0xFF800000> : vector<8xf32>
    %19 = vector.multi_reduction <maximumf>, %18, %cst_17 [1] : vector<8x8xf32> to vector<8xf32>
    %20 = vector.shape_cast %19 : vector<8xf32> to vector<8x1xf32>
    %21 = vector.broadcast %20 : vector<8x1xf32> to vector<8x8xf32>
    %22 = arith.subf %18, %21 : vector<8x8xf32>
    %23 = math.exp %22 : vector<8x8xf32>
    %cst_18 = arith.constant dense<0.000000e+00> : vector<8xf32>
    %24 = vector.multi_reduction <add>, %23, %cst_18 [1] : vector<8x8xf32> to vector<8xf32>
    %25 = vector.shape_cast %24 : vector<8xf32> to vector<8x1xf32>
    %26 = tpu.reciprocal %25 {approx = true} : vector<8x1xf32> -> vector<8x1xf32>
    %27 = vector.broadcast %26 : vector<8x1xf32> to vector<8x8xf32>
    %28 = arith.mulf %23, %27 : vector<8x8xf32>
    %29 = vector.extract_strided_slice %13 {offsets = [0, 0], sizes = [8, 8], strides = [1, 1]} : vector<8x32xf32> to vector<8x8xf32>
    %cst_19 = arith.constant dense<0.000000e+00> : vector<8x8xf32>
    %30 = tpu.matmul %28, %29, %cst_19 {dimension_numbers = #tpu.dot_dimension_numbers<[1], [0], [0], [1], [0, 0, 1, 1], [], []>} : vector<8x8xf32>, vector<8x8xf32>, vector<8x8xf32> -> vector<8x8xf32>
    %c0_20 = arith.constant 0 : index
    %c0_21 = arith.constant 0 : index
    %31 = vector.load %arg19[%c0_20, %c0_21] : memref<8x32xf32, #tpu.memory_space<vmem>>, vector<8x8xf32>
    tpu.vector_store %arg19[%c0_20, %c0_21], %30 {strides = array<i32>} : memref<8x32xf32, #tpu.memory_space<vmem>>, vector<8x8xf32>,
    %32 = vector.extract_strided_slice %8 {offsets = [0, 8], sizes = [8, 8], strides = [1, 1]} : vector<8x32xf32> to vector<8x8xf32>
    %33 = vector.extract_strided_slice %12 {offsets = [0, 8], sizes = [8, 8], strides = [1, 1]} : vector<8x32xf32> to vector<8x8xf32>
    %cst_22 = arith.constant dense<0.000000e+00> : vector<8x8xf32>
    %34 = tpu.matmul %32, %33, %cst_22 {dimension_numbers = #tpu.dot_dimension_numbers<[1], [1], [0], [0], [0, 0, 1, 0], [], []>} : vector<8x8xf32>, vector<8x8xf32>, vector<8x8xf32> -> vector<8x8xf32>
    %cst_23 = arith.constant 0.353553385 : f32
    %35 = vector.broadcast %cst_23 : f32 to vector<8x8xf32>
    %36 = arith.mulf %34, %35 : vector<8x8xf32>
    %cst_24 = arith.constant dense<0xFF800000> : vector<8xf32>
    %37 = vector.multi_reduction <maximumf>, %36, %cst_24 [1] : vector<8x8xf32> to vector<8xf32>
    %38 = vector.shape_cast %37 : vector<8xf32> to vector<8x1xf32>
    %39 = vector.broadcast %38 : vector<8x1xf32> to vector<8x8xf32>
    %40 = arith.subf %36, %39 : vector<8x8xf32>
    %41 = math.exp %40 : vector<8x8xf32>
    %cst_25 = arith.constant dense<0.000000e+00> : vector<8xf32>
    %42 = vector.multi_reduction <add>, %41, %cst_25 [1] : vector<8x8xf32> to vector<8xf32>
    %43 = vector.shape_cast %42 : vector<8xf32> to vector<8x1xf32>
    %44 = tpu.reciprocal %43 {approx = true} : vector<8x1xf32> -> vector<8x1xf32>
    %45 = vector.broadcast %44 : vector<8x1xf32> to vector<8x8xf32>
    %46 = arith.mulf %41, %45 : vector<8x8xf32>
    %47 = vector.extract_strided_slice %13 {offsets = [0, 8], sizes = [8, 8], strides = [1, 1]} : vector<8x32xf32> to vector<8x8xf32>
    %cst_26 = arith.constant dense<0.000000e+00> : vector<8x8xf32>
    %48 = tpu.matmul %46, %47, %cst_26 {dimension_numbers = #tpu.dot_dimension_numbers<[1], [0], [0], [1], [0, 0, 1, 1], [], []>} : vector<8x8xf32>, vector<8x8xf32>, vector<8x8xf32> -> vector<8x8xf32>
    %c0_27 = arith.constant 0 : index
    %c8 = arith.constant 8 : index
    %49 = vector.load %arg19[%c0_27, %c8] : memref<8x32xf32, #tpu.memory_space<vmem>>, vector<8x8xf32>
    tpu.vector_store %arg19[%c0_27, %c8], %48 {strides = array<i32>} : memref<8x32xf32, #tpu.memory_space<vmem>>, vector<8x8xf32>,
    %50 = vector.extract_strided_slice %8 {offsets = [0, 16], sizes = [8, 8], strides = [1, 1]} : vector<8x32xf32> to vector<8x8xf32>
    %51 = vector.extract_strided_slice %12 {offsets = [0, 16], sizes = [8, 8], strides = [1, 1]} : vector<8x32xf32> to vector<8x8xf32>
    %cst_28 = arith.constant dense<0.000000e+00> : vector<8x8xf32>
    %52 = tpu.matmul %50, %51, %cst_28 {dimension_numbers = #tpu.dot_dimension_numbers<[1], [1], [0], [0], [0, 0, 1, 0], [], []>} : vector<8x8xf32>, vector<8x8xf32>, vector<8x8xf32> -> vector<8x8xf32>
    %cst_29 = arith.constant 0.353553385 : f32
    %53 = vector.broadcast %cst_29 : f32 to vector<8x8xf32>
    %54 = arith.mulf %52, %53 : vector<8x8xf32>
    %cst_30 = arith.constant dense<0xFF800000> : vector<8xf32>
    %55 = vector.multi_reduction <maximumf>, %54, %cst_30 [1] : vector<8x8xf32> to vector<8xf32>
    %56 = vector.shape_cast %55 : vector<8xf32> to vector<8x1xf32>
    %57 = vector.broadcast %56 : vector<8x1xf32> to vector<8x8xf32>
    %58 = arith.subf %54, %57 : vector<8x8xf32>
    %59 = math.exp %58 : vector<8x8xf32>
    %cst_31 = arith.constant dense<0.000000e+00> : vector<8xf32>
    %60 = vector.multi_reduction <add>, %59, %cst_31 [1] : vector<8x8xf32> to vector<8xf32>
    %61 = vector.shape_cast %60 : vector<8xf32> to vector<8x1xf32>
    %62 = tpu.reciprocal %61 {approx = true} : vector<8x1xf32> -> vector<8x1xf32>
    %63 = vector.broadcast %62 : vector<8x1xf32> to vector<8x8xf32>
    %64 = arith.mulf %59, %63 : vector<8x8xf32>
    %65 = vector.extract_strided_slice %13 {offsets = [0, 16], sizes = [8, 8], strides = [1, 1]} : vector<8x32xf32> to vector<8x8xf32>
    %cst_32 = arith.constant dense<0.000000e+00> : vector<8x8xf32>
    %66 = tpu.matmul %64, %65, %cst_32 {dimension_numbers = #tpu.dot_dimension_numbers<[1], [0], [0], [1], [0, 0, 1, 1], [], []>} : vector<8x8xf32>, vector<8x8xf32>, vector<8x8xf32> -> vector<8x8xf32>
    %c0_33 = arith.constant 0 : index
    %c16 = arith.constant 16 : index
    %67 = vector.load %arg19[%c0_33, %c16] : memref<8x32xf32, #tpu.memory_space<vmem>>, vector<8x8xf32>
    tpu.vector_store %arg19[%c0_33, %c16], %66 {strides = array<i32>} : memref<8x32xf32, #tpu.memory_space<vmem>>, vector<8x8xf32>,
    %68 = vector.extract_strided_slice %8 {offsets = [0, 24], sizes = [8, 8], strides = [1, 1]} : vector<8x32xf32> to vector<8x8xf32>
    %69 = vector.extract_strided_slice %12 {offsets = [0, 24], sizes = [8, 8], strides = [1, 1]} : vector<8x32xf32> to vector<8x8xf32>
    %cst_34 = arith.constant dense<0.000000e+00> : vector<8x8xf32>
    %70 = tpu.matmul %68, %69, %cst_34 {dimension_numbers = #tpu.dot_dimension_numbers<[1], [1], [0], [0], [0, 0, 1, 0], [], []>} : vector<8x8xf32>, vector<8x8xf32>, vector<8x8xf32> -> vector<8x8xf32>
    %cst_35 = arith.constant 0.353553385 : f32
    %71 = vector.broadcast %cst_35 : f32 to vector<8x8xf32>
    %72 = arith.mulf %70, %71 : vector<8x8xf32>
    %cst_36 = arith.constant dense<0xFF800000> : vector<8xf32>
    %73 = vector.multi_reduction <maximumf>, %72, %cst_36 [1] : vector<8x8xf32> to vector<8xf32>
    %74 = vector.shape_cast %73 : vector<8xf32> to vector<8x1xf32>
    %75 = vector.broadcast %74 : vector<8x1xf32> to vector<8x8xf32>
    %76 = arith.subf %72, %75 : vector<8x8xf32>
    %77 = math.exp %76 : vector<8x8xf32>
    %cst_37 = arith.constant dense<0.000000e+00> : vector<8xf32>
    %78 = vector.multi_reduction <add>, %77, %cst_37 [1] : vector<8x8xf32> to vector<8xf32>
    %79 = vector.shape_cast %78 : vector<8xf32> to vector<8x1xf32>
    %80 = tpu.reciprocal %79 {approx = true} : vector<8x1xf32> -> vector<8x1xf32>
    %81 = vector.broadcast %80 : vector<8x1xf32> to vector<8x8xf32>
    %82 = arith.mulf %77, %81 : vector<8x8xf32>
    %83 = vector.extract_strided_slice %13 {offsets = [0, 24], sizes = [8, 8], strides = [1, 1]} : vector<8x32xf32> to vector<8x8xf32>
    %cst_38 = arith.constant dense<0.000000e+00> : vector<8x8xf32>
    %84 = tpu.matmul %82, %83, %cst_38 {dimension_numbers = #tpu.dot_dimension_numbers<[1], [0], [0], [1], [0, 0, 1, 1], [], []>} : vector<8x8xf32>, vector<8x8xf32>, vector<8x8xf32> -> vector<8x8xf32>
    %c0_39 = arith.constant 0 : index
    %c24 = arith.constant 24 : index
    %85 = vector.load %arg19[%c0_39, %c24] : memref<8x32xf32, #tpu.memory_space<vmem>>, vector<8x8xf32>
    tpu.vector_store %arg19[%c0_39, %c24], %84 {strides = array<i32>} : memref<8x32xf32, #tpu.memory_space<vmem>>, vector<8x8xf32>,
    %c0_40 = arith.constant 0 : index
    %c0_41 = arith.constant 0 : index
    %86 = vector.load %arg19[%c0_40, %c0_41] : memref<8x32xf32, #tpu.memory_space<vmem>>, vector<8x32xf32>
    %c0_42 = arith.constant 0 : index
    %c0_43 = arith.constant 0 : index
    %c0_44 = arith.constant 0 : index
    %87 = vector.load %arg6[%c0_42, %c0_43, %c0_44] : memref<7x32x32xf32, #tpu.memory_space<vmem>>, vector<1x32x32xf32>
    %88 = vector.shape_cast %87 : vector<1x32x32xf32> to vector<32x32xf32>
    %cst_45 = arith.constant dense<0.000000e+00> : vector<8x32xf32>
    %89 = tpu.matmul %86, %88, %cst_45 {dimension_numbers = #tpu.dot_dimension_numbers<[1], [0], [0], [1], [0, 0, 1, 1], [], []>} : vector<8x32xf32>, vector<32x32xf32>, vector<8x32xf32> -> vector<8x32xf32>
    %c0_46 = arith.constant 0 : index
    %c0_47 = arith.constant 0 : index
    %c0_48 = arith.constant 0 : index
    %90 = vector.load %arg7[%c0_46, %c0_47, %c0_48] : memref<7x1x32xf32, #tpu.memory_space<vmem>>, vector<1x1x32xf32>
    %91 = vector.shape_cast %90 : vector<1x1x32xf32> to vector<1x32xf32>
    %92 = vector.broadcast %91 : vector<1x32xf32> to vector<8x32xf32>
    %93 = arith.addf %89, %92 : vector<8x32xf32>
    %c0_49 = arith.constant 0 : index
    %c0_50 = arith.constant 0 : index
    %94 = memref.load %arg12[%c0_49, %c0_50] : memref<7x2xf32, #tpu.memory_space<smem>>
    %95 = vector.broadcast %94 : f32 to vector<8x32xf32>
    %96 = arith.mulf %93, %95 : vector<8x32xf32>
    %97 = arith.addf %5, %96 : vector<8x32xf32>
    %c0_51 = arith.constant 0 : index
    %c0_52 = arith.constant 0 : index
    %c0_53 = arith.constant 0 : index
    %98 = vector.load %arg8[%c0_51, %c0_52, %c0_53] : memref<7x32x64xf32, #tpu.memory_space<vmem>>, vector<1x32x64xf32>
    %99 = vector.shape_cast %98 : vector<1x32x64xf32> to vector<32x64xf32>
    %cst_54 = arith.constant dense<0.000000e+00> : vector<8x64xf32>
    %100 = tpu.matmul %97, %99, %cst_54 {dimension_numbers = #tpu.dot_dimension_numbers<[1], [0], [0], [1], [0, 0, 1, 1], [], []>} : vector<8x32xf32>, vector<32x64xf32>, vector<8x64xf32> -> vector<8x64xf32>
    %c0_55 = arith.constant 0 : index
    %c0_56 = arith.constant 0 : index
    %c0_57 = arith.constant 0 : index
    %101 = vector.load %arg9[%c0_55, %c0_56, %c0_57] : memref<7x1x64xf32, #tpu.memory_space<vmem>>, vector<1x1x64xf32>
    %102 = vector.shape_cast %101 : vector<1x1x64xf32> to vector<1x64xf32>
    %103 = vector.broadcast %102 : vector<1x64xf32> to vector<8x64xf32>
    %104 = arith.addf %100, %103 : vector<8x64xf32>
    %cst_58 = arith.constant 0.000000e+00 : f32
    %105 = vector.broadcast %cst_58 : f32 to vector<8x64xf32>
    %106 = arith.maximumf %104, %105 : vector<8x64xf32>
    %c0_59 = arith.constant 0 : index
    %c0_60 = arith.constant 0 : index
    %c0_61 = arith.constant 0 : index
    %107 = vector.load %arg10[%c0_59, %c0_60, %c0_61] : memref<7x64x32xf32, #tpu.memory_space<vmem>>, vector<1x64x32xf32>
    %108 = vector.shape_cast %107 : vector<1x64x32xf32> to vector<64x32xf32>
    %cst_62 = arith.constant dense<0.000000e+00> : vector<8x32xf32>
    %109 = tpu.matmul %106, %108, %cst_62 {dimension_numbers = #tpu.dot_dimension_numbers<[1], [0], [0], [1], [0, 0, 1, 1], [], []>} : vector<8x64xf32>, vector<64x32xf32>, vector<8x32xf32> -> vector<8x32xf32>
    %c0_63 = arith.constant 0 : index
    %c0_64 = arith.constant 0 : index
    %c0_65 = arith.constant 0 : index
    %110 = vector.load %arg11[%c0_63, %c0_64, %c0_65] : memref<7x1x32xf32, #tpu.memory_space<vmem>>, vector<1x1x32xf32>
    %111 = vector.shape_cast %110 : vector<1x1x32xf32> to vector<1x32xf32>
    %112 = vector.broadcast %111 : vector<1x32xf32> to vector<8x32xf32>
    %113 = arith.addf %109, %112 : vector<8x32xf32>
    %c0_66 = arith.constant 0 : index
    %c1 = arith.constant 1 : index
    %114 = memref.load %arg12[%c0_66, %c1] : memref<7x2xf32, #tpu.memory_space<smem>>
    %115 = vector.broadcast %114 : f32 to vector<8x32xf32>
    %116 = arith.mulf %113, %115 : vector<8x32xf32>
    %117 = arith.addf %97, %116 : vector<8x32xf32>
    %c1_67 = arith.constant 1 : index
    %c0_68 = arith.constant 0 : index
    %c0_69 = arith.constant 0 : index
    %118 = vector.load %arg4[%c1_67, %c0_68, %c0_69] : memref<7x32x32xf32, #tpu.memory_space<vmem>>, vector<1x32x32xf32>
    %119 = vector.shape_cast %118 : vector<1x32x32xf32> to vector<32x32xf32>
    %cst_70 = arith.constant dense<0.000000e+00> : vector<3x32xf32>
    %120 = tpu.matmul %3, %119, %cst_70 {dimension_numbers = #tpu.dot_dimension_numbers<[1], [0], [0], [1], [0, 0, 1, 1], [], []>} : vector<3x32xf32>, vector<32x32xf32>, vector<3x32xf32> -> vector<3x32xf32>
    %c1_71 = arith.constant 1 : index
    %c0_72 = arith.constant 0 : index
    %c0_73 = arith.constant 0 : index
    %121 = vector.load %arg5[%c1_71, %c0_72, %c0_73] : memref<7x32x64xf32, #tpu.memory_space<vmem>>, vector<1x32x64xf32>
    %122 = vector.shape_cast %121 : vector<1x32x64xf32> to vector<32x64xf32>
    %cst_74 = arith.constant dense<0.000000e+00> : vector<8x64xf32>
    %123 = tpu.matmul %117, %122, %cst_74 {dimension_numbers = #tpu.dot_dimension_numbers<[1], [0], [0], [1], [0, 0, 1, 1], [], []>} : vector<8x32xf32>, vector<32x64xf32>, vector<8x64xf32> -> vector<8x64xf32>
    %124 = vector.extract_strided_slice %123 {offsets = [0, 0], sizes = [8, 32], strides = [1, 1]} : vector<8x64xf32> to vector<8x32xf32>
    %125 = vector.extract_strided_slice %123 {offsets = [0, 32], sizes = [8, 32], strides = [1, 1]} : vector<8x64xf32> to vector<8x32xf32>
    %126 = vector.extract_strided_slice %120 {offsets = [0, 0], sizes = [3, 8], strides = [1, 1]} : vector<3x32xf32> to vector<3x8xf32>
    %127 = vector.extract_strided_slice %124 {offsets = [0, 0], sizes = [8, 8], strides = [1, 1]} : vector<8x32xf32> to vector<8x8xf32>
    %cst_75 = arith.constant dense<0.000000e+00> : vector<3x8xf32>
    %128 = tpu.matmul %126, %127, %cst_75 {dimension_numbers = #tpu.dot_dimension_numbers<[1], [1], [0], [0], [0, 0, 1, 0], [], []>} : vector<3x8xf32>, vector<8x8xf32>, vector<3x8xf32> -> vector<3x8xf32>
    %cst_76 = arith.constant 0.353553385 : f32
    %129 = vector.broadcast %cst_76 : f32 to vector<3x8xf32>
    %130 = arith.mulf %128, %129 : vector<3x8xf32>
    %cst_77 = arith.constant dense<0xFF800000> : vector<3xf32>
    %131 = vector.multi_reduction <maximumf>, %130, %cst_77 [1] : vector<3x8xf32> to vector<3xf32>
    %132 = vector.shape_cast %131 : vector<3xf32> to vector<3x1xf32>
    %133 = vector.broadcast %132 : vector<3x1xf32> to vector<3x8xf32>
    %134 = arith.subf %130, %133 : vector<3x8xf32>
    %135 = math.exp %134 : vector<3x8xf32>
    %cst_78 = arith.constant dense<0.000000e+00> : vector<3xf32>
    %136 = vector.multi_reduction <add>, %135, %cst_78 [1] : vector<3x8xf32> to vector<3xf32>
    %137 = vector.shape_cast %136 : vector<3xf32> to vector<3x1xf32>
    %138 = tpu.reciprocal %137 {approx = true} : vector<3x1xf32> -> vector<3x1xf32>
    %139 = vector.broadcast %138 : vector<3x1xf32> to vector<3x8xf32>
    %140 = arith.mulf %135, %139 : vector<3x8xf32>
    %141 = vector.extract_strided_slice %125 {offsets = [0, 0], sizes = [8, 8], strides = [1, 1]} : vector<8x32xf32> to vector<8x8xf32>
    %cst_79 = arith.constant dense<0.000000e+00> : vector<3x8xf32>
    %142 = tpu.matmul %140, %141, %cst_79 {dimension_numbers = #tpu.dot_dimension_numbers<[1], [0], [0], [1], [0, 0, 1, 1], [], []>} : vector<3x8xf32>, vector<8x8xf32>, vector<3x8xf32> -> vector<3x8xf32>
    %c0_80 = arith.constant 0 : index
    %c0_81 = arith.constant 0 : index
    %143 = vector.load %arg19[%c0_80, %c0_81] : memref<8x32xf32, #tpu.memory_space<vmem>>, vector<3x8xf32>
    tpu.vector_store %arg19[%c0_80, %c0_81], %142 {strides = array<i32>} : memref<8x32xf32, #tpu.memory_space<vmem>>, vector<3x8xf32>,
    %144 = vector.extract_strided_slice %120 {offsets = [0, 8], sizes = [3, 8], strides = [1, 1]} : vector<3x32xf32> to vector<3x8xf32>
    %145 = vector.extract_strided_slice %124 {offsets = [0, 8], sizes = [8, 8], strides = [1, 1]} : vector<8x32xf32> to vector<8x8xf32>
    %cst_82 = arith.constant dense<0.000000e+00> : vector<3x8xf32>
    %146 = tpu.matmul %144, %145, %cst_82 {dimension_numbers = #tpu.dot_dimension_numbers<[1], [1], [0], [0], [0, 0, 1, 0], [], []>} : vector<3x8xf32>, vector<8x8xf32>, vector<3x8xf32> -> vector<3x8xf32>
    %cst_83 = arith.constant 0.353553385 : f32
    %147 = vector.broadcast %cst_83 : f32 to vector<3x8xf32>
    %148 = arith.mulf %146, %147 : vector<3x8xf32>
    %cst_84 = arith.constant dense<0xFF800000> : vector<3xf32>
    %149 = vector.multi_reduction <maximumf>, %148, %cst_84 [1] : vector<3x8xf32> to vector<3xf32>
    %150 = vector.shape_cast %149 : vector<3xf32> to vector<3x1xf32>
    %151 = vector.broadcast %150 : vector<3x1xf32> to vector<3x8xf32>
    %152 = arith.subf %148, %151 : vector<3x8xf32>
    %153 = math.exp %152 : vector<3x8xf32>
    %cst_85 = arith.constant dense<0.000000e+00> : vector<3xf32>
    %154 = vector.multi_reduction <add>, %153, %cst_85 [1] : vector<3x8xf32> to vector<3xf32>
    %155 = vector.shape_cast %154 : vector<3xf32> to vector<3x1xf32>
    %156 = tpu.reciprocal %155 {approx = true} : vector<3x1xf32> -> vector<3x1xf32>
    %157 = vector.broadcast %156 : vector<3x1xf32> to vector<3x8xf32>
    %158 = arith.mulf %153, %157 : vector<3x8xf32>
    %159 = vector.extract_strided_slice %125 {offsets = [0, 8], sizes = [8, 8], strides = [1, 1]} : vector<8x32xf32> to vector<8x8xf32>
    %cst_86 = arith.constant dense<0.000000e+00> : vector<3x8xf32>
    %160 = tpu.matmul %158, %159, %cst_86 {dimension_numbers = #tpu.dot_dimension_numbers<[1], [0], [0], [1], [0, 0, 1, 1], [], []>} : vector<3x8xf32>, vector<8x8xf32>, vector<3x8xf32> -> vector<3x8xf32>
    %c0_87 = arith.constant 0 : index
    %c8_88 = arith.constant 8 : index
    %161 = vector.load %arg19[%c0_87, %c8_88] : memref<8x32xf32, #tpu.memory_space<vmem>>, vector<3x8xf32>
    tpu.vector_store %arg19[%c0_87, %c8_88], %160 {strides = array<i32>} : memref<8x32xf32, #tpu.memory_space<vmem>>, vector<3x8xf32>,
    %162 = vector.extract_strided_slice %120 {offsets = [0, 16], sizes = [3, 8], strides = [1, 1]} : vector<3x32xf32> to vector<3x8xf32>
    %163 = vector.extract_strided_slice %124 {offsets = [0, 16], sizes = [8, 8], strides = [1, 1]} : vector<8x32xf32> to vector<8x8xf32>
    %cst_89 = arith.constant dense<0.000000e+00> : vector<3x8xf32>
    %164 = tpu.matmul %162, %163, %cst_89 {dimension_numbers = #tpu.dot_dimension_numbers<[1], [1], [0], [0], [0, 0, 1, 0], [], []>} : vector<3x8xf32>, vector<8x8xf32>, vector<3x8xf32> -> vector<3x8xf32>
    %cst_90 = arith.constant 0.353553385 : f32
    %165 = vector.broadcast %cst_90 : f32 to vector<3x8xf32>
    %166 = arith.mulf %164, %165 : vector<3x8xf32>
    %cst_91 = arith.constant dense<0xFF800000> : vector<3xf32>
    %167 = vector.multi_reduction <maximumf>, %166, %cst_91 [1] : vector<3x8xf32> to vector<3xf32>
    %168 = vector.shape_cast %167 : vector<3xf32> to vector<3x1xf32>
    %169 = vector.broadcast %168 : vector<3x1xf32> to vector<3x8xf32>
    %170 = arith.subf %166, %169 : vector<3x8xf32>
    %171 = math.exp %170 : vector<3x8xf32>
    %cst_92 = arith.constant dense<0.000000e+00> : vector<3xf32>
    %172 = vector.multi_reduction <add>, %171, %cst_92 [1] : vector<3x8xf32> to vector<3xf32>
    %173 = vector.shape_cast %172 : vector<3xf32> to vector<3x1xf32>
    %174 = tpu.reciprocal %173 {approx = true} : vector<3x1xf32> -> vector<3x1xf32>
    %175 = vector.broadcast %174 : vector<3x1xf32> to vector<3x8xf32>
    %176 = arith.mulf %171, %175 : vector<3x8xf32>
    %177 = vector.extract_strided_slice %125 {offsets = [0, 16], sizes = [8, 8], strides = [1, 1]} : vector<8x32xf32> to vector<8x8xf32>
    %cst_93 = arith.constant dense<0.000000e+00> : vector<3x8xf32>
    %178 = tpu.matmul %176, %177, %cst_93 {dimension_numbers = #tpu.dot_dimension_numbers<[1], [0], [0], [1], [0, 0, 1, 1], [], []>} : vector<3x8xf32>, vector<8x8xf32>, vector<3x8xf32> -> vector<3x8xf32>
    %c0_94 = arith.constant 0 : index
    %c16_95 = arith.constant 16 : index
    %179 = vector.load %arg19[%c0_94, %c16_95] : memref<8x32xf32, #tpu.memory_space<vmem>>, vector<3x8xf32>
    tpu.vector_store %arg19[%c0_94, %c16_95], %178 {strides = array<i32>} : memref<8x32xf32, #tpu.memory_space<vmem>>, vector<3x8xf32>,
    %180 = vector.extract_strided_slice %120 {offsets = [0, 24], sizes = [3, 8], strides = [1, 1]} : vector<3x32xf32> to vector<3x8xf32>
    %181 = vector.extract_strided_slice %124 {offsets = [0, 24], sizes = [8, 8], strides = [1, 1]} : vector<8x32xf32> to vector<8x8xf32>
    %cst_96 = arith.constant dense<0.000000e+00> : vector<3x8xf32>
    %182 = tpu.matmul %180, %181, %cst_96 {dimension_numbers = #tpu.dot_dimension_numbers<[1], [1], [0], [0], [0, 0, 1, 0], [], []>} : vector<3x8xf32>, vector<8x8xf32>, vector<3x8xf32> -> vector<3x8xf32>
    %cst_97 = arith.constant 0.353553385 : f32
    %183 = vector.broadcast %cst_97 : f32 to vector<3x8xf32>
    %184 = arith.mulf %182, %183 : vector<3x8xf32>
    %cst_98 = arith.constant dense<0xFF800000> : vector<3xf32>
    %185 = vector.multi_reduction <maximumf>, %184, %cst_98 [1] : vector<3x8xf32> to vector<3xf32>
    %186 = vector.shape_cast %185 : vector<3xf32> to vector<3x1xf32>
    %187 = vector.broadcast %186 : vector<3x1xf32> to vector<3x8xf32>
    %188 = arith.subf %184, %187 : vector<3x8xf32>
    %189 = math.exp %188 : vector<3x8xf32>
    %cst_99 = arith.constant dense<0.000000e+00> : vector<3xf32>
    %190 = vector.multi_reduction <add>, %189, %cst_99 [1] : vector<3x8xf32> to vector<3xf32>
    %191 = vector.shape_cast %190 : vector<3xf32> to vector<3x1xf32>
    %192 = tpu.reciprocal %191 {approx = true} : vector<3x1xf32> -> vector<3x1xf32>
    %193 = vector.broadcast %192 : vector<3x1xf32> to vector<3x8xf32>
    %194 = arith.mulf %189, %193 : vector<3x8xf32>
    %195 = vector.extract_strided_slice %125 {offsets = [0, 24], sizes = [8, 8], strides = [1, 1]} : vector<8x32xf32> to vector<8x8xf32>
    %cst_100 = arith.constant dense<0.000000e+00> : vector<3x8xf32>
    %196 = tpu.matmul %194, %195, %cst_100 {dimension_numbers = #tpu.dot_dimension_numbers<[1], [0], [0], [1], [0, 0, 1, 1], [], []>} : vector<3x8xf32>, vector<8x8xf32>, vector<3x8xf32> -> vector<3x8xf32>
    %c0_101 = arith.constant 0 : index
    %c24_102 = arith.constant 24 : index
    %197 = vector.load %arg19[%c0_101, %c24_102] : memref<8x32xf32, #tpu.memory_space<vmem>>, vector<3x8xf32>
    tpu.vector_store %arg19[%c0_101, %c24_102], %196 {strides = array<i32>} : memref<8x32xf32, #tpu.memory_space<vmem>>, vector<3x8xf32>,
    %c0_103 = arith.constant 0 : index
    %c0_104 = arith.constant 0 : index
    %198 = vector.load %arg19[%c0_103, %c0_104] : memref<8x32xf32, #tpu.memory_space<vmem>>, vector<3x32xf32>
    %c1_105 = arith.constant 1 : index
    %c0_106 = arith.constant 0 : index
    %c0_107 = arith.constant 0 : index
    %199 = vector.load %arg6[%c1_105, %c0_106, %c0_107] : memref<7x32x32xf32, #tpu.memory_space<vmem>>, vector<1x32x32xf32>
    %200 = vector.shape_cast %199 : vector<1x32x32xf32> to vector<32x32xf32>
    %cst_108 = arith.constant dense<0.000000e+00> : vector<3x32xf32>
    %201 = tpu.matmul %198, %200, %cst_108 {dimension_numbers = #tpu.dot_dimension_numbers<[1], [0], [0], [1], [0, 0, 1, 1], [], []>} : vector<3x32xf32>, vector<32x32xf32>, vector<3x32xf32> -> vector<3x32xf32>
    %c1_109 = arith.constant 1 : index
    %c0_110 = arith.constant 0 : index
    %c0_111 = arith.constant 0 : index
    %202 = vector.load %arg7[%c1_109, %c0_110, %c0_111] : memref<7x1x32xf32, #tpu.memory_space<vmem>>, vector<1x1x32xf32>
    %203 = vector.shape_cast %202 : vector<1x1x32xf32> to vector<1x32xf32>
    %204 = vector.broadcast %203 : vector<1x32xf32> to vector<3x32xf32>
    %205 = arith.addf %201, %204 : vector<3x32xf32>
    %c1_112 = arith.constant 1 : index
    %c0_113 = arith.constant 0 : index
    %206 = memref.load %arg12[%c1_112, %c0_113] : memref<7x2xf32, #tpu.memory_space<smem>>
    %207 = vector.broadcast %206 : f32 to vector<3x32xf32>
    %208 = arith.mulf %205, %207 : vector<3x32xf32>
    %209 = arith.addf %3, %208 : vector<3x32xf32>
    %c1_114 = arith.constant 1 : index
    %c0_115 = arith.constant 0 : index
    %c0_116 = arith.constant 0 : index
    %210 = vector.load %arg8[%c1_114, %c0_115, %c0_116] : memref<7x32x64xf32, #tpu.memory_space<vmem>>, vector<1x32x64xf32>
    %211 = vector.shape_cast %210 : vector<1x32x64xf32> to vector<32x64xf32>
    %cst_117 = arith.constant dense<0.000000e+00> : vector<3x64xf32>
    %212 = tpu.matmul %209, %211, %cst_117 {dimension_numbers = #tpu.dot_dimension_numbers<[1], [0], [0], [1], [0, 0, 1, 1], [], []>} : vector<3x32xf32>, vector<32x64xf32>, vector<3x64xf32> -> vector<3x64xf32>
    %c1_118 = arith.constant 1 : index
    %c0_119 = arith.constant 0 : index
    %c0_120 = arith.constant 0 : index
    %213 = vector.load %arg9[%c1_118, %c0_119, %c0_120] : memref<7x1x64xf32, #tpu.memory_space<vmem>>, vector<1x1x64xf32>
    %214 = vector.shape_cast %213 : vector<1x1x64xf32> to vector<1x64xf32>
    %215 = vector.broadcast %214 : vector<1x64xf32> to vector<3x64xf32>
    %216 = arith.addf %212, %215 : vector<3x64xf32>
    %cst_121 = arith.constant 0.000000e+00 : f32
    %217 = vector.broadcast %cst_121 : f32 to vector<3x64xf32>
    %218 = arith.maximumf %216, %217 : vector<3x64xf32>
    %c1_122 = arith.constant 1 : index
    %c0_123 = arith.constant 0 : index
    %c0_124 = arith.constant 0 : index
    %219 = vector.load %arg10[%c1_122, %c0_123, %c0_124] : memref<7x64x32xf32, #tpu.memory_space<vmem>>, vector<1x64x32xf32>
    %220 = vector.shape_cast %219 : vector<1x64x32xf32> to vector<64x32xf32>
    %cst_125 = arith.constant dense<0.000000e+00> : vector<3x32xf32>
    %221 = tpu.matmul %218, %220, %cst_125 {dimension_numbers = #tpu.dot_dimension_numbers<[1], [0], [0], [1], [0, 0, 1, 1], [], []>} : vector<3x64xf32>, vector<64x32xf32>, vector<3x32xf32> -> vector<3x32xf32>
    %c1_126 = arith.constant 1 : index
    %c0_127 = arith.constant 0 : index
    %c0_128 = arith.constant 0 : index
    %222 = vector.load %arg11[%c1_126, %c0_127, %c0_128] : memref<7x1x32xf32, #tpu.memory_space<vmem>>, vector<1x1x32xf32>
    %223 = vector.shape_cast %222 : vector<1x1x32xf32> to vector<1x32xf32>
    %224 = vector.broadcast %223 : vector<1x32xf32> to vector<3x32xf32>
    %225 = arith.addf %221, %224 : vector<3x32xf32>
    %c1_129 = arith.constant 1 : index
    %c1_130 = arith.constant 1 : index
    %226 = memref.load %arg12[%c1_129, %c1_130] : memref<7x2xf32, #tpu.memory_space<smem>>
    %227 = vector.broadcast %226 : f32 to vector<3x32xf32>
    %228 = arith.mulf %225, %227 : vector<3x32xf32>
    %229 = arith.addf %209, %228 : vector<3x32xf32>
    %c2 = arith.constant 2 : index
    %c0_131 = arith.constant 0 : index
    %c0_132 = arith.constant 0 : index
    %230 = vector.load %arg4[%c2, %c0_131, %c0_132] : memref<7x32x32xf32, #tpu.memory_space<vmem>>, vector<1x32x32xf32>
    %231 = vector.shape_cast %230 : vector<1x32x32xf32> to vector<32x32xf32>
    %cst_133 = arith.constant dense<0.000000e+00> : vector<8x32xf32>
    %232 = tpu.matmul %117, %231, %cst_133 {dimension_numbers = #tpu.dot_dimension_numbers<[1], [0], [0], [1], [0, 0, 1, 1], [], []>} : vector<8x32xf32>, vector<32x32xf32>, vector<8x32xf32> -> vector<8x32xf32>
    %c2_134 = arith.constant 2 : index
    %c0_135 = arith.constant 0 : index
    %c0_136 = arith.constant 0 : index
    %233 = vector.load %arg5[%c2_134, %c0_135, %c0_136] : memref<7x32x64xf32, #tpu.memory_space<vmem>>, vector<1x32x64xf32>
    %234 = vector.shape_cast %233 : vector<1x32x64xf32> to vector<32x64xf32>
    %cst_137 = arith.constant dense<0.000000e+00> : vector<3x64xf32>
    %235 = tpu.matmul %229, %234, %cst_137 {dimension_numbers = #tpu.dot_dimension_numbers<[1], [0], [0], [1], [0, 0, 1, 1], [], []>} : vector<3x32xf32>, vector<32x64xf32>, vector<3x64xf32> -> vector<3x64xf32>
    %236 = vector.extract_strided_slice %235 {offsets = [0, 0], sizes = [3, 32], strides = [1, 1]} : vector<3x64xf32> to vector<3x32xf32>
    %237 = vector.extract_strided_slice %235 {offsets = [0, 32], sizes = [3, 32], strides = [1, 1]} : vector<3x64xf32> to vector<3x32xf32>
    %238 = vector.extract_strided_slice %232 {offsets = [0, 0], sizes = [8, 8], strides = [1, 1]} : vector<8x32xf32> to vector<8x8xf32>
    %239 = vector.extract_strided_slice %236 {offsets = [0, 0], sizes = [3, 8], strides = [1, 1]} : vector<3x32xf32> to vector<3x8xf32>
    %cst_138 = arith.constant dense<0.000000e+00> : vector<8x3xf32>
    %240 = tpu.matmul %238, %239, %cst_138 {dimension_numbers = #tpu.dot_dimension_numbers<[1], [1], [0], [0], [0, 0, 1, 0], [], []>} : vector<8x8xf32>, vector<3x8xf32>, vector<8x3xf32> -> vector<8x3xf32>
    %cst_139 = arith.constant 1.000000e+00 : f32
    %241 = vector.broadcast %cst_139 : f32 to vector<8x3xf32>
    %242 = arith.mulf %240, %241 : vector<8x3xf32>
    %cst_140 = arith.constant dense<0xFF800000> : vector<8xf32>
    %243 = vector.multi_reduction <maximumf>, %242, %cst_140 [1] : vector<8x3xf32> to vector<8xf32>
    %244 = vector.shape_cast %243 : vector<8xf32> to vector<8x1xf32>
    %245 = vector.broadcast %244 : vector<8x1xf32> to vector<8x3xf32>
    %246 = arith.subf %242, %245 : vector<8x3xf32>
    %247 = math.exp %246 : vector<8x3xf32>
    %cst_141 = arith.constant dense<0.000000e+00> : vector<8xf32>
    %248 = vector.multi_reduction <add>, %247, %cst_141 [1] : vector<8x3xf32> to vector<8xf32>
    %249 = vector.shape_cast %248 : vector<8xf32> to vector<8x1xf32>
    %250 = tpu.reciprocal %249 {approx = true} : vector<8x1xf32> -> vector<8x1xf32>
    %251 = vector.broadcast %250 : vector<8x1xf32> to vector<8x3xf32>
    %252 = arith.mulf %247, %251 : vector<8x3xf32>
    %253 = vector.extract_strided_slice %237 {offsets = [0, 0], sizes = [3, 8], strides = [1, 1]} : vector<3x32xf32> to vector<3x8xf32>
    %cst_142 = arith.constant dense<0.000000e+00> : vector<8x8xf32>
    %254 = tpu.matmul %252, %253, %cst_142 {dimension_numbers = #tpu.dot_dimension_numbers<[1], [0], [0], [1], [0, 0, 1, 1], [], []>} : vector<8x3xf32>, vector<3x8xf32>, vector<8x8xf32> -> vector<8x8xf32>
    %c0_143 = arith.constant 0 : index
    %c0_144 = arith.constant 0 : index
    %255 = vector.load %arg19[%c0_143, %c0_144] : memref<8x32xf32, #tpu.memory_space<vmem>>, vector<8x8xf32>
    tpu.vector_store %arg19[%c0_143, %c0_144], %254 {strides = array<i32>} : memref<8x32xf32, #tpu.memory_space<vmem>>, vector<8x8xf32>,
    %256 = vector.extract_strided_slice %232 {offsets = [0, 8], sizes = [8, 8], strides = [1, 1]} : vector<8x32xf32> to vector<8x8xf32>
    %257 = vector.extract_strided_slice %236 {offsets = [0, 8], sizes = [3, 8], strides = [1, 1]} : vector<3x32xf32> to vector<3x8xf32>
    %cst_145 = arith.constant dense<0.000000e+00> : vector<8x3xf32>
    %258 = tpu.matmul %256, %257, %cst_145 {dimension_numbers = #tpu.dot_dimension_numbers<[1], [1], [0], [0], [0, 0, 1, 0], [], []>} : vector<8x8xf32>, vector<3x8xf32>, vector<8x3xf32> -> vector<8x3xf32>
    %cst_146 = arith.constant 1.000000e+00 : f32
    %259 = vector.broadcast %cst_146 : f32 to vector<8x3xf32>
    %260 = arith.mulf %258, %259 : vector<8x3xf32>
    %cst_147 = arith.constant dense<0xFF800000> : vector<8xf32>
    %261 = vector.multi_reduction <maximumf>, %260, %cst_147 [1] : vector<8x3xf32> to vector<8xf32>
    %262 = vector.shape_cast %261 : vector<8xf32> to vector<8x1xf32>
    %263 = vector.broadcast %262 : vector<8x1xf32> to vector<8x3xf32>
    %264 = arith.subf %260, %263 : vector<8x3xf32>
    %265 = math.exp %264 : vector<8x3xf32>
    %cst_148 = arith.constant dense<0.000000e+00> : vector<8xf32>
    %266 = vector.multi_reduction <add>, %265, %cst_148 [1] : vector<8x3xf32> to vector<8xf32>
    %267 = vector.shape_cast %266 : vector<8xf32> to vector<8x1xf32>
    %268 = tpu.reciprocal %267 {approx = true} : vector<8x1xf32> -> vector<8x1xf32>
    %269 = vector.broadcast %268 : vector<8x1xf32> to vector<8x3xf32>
    %270 = arith.mulf %265, %269 : vector<8x3xf32>
    %271 = vector.extract_strided_slice %237 {offsets = [0, 8], sizes = [3, 8], strides = [1, 1]} : vector<3x32xf32> to vector<3x8xf32>
    %cst_149 = arith.constant dense<0.000000e+00> : vector<8x8xf32>
    %272 = tpu.matmul %270, %271, %cst_149 {dimension_numbers = #tpu.dot_dimension_numbers<[1], [0], [0], [1], [0, 0, 1, 1], [], []>} : vector<8x3xf32>, vector<3x8xf32>, vector<8x8xf32> -> vector<8x8xf32>
    %c0_150 = arith.constant 0 : index
    %c8_151 = arith.constant 8 : index
    %273 = vector.load %arg19[%c0_150, %c8_151] : memref<8x32xf32, #tpu.memory_space<vmem>>, vector<8x8xf32>
    tpu.vector_store %arg19[%c0_150, %c8_151], %272 {strides = array<i32>} : memref<8x32xf32, #tpu.memory_space<vmem>>, vector<8x8xf32>,
    %274 = vector.extract_strided_slice %232 {offsets = [0, 16], sizes = [8, 8], strides = [1, 1]} : vector<8x32xf32> to vector<8x8xf32>
    %275 = vector.extract_strided_slice %236 {offsets = [0, 16], sizes = [3, 8], strides = [1, 1]} : vector<3x32xf32> to vector<3x8xf32>
    %cst_152 = arith.constant dense<0.000000e+00> : vector<8x3xf32>
    %276 = tpu.matmul %274, %275, %cst_152 {dimension_numbers = #tpu.dot_dimension_numbers<[1], [1], [0], [0], [0, 0, 1, 0], [], []>} : vector<8x8xf32>, vector<3x8xf32>, vector<8x3xf32> -> vector<8x3xf32>
    %cst_153 = arith.constant 1.000000e+00 : f32
    %277 = vector.broadcast %cst_153 : f32 to vector<8x3xf32>
    %278 = arith.mulf %276, %277 : vector<8x3xf32>
    %cst_154 = arith.constant dense<0xFF800000> : vector<8xf32>
    %279 = vector.multi_reduction <maximumf>, %278, %cst_154 [1] : vector<8x3xf32> to vector<8xf32>
    %280 = vector.shape_cast %279 : vector<8xf32> to vector<8x1xf32>
    %281 = vector.broadcast %280 : vector<8x1xf32> to vector<8x3xf32>
    %282 = arith.subf %278, %281 : vector<8x3xf32>
    %283 = math.exp %282 : vector<8x3xf32>
    %cst_155 = arith.constant dense<0.000000e+00> : vector<8xf32>
    %284 = vector.multi_reduction <add>, %283, %cst_155 [1] : vector<8x3xf32> to vector<8xf32>
    %285 = vector.shape_cast %284 : vector<8xf32> to vector<8x1xf32>
    %286 = tpu.reciprocal %285 {approx = true} : vector<8x1xf32> -> vector<8x1xf32>
    %287 = vector.broadcast %286 : vector<8x1xf32> to vector<8x3xf32>
    %288 = arith.mulf %283, %287 : vector<8x3xf32>
    %289 = vector.extract_strided_slice %237 {offsets = [0, 16], sizes = [3, 8], strides = [1, 1]} : vector<3x32xf32> to vector<3x8xf32>
    %cst_156 = arith.constant dense<0.000000e+00> : vector<8x8xf32>
    %290 = tpu.matmul %288, %289, %cst_156 {dimension_numbers = #tpu.dot_dimension_numbers<[1], [0], [0], [1], [0, 0, 1, 1], [], []>} : vector<8x3xf32>, vector<3x8xf32>, vector<8x8xf32> -> vector<8x8xf32>
    %c0_157 = arith.constant 0 : index
    %c16_158 = arith.constant 16 : index
    %291 = vector.load %arg19[%c0_157, %c16_158] : memref<8x32xf32, #tpu.memory_space<vmem>>, vector<8x8xf32>
    tpu.vector_store %arg19[%c0_157, %c16_158], %290 {strides = array<i32>} : memref<8x32xf32, #tpu.memory_space<vmem>>, vector<8x8xf32>,
    %292 = vector.extract_strided_slice %232 {offsets = [0, 24], sizes = [8, 8], strides = [1, 1]} : vector<8x32xf32> to vector<8x8xf32>
    %293 = vector.extract_strided_slice %236 {offsets = [0, 24], sizes = [3, 8], strides = [1, 1]} : vector<3x32xf32> to vector<3x8xf32>
    %cst_159 = arith.constant dense<0.000000e+00> : vector<8x3xf32>
    %294 = tpu.matmul %292, %293, %cst_159 {dimension_numbers = #tpu.dot_dimension_numbers<[1], [1], [0], [0], [0, 0, 1, 0], [], []>} : vector<8x8xf32>, vector<3x8xf32>, vector<8x3xf32> -> vector<8x3xf32>
    %cst_160 = arith.constant 1.000000e+00 : f32
    %295 = vector.broadcast %cst_160 : f32 to vector<8x3xf32>
    %296 = arith.mulf %294, %295 : vector<8x3xf32>
    %cst_161 = arith.constant dense<0xFF800000> : vector<8xf32>
    %297 = vector.multi_reduction <maximumf>, %296, %cst_161 [1] : vector<8x3xf32> to vector<8xf32>
    %298 = vector.shape_cast %297 : vector<8xf32> to vector<8x1xf32>
    %299 = vector.broadcast %298 : vector<8x1xf32> to vector<8x3xf32>
    %300 = arith.subf %296, %299 : vector<8x3xf32>
    %301 = math.exp %300 : vector<8x3xf32>
    %cst_162 = arith.constant dense<0.000000e+00> : vector<8xf32>
    %302 = vector.multi_reduction <add>, %301, %cst_162 [1] : vector<8x3xf32> to vector<8xf32>
    %303 = vector.shape_cast %302 : vector<8xf32> to vector<8x1xf32>
    %304 = tpu.reciprocal %303 {approx = true} : vector<8x1xf32> -> vector<8x1xf32>
    %305 = vector.broadcast %304 : vector<8x1xf32> to vector<8x3xf32>
    %306 = arith.mulf %301, %305 : vector<8x3xf32>
    %307 = vector.extract_strided_slice %237 {offsets = [0, 24], sizes = [3, 8], strides = [1, 1]} : vector<3x32xf32> to vector<3x8xf32>
    %cst_163 = arith.constant dense<0.000000e+00> : vector<8x8xf32>
    %308 = tpu.matmul %306, %307, %cst_163 {dimension_numbers = #tpu.dot_dimension_numbers<[1], [0], [0], [1], [0, 0, 1, 1], [], []>} : vector<8x3xf32>, vector<3x8xf32>, vector<8x8xf32> -> vector<8x8xf32>
    %c0_164 = arith.constant 0 : index
    %c24_165 = arith.constant 24 : index
    %309 = vector.load %arg19[%c0_164, %c24_165] : memref<8x32xf32, #tpu.memory_space<vmem>>, vector<8x8xf32>
    tpu.vector_store %arg19[%c0_164, %c24_165], %308 {strides = array<i32>} : memref<8x32xf32, #tpu.memory_space<vmem>>, vector<8x8xf32>,
    %c0_166 = arith.constant 0 : index
    %c0_167 = arith.constant 0 : index
    %310 = vector.load %arg19[%c0_166, %c0_167] : memref<8x32xf32, #tpu.memory_space<vmem>>, vector<8x32xf32>
    %c2_168 = arith.constant 2 : index
    %c0_169 = arith.constant 0 : index
    %c0_170 = arith.constant 0 : index
    %311 = vector.load %arg6[%c2_168, %c0_169, %c0_170] : memref<7x32x32xf32, #tpu.memory_space<vmem>>, vector<1x32x32xf32>
    %312 = vector.shape_cast %311 : vector<1x32x32xf32> to vector<32x32xf32>
    %cst_171 = arith.constant dense<0.000000e+00> : vector<8x32xf32>
    %313 = tpu.matmul %310, %312, %cst_171 {dimension_numbers = #tpu.dot_dimension_numbers<[1], [0], [0], [1], [0, 0, 1, 1], [], []>} : vector<8x32xf32>, vector<32x32xf32>, vector<8x32xf32> -> vector<8x32xf32>
    %c2_172 = arith.constant 2 : index
    %c0_173 = arith.constant 0 : index
    %c0_174 = arith.constant 0 : index
    %314 = vector.load %arg7[%c2_172, %c0_173, %c0_174] : memref<7x1x32xf32, #tpu.memory_space<vmem>>, vector<1x1x32xf32>
    %315 = vector.shape_cast %314 : vector<1x1x32xf32> to vector<1x32xf32>
    %316 = vector.broadcast %315 : vector<1x32xf32> to vector<8x32xf32>
    %317 = arith.addf %313, %316 : vector<8x32xf32>
    %c2_175 = arith.constant 2 : index
    %c0_176 = arith.constant 0 : index
    %318 = memref.load %arg12[%c2_175, %c0_176] : memref<7x2xf32, #tpu.memory_space<smem>>
    %319 = vector.broadcast %318 : f32 to vector<8x32xf32>
    %320 = arith.mulf %317, %319 : vector<8x32xf32>
    %321 = arith.addf %117, %320 : vector<8x32xf32>
    %c2_177 = arith.constant 2 : index
    %c0_178 = arith.constant 0 : index
    %c0_179 = arith.constant 0 : index
    %322 = vector.load %arg8[%c2_177, %c0_178, %c0_179] : memref<7x32x64xf32, #tpu.memory_space<vmem>>, vector<1x32x64xf32>
    %323 = vector.shape_cast %322 : vector<1x32x64xf32> to vector<32x64xf32>
    %cst_180 = arith.constant dense<0.000000e+00> : vector<8x64xf32>
    %324 = tpu.matmul %321, %323, %cst_180 {dimension_numbers = #tpu.dot_dimension_numbers<[1], [0], [0], [1], [0, 0, 1, 1], [], []>} : vector<8x32xf32>, vector<32x64xf32>, vector<8x64xf32> -> vector<8x64xf32>
    %c2_181 = arith.constant 2 : index
    %c0_182 = arith.constant 0 : index
    %c0_183 = arith.constant 0 : index
    %325 = vector.load %arg9[%c2_181, %c0_182, %c0_183] : memref<7x1x64xf32, #tpu.memory_space<vmem>>, vector<1x1x64xf32>
    %326 = vector.shape_cast %325 : vector<1x1x64xf32> to vector<1x64xf32>
    %327 = vector.broadcast %326 : vector<1x64xf32> to vector<8x64xf32>
    %328 = arith.addf %324, %327 : vector<8x64xf32>
    %cst_184 = arith.constant 0.000000e+00 : f32
    %329 = vector.broadcast %cst_184 : f32 to vector<8x64xf32>
    %330 = arith.maximumf %328, %329 : vector<8x64xf32>
    %c2_185 = arith.constant 2 : index
    %c0_186 = arith.constant 0 : index
    %c0_187 = arith.constant 0 : index
    %331 = vector.load %arg10[%c2_185, %c0_186, %c0_187] : memref<7x64x32xf32, #tpu.memory_space<vmem>>, vector<1x64x32xf32>
    %332 = vector.shape_cast %331 : vector<1x64x32xf32> to vector<64x32xf32>
    %cst_188 = arith.constant dense<0.000000e+00> : vector<8x32xf32>
    %333 = tpu.matmul %330, %332, %cst_188 {dimension_numbers = #tpu.dot_dimension_numbers<[1], [0], [0], [1], [0, 0, 1, 1], [], []>} : vector<8x64xf32>, vector<64x32xf32>, vector<8x32xf32> -> vector<8x32xf32>
    %c2_189 = arith.constant 2 : index
    %c0_190 = arith.constant 0 : index
    %c0_191 = arith.constant 0 : index
    %334 = vector.load %arg11[%c2_189, %c0_190, %c0_191] : memref<7x1x32xf32, #tpu.memory_space<vmem>>, vector<1x1x32xf32>
    %335 = vector.shape_cast %334 : vector<1x1x32xf32> to vector<1x32xf32>
    %336 = vector.broadcast %335 : vector<1x32xf32> to vector<8x32xf32>
    %337 = arith.addf %333, %336 : vector<8x32xf32>
    %c2_192 = arith.constant 2 : index
    %c1_193 = arith.constant 1 : index
    %338 = memref.load %arg12[%c2_192, %c1_193] : memref<7x2xf32, #tpu.memory_space<smem>>
    %339 = vector.broadcast %338 : f32 to vector<8x32xf32>
    %340 = arith.mulf %337, %339 : vector<8x32xf32>
    %341 = arith.addf %321, %340 : vector<8x32xf32>
    %c3 = arith.constant 3 : index
    %c0_194 = arith.constant 0 : index
    %c0_195 = arith.constant 0 : index
    %342 = vector.load %arg4[%c3, %c0_194, %c0_195] : memref<7x32x32xf32, #tpu.memory_space<vmem>>, vector<1x32x32xf32>
    %343 = vector.shape_cast %342 : vector<1x32x32xf32> to vector<32x32xf32>
    %cst_196 = arith.constant dense<0.000000e+00> : vector<4x32xf32>
    %344 = tpu.matmul %1, %343, %cst_196 {dimension_numbers = #tpu.dot_dimension_numbers<[1], [0], [0], [1], [0, 0, 1, 1], [], []>} : vector<4x32xf32>, vector<32x32xf32>, vector<4x32xf32> -> vector<4x32xf32>
    %c3_197 = arith.constant 3 : index
    %c0_198 = arith.constant 0 : index
    %c0_199 = arith.constant 0 : index
    %345 = vector.load %arg5[%c3_197, %c0_198, %c0_199] : memref<7x32x64xf32, #tpu.memory_space<vmem>>, vector<1x32x64xf32>
    %346 = vector.shape_cast %345 : vector<1x32x64xf32> to vector<32x64xf32>
    %cst_200 = arith.constant dense<0.000000e+00> : vector<3x64xf32>
    %347 = tpu.matmul %229, %346, %cst_200 {dimension_numbers = #tpu.dot_dimension_numbers<[1], [0], [0], [1], [0, 0, 1, 1], [], []>} : vector<3x32xf32>, vector<32x64xf32>, vector<3x64xf32> -> vector<3x64xf32>
    %348 = vector.extract_strided_slice %347 {offsets = [0, 0], sizes = [3, 32], strides = [1, 1]} : vector<3x64xf32> to vector<3x32xf32>
    %349 = vector.extract_strided_slice %347 {offsets = [0, 32], sizes = [3, 32], strides = [1, 1]} : vector<3x64xf32> to vector<3x32xf32>
    %350 = vector.extract_strided_slice %344 {offsets = [0, 16], sizes = [4, 16], strides = [1, 1]} : vector<4x32xf32> to vector<4x16xf32>
    %c0_201 = arith.constant 0 : index
    %c0_202 = arith.constant 0 : index
    %351 = vector.load %arg18[%c0_201, %c0_202] : memref<8x32xf32, #tpu.memory_space<vmem>>, vector<4x16xf32>
    tpu.vector_store %arg18[%c0_201, %c0_202], %350 {strides = array<i32>} : memref<8x32xf32, #tpu.memory_space<vmem>>, vector<4x16xf32>,
    %352 = vector.extract_strided_slice %344 {offsets = [0, 0], sizes = [4, 16], strides = [1, 1]} : vector<4x32xf32> to vector<4x16xf32>
    %c0_203 = arith.constant 0 : index
    %c16_204 = arith.constant 16 : index
    %353 = vector.load %arg18[%c0_203, %c16_204] : memref<8x32xf32, #tpu.memory_space<vmem>>, vector<4x16xf32>
    tpu.vector_store %arg18[%c0_203, %c16_204], %352 {strides = array<i32>} : memref<8x32xf32, #tpu.memory_space<vmem>>, vector<4x16xf32>,
    %c0_205 = arith.constant 0 : index
    %c0_206 = arith.constant 0 : index
    %354 = vector.load %arg13[%c0_205, %c0_206] : memref<4x32xf32, #tpu.memory_space<vmem>>, vector<4x32xf32>
    %355 = arith.mulf %344, %354 : vector<4x32xf32>
    %c0_207 = arith.constant 0 : index
    %c0_208 = arith.constant 0 : index
    %356 = vector.load %arg18[%c0_207, %c0_208] : memref<8x32xf32, #tpu.memory_space<vmem>>, vector<4x32xf32>
    %c0_209 = arith.constant 0 : index
    %c0_210 = arith.constant 0 : index
    %357 = vector.load %arg14[%c0_209, %c0_210] : memref<4x32xf32, #tpu.memory_space<vmem>>, vector<4x32xf32>
    %358 = arith.mulf %356, %357 : vector<4x32xf32>
    %359 = arith.addf %355, %358 : vector<4x32xf32>
    %360 = vector.extract_strided_slice %359 {offsets = [0, 0], sizes = [4, 8], strides = [1, 1]} : vector<4x32xf32> to vector<4x8xf32>
    %361 = vector.extract_strided_slice %348 {offsets = [0, 0], sizes = [3, 8], strides = [1, 1]} : vector<3x32xf32> to vector<3x8xf32>
    %cst_211 = arith.constant dense<0.000000e+00> : vector<4x3xf32>
    %362 = tpu.matmul %360, %361, %cst_211 {dimension_numbers = #tpu.dot_dimension_numbers<[1], [1], [0], [0], [0, 0, 1, 0], [], []>} : vector<4x8xf32>, vector<3x8xf32>, vector<4x3xf32> -> vector<4x3xf32>
    %cst_212 = arith.constant 1.000000e+00 : f32
    %363 = vector.broadcast %cst_212 : f32 to vector<4x3xf32>
    %364 = arith.mulf %362, %363 : vector<4x3xf32>
    %cst_213 = arith.constant dense<0xFF800000> : vector<4xf32>
    %365 = vector.multi_reduction <maximumf>, %364, %cst_213 [1] : vector<4x3xf32> to vector<4xf32>
    %366 = vector.shape_cast %365 : vector<4xf32> to vector<4x1xf32>
    %367 = vector.broadcast %366 : vector<4x1xf32> to vector<4x3xf32>
    %368 = arith.subf %364, %367 : vector<4x3xf32>
    %369 = math.exp %368 : vector<4x3xf32>
    %cst_214 = arith.constant dense<0.000000e+00> : vector<4xf32>
    %370 = vector.multi_reduction <add>, %369, %cst_214 [1] : vector<4x3xf32> to vector<4xf32>
    %371 = vector.shape_cast %370 : vector<4xf32> to vector<4x1xf32>
    %372 = tpu.reciprocal %371 {approx = true} : vector<4x1xf32> -> vector<4x1xf32>
    %373 = vector.broadcast %372 : vector<4x1xf32> to vector<4x3xf32>
    %374 = arith.mulf %369, %373 : vector<4x3xf32>
    %375 = vector.extract_strided_slice %349 {offsets = [0, 0], sizes = [3, 8], strides = [1, 1]} : vector<3x32xf32> to vector<3x8xf32>
    %cst_215 = arith.constant dense<0.000000e+00> : vector<4x8xf32>
    %376 = tpu.matmul %374, %375, %cst_215 {dimension_numbers = #tpu.dot_dimension_numbers<[1], [0], [0], [1], [0, 0, 1, 1], [], []>} : vector<4x3xf32>, vector<3x8xf32>, vector<4x8xf32> -> vector<4x8xf32>
    %c0_216 = arith.constant 0 : index
    %c0_217 = arith.constant 0 : index
    %377 = vector.load %arg19[%c0_216, %c0_217] : memref<8x32xf32, #tpu.memory_space<vmem>>, vector<4x8xf32>
    tpu.vector_store %arg19[%c0_216, %c0_217], %376 {strides = array<i32>} : memref<8x32xf32, #tpu.memory_space<vmem>>, vector<4x8xf32>,
    %378 = vector.extract_strided_slice %359 {offsets = [0, 8], sizes = [4, 8], strides = [1, 1]} : vector<4x32xf32> to vector<4x8xf32>
    %379 = vector.extract_strided_slice %348 {offsets = [0, 8], sizes = [3, 8], strides = [1, 1]} : vector<3x32xf32> to vector<3x8xf32>
    %cst_218 = arith.constant dense<0.000000e+00> : vector<4x3xf32>
    %380 = tpu.matmul %378, %379, %cst_218 {dimension_numbers = #tpu.dot_dimension_numbers<[1], [1], [0], [0], [0, 0, 1, 0], [], []>} : vector<4x8xf32>, vector<3x8xf32>, vector<4x3xf32> -> vector<4x3xf32>
    %cst_219 = arith.constant 1.000000e+00 : f32
    %381 = vector.broadcast %cst_219 : f32 to vector<4x3xf32>
    %382 = arith.mulf %380, %381 : vector<4x3xf32>
    %cst_220 = arith.constant dense<0xFF800000> : vector<4xf32>
    %383 = vector.multi_reduction <maximumf>, %382, %cst_220 [1] : vector<4x3xf32> to vector<4xf32>
    %384 = vector.shape_cast %383 : vector<4xf32> to vector<4x1xf32>
    %385 = vector.broadcast %384 : vector<4x1xf32> to vector<4x3xf32>
    %386 = arith.subf %382, %385 : vector<4x3xf32>
    %387 = math.exp %386 : vector<4x3xf32>
    %cst_221 = arith.constant dense<0.000000e+00> : vector<4xf32>
    %388 = vector.multi_reduction <add>, %387, %cst_221 [1] : vector<4x3xf32> to vector<4xf32>
    %389 = vector.shape_cast %388 : vector<4xf32> to vector<4x1xf32>
    %390 = tpu.reciprocal %389 {approx = true} : vector<4x1xf32> -> vector<4x1xf32>
    %391 = vector.broadcast %390 : vector<4x1xf32> to vector<4x3xf32>
    %392 = arith.mulf %387, %391 : vector<4x3xf32>
    %393 = vector.extract_strided_slice %349 {offsets = [0, 8], sizes = [3, 8], strides = [1, 1]} : vector<3x32xf32> to vector<3x8xf32>
    %cst_222 = arith.constant dense<0.000000e+00> : vector<4x8xf32>
    %394 = tpu.matmul %392, %393, %cst_222 {dimension_numbers = #tpu.dot_dimension_numbers<[1], [0], [0], [1], [0, 0, 1, 1], [], []>} : vector<4x3xf32>, vector<3x8xf32>, vector<4x8xf32> -> vector<4x8xf32>
    %c0_223 = arith.constant 0 : index
    %c8_224 = arith.constant 8 : index
    %395 = vector.load %arg19[%c0_223, %c8_224] : memref<8x32xf32, #tpu.memory_space<vmem>>, vector<4x8xf32>
    tpu.vector_store %arg19[%c0_223, %c8_224], %394 {strides = array<i32>} : memref<8x32xf32, #tpu.memory_space<vmem>>, vector<4x8xf32>,
    %396 = vector.extract_strided_slice %359 {offsets = [0, 16], sizes = [4, 8], strides = [1, 1]} : vector<4x32xf32> to vector<4x8xf32>
    %397 = vector.extract_strided_slice %348 {offsets = [0, 16], sizes = [3, 8], strides = [1, 1]} : vector<3x32xf32> to vector<3x8xf32>
    %cst_225 = arith.constant dense<0.000000e+00> : vector<4x3xf32>
    %398 = tpu.matmul %396, %397, %cst_225 {dimension_numbers = #tpu.dot_dimension_numbers<[1], [1], [0], [0], [0, 0, 1, 0], [], []>} : vector<4x8xf32>, vector<3x8xf32>, vector<4x3xf32> -> vector<4x3xf32>
    %cst_226 = arith.constant 1.000000e+00 : f32
    %399 = vector.broadcast %cst_226 : f32 to vector<4x3xf32>
    %400 = arith.mulf %398, %399 : vector<4x3xf32>
    %cst_227 = arith.constant dense<0xFF800000> : vector<4xf32>
    %401 = vector.multi_reduction <maximumf>, %400, %cst_227 [1] : vector<4x3xf32> to vector<4xf32>
    %402 = vector.shape_cast %401 : vector<4xf32> to vector<4x1xf32>
    %403 = vector.broadcast %402 : vector<4x1xf32> to vector<4x3xf32>
    %404 = arith.subf %400, %403 : vector<4x3xf32>
    %405 = math.exp %404 : vector<4x3xf32>
    %cst_228 = arith.constant dense<0.000000e+00> : vector<4xf32>
    %406 = vector.multi_reduction <add>, %405, %cst_228 [1] : vector<4x3xf32> to vector<4xf32>
    %407 = vector.shape_cast %406 : vector<4xf32> to vector<4x1xf32>
    %408 = tpu.reciprocal %407 {approx = true} : vector<4x1xf32> -> vector<4x1xf32>
    %409 = vector.broadcast %408 : vector<4x1xf32> to vector<4x3xf32>
    %410 = arith.mulf %405, %409 : vector<4x3xf32>
    %411 = vector.extract_strided_slice %349 {offsets = [0, 16], sizes = [3, 8], strides = [1, 1]} : vector<3x32xf32> to vector<3x8xf32>
    %cst_229 = arith.constant dense<0.000000e+00> : vector<4x8xf32>
    %412 = tpu.matmul %410, %411, %cst_229 {dimension_numbers = #tpu.dot_dimension_numbers<[1], [0], [0], [1], [0, 0, 1, 1], [], []>} : vector<4x3xf32>, vector<3x8xf32>, vector<4x8xf32> -> vector<4x8xf32>
    %c0_230 = arith.constant 0 : index
    %c16_231 = arith.constant 16 : index
    %413 = vector.load %arg19[%c0_230, %c16_231] : memref<8x32xf32, #tpu.memory_space<vmem>>, vector<4x8xf32>
    tpu.vector_store %arg19[%c0_230, %c16_231], %412 {strides = array<i32>} : memref<8x32xf32, #tpu.memory_space<vmem>>, vector<4x8xf32>,
    %414 = vector.extract_strided_slice %359 {offsets = [0, 24], sizes = [4, 8], strides = [1, 1]} : vector<4x32xf32> to vector<4x8xf32>
    %415 = vector.extract_strided_slice %348 {offsets = [0, 24], sizes = [3, 8], strides = [1, 1]} : vector<3x32xf32> to vector<3x8xf32>
    %cst_232 = arith.constant dense<0.000000e+00> : vector<4x3xf32>
    %416 = tpu.matmul %414, %415, %cst_232 {dimension_numbers = #tpu.dot_dimension_numbers<[1], [1], [0], [0], [0, 0, 1, 0], [], []>} : vector<4x8xf32>, vector<3x8xf32>, vector<4x3xf32> -> vector<4x3xf32>
    %cst_233 = arith.constant 1.000000e+00 : f32
    %417 = vector.broadcast %cst_233 : f32 to vector<4x3xf32>
    %418 = arith.mulf %416, %417 : vector<4x3xf32>
    %cst_234 = arith.constant dense<0xFF800000> : vector<4xf32>
    %419 = vector.multi_reduction <maximumf>, %418, %cst_234 [1] : vector<4x3xf32> to vector<4xf32>
    %420 = vector.shape_cast %419 : vector<4xf32> to vector<4x1xf32>
    %421 = vector.broadcast %420 : vector<4x1xf32> to vector<4x3xf32>
    %422 = arith.subf %418, %421 : vector<4x3xf32>
    %423 = math.exp %422 : vector<4x3xf32>
    %cst_235 = arith.constant dense<0.000000e+00> : vector<4xf32>
    %424 = vector.multi_reduction <add>, %423, %cst_235 [1] : vector<4x3xf32> to vector<4xf32>
    %425 = vector.shape_cast %424 : vector<4xf32> to vector<4x1xf32>
    %426 = tpu.reciprocal %425 {approx = true} : vector<4x1xf32> -> vector<4x1xf32>
    %427 = vector.broadcast %426 : vector<4x1xf32> to vector<4x3xf32>
    %428 = arith.mulf %423, %427 : vector<4x3xf32>
    %429 = vector.extract_strided_slice %349 {offsets = [0, 24], sizes = [3, 8], strides = [1, 1]} : vector<3x32xf32> to vector<3x8xf32>
    %cst_236 = arith.constant dense<0.000000e+00> : vector<4x8xf32>
    %430 = tpu.matmul %428, %429, %cst_236 {dimension_numbers = #tpu.dot_dimension_numbers<[1], [0], [0], [1], [0, 0, 1, 1], [], []>} : vector<4x3xf32>, vector<3x8xf32>, vector<4x8xf32> -> vector<4x8xf32>
    %c0_237 = arith.constant 0 : index
    %c24_238 = arith.constant 24 : index
    %431 = vector.load %arg19[%c0_237, %c24_238] : memref<8x32xf32, #tpu.memory_space<vmem>>, vector<4x8xf32>
    tpu.vector_store %arg19[%c0_237, %c24_238], %430 {strides = array<i32>} : memref<8x32xf32, #tpu.memory_space<vmem>>, vector<4x8xf32>,
    %c0_239 = arith.constant 0 : index
    %c0_240 = arith.constant 0 : index
    %432 = vector.load %arg19[%c0_239, %c0_240] : memref<8x32xf32, #tpu.memory_space<vmem>>, vector<4x32xf32>
    %c3_241 = arith.constant 3 : index
    %c0_242 = arith.constant 0 : index
    %c0_243 = arith.constant 0 : index
    %433 = vector.load %arg6[%c3_241, %c0_242, %c0_243] : memref<7x32x32xf32, #tpu.memory_space<vmem>>, vector<1x32x32xf32>
    %434 = vector.shape_cast %433 : vector<1x32x32xf32> to vector<32x32xf32>
    %cst_244 = arith.constant dense<0.000000e+00> : vector<4x32xf32>
    %435 = tpu.matmul %432, %434, %cst_244 {dimension_numbers = #tpu.dot_dimension_numbers<[1], [0], [0], [1], [0, 0, 1, 1], [], []>} : vector<4x32xf32>, vector<32x32xf32>, vector<4x32xf32> -> vector<4x32xf32>
    %c3_245 = arith.constant 3 : index
    %c0_246 = arith.constant 0 : index
    %c0_247 = arith.constant 0 : index
    %436 = vector.load %arg7[%c3_245, %c0_246, %c0_247] : memref<7x1x32xf32, #tpu.memory_space<vmem>>, vector<1x1x32xf32>
    %437 = vector.shape_cast %436 : vector<1x1x32xf32> to vector<1x32xf32>
    %438 = vector.broadcast %437 : vector<1x32xf32> to vector<4x32xf32>
    %439 = arith.addf %435, %438 : vector<4x32xf32>
    %c3_248 = arith.constant 3 : index
    %c0_249 = arith.constant 0 : index
    %440 = memref.load %arg12[%c3_248, %c0_249] : memref<7x2xf32, #tpu.memory_space<smem>>
    %441 = vector.broadcast %440 : f32 to vector<4x32xf32>
    %442 = arith.mulf %439, %441 : vector<4x32xf32>
    %443 = arith.addf %1, %442 : vector<4x32xf32>
    %c3_250 = arith.constant 3 : index
    %c0_251 = arith.constant 0 : index
    %c0_252 = arith.constant 0 : index
    %444 = vector.load %arg8[%c3_250, %c0_251, %c0_252] : memref<7x32x64xf32, #tpu.memory_space<vmem>>, vector<1x32x64xf32>
    %445 = vector.shape_cast %444 : vector<1x32x64xf32> to vector<32x64xf32>
    %cst_253 = arith.constant dense<0.000000e+00> : vector<4x64xf32>
    %446 = tpu.matmul %443, %445, %cst_253 {dimension_numbers = #tpu.dot_dimension_numbers<[1], [0], [0], [1], [0, 0, 1, 1], [], []>} : vector<4x32xf32>, vector<32x64xf32>, vector<4x64xf32> -> vector<4x64xf32>
    %c3_254 = arith.constant 3 : index
    %c0_255 = arith.constant 0 : index
    %c0_256 = arith.constant 0 : index
    %447 = vector.load %arg9[%c3_254, %c0_255, %c0_256] : memref<7x1x64xf32, #tpu.memory_space<vmem>>, vector<1x1x64xf32>
    %448 = vector.shape_cast %447 : vector<1x1x64xf32> to vector<1x64xf32>
    %449 = vector.broadcast %448 : vector<1x64xf32> to vector<4x64xf32>
    %450 = arith.addf %446, %449 : vector<4x64xf32>
    %cst_257 = arith.constant 0.000000e+00 : f32
    %451 = vector.broadcast %cst_257 : f32 to vector<4x64xf32>
    %452 = arith.maximumf %450, %451 : vector<4x64xf32>
    %c3_258 = arith.constant 3 : index
    %c0_259 = arith.constant 0 : index
    %c0_260 = arith.constant 0 : index
    %453 = vector.load %arg10[%c3_258, %c0_259, %c0_260] : memref<7x64x32xf32, #tpu.memory_space<vmem>>, vector<1x64x32xf32>
    %454 = vector.shape_cast %453 : vector<1x64x32xf32> to vector<64x32xf32>
    %cst_261 = arith.constant dense<0.000000e+00> : vector<4x32xf32>
    %455 = tpu.matmul %452, %454, %cst_261 {dimension_numbers = #tpu.dot_dimension_numbers<[1], [0], [0], [1], [0, 0, 1, 1], [], []>} : vector<4x64xf32>, vector<64x32xf32>, vector<4x32xf32> -> vector<4x32xf32>
    %c3_262 = arith.constant 3 : index
    %c0_263 = arith.constant 0 : index
    %c0_264 = arith.constant 0 : index
    %456 = vector.load %arg11[%c3_262, %c0_263, %c0_264] : memref<7x1x32xf32, #tpu.memory_space<vmem>>, vector<1x1x32xf32>
    %457 = vector.shape_cast %456 : vector<1x1x32xf32> to vector<1x32xf32>
    %458 = vector.broadcast %457 : vector<1x32xf32> to vector<4x32xf32>
    %459 = arith.addf %455, %458 : vector<4x32xf32>
    %c3_265 = arith.constant 3 : index
    %c1_266 = arith.constant 1 : index
    %460 = memref.load %arg12[%c3_265, %c1_266] : memref<7x2xf32, #tpu.memory_space<smem>>
    %461 = vector.broadcast %460 : f32 to vector<4x32xf32>
    %462 = arith.mulf %459, %461 : vector<4x32xf32>
    %463 = arith.addf %443, %462 : vector<4x32xf32>
    %c4 = arith.constant 4 : index
    %c0_267 = arith.constant 0 : index
    %c0_268 = arith.constant 0 : index
    %464 = vector.load %arg4[%c4, %c0_267, %c0_268] : memref<7x32x32xf32, #tpu.memory_space<vmem>>, vector<1x32x32xf32>
    %465 = vector.shape_cast %464 : vector<1x32x32xf32> to vector<32x32xf32>
    %cst_269 = arith.constant dense<0.000000e+00> : vector<3x32xf32>
    %466 = tpu.matmul %229, %465, %cst_269 {dimension_numbers = #tpu.dot_dimension_numbers<[1], [0], [0], [1], [0, 0, 1, 1], [], []>} : vector<3x32xf32>, vector<32x32xf32>, vector<3x32xf32> -> vector<3x32xf32>
    %c4_270 = arith.constant 4 : index
    %c0_271 = arith.constant 0 : index
    %c0_272 = arith.constant 0 : index
    %467 = vector.load %arg5[%c4_270, %c0_271, %c0_272] : memref<7x32x64xf32, #tpu.memory_space<vmem>>, vector<1x32x64xf32>
    %468 = vector.shape_cast %467 : vector<1x32x64xf32> to vector<32x64xf32>
    %cst_273 = arith.constant dense<0.000000e+00> : vector<4x64xf32>
    %469 = tpu.matmul %463, %468, %cst_273 {dimension_numbers = #tpu.dot_dimension_numbers<[1], [0], [0], [1], [0, 0, 1, 1], [], []>} : vector<4x32xf32>, vector<32x64xf32>, vector<4x64xf32> -> vector<4x64xf32>
    %470 = vector.extract_strided_slice %469 {offsets = [0, 0], sizes = [4, 32], strides = [1, 1]} : vector<4x64xf32> to vector<4x32xf32>
    %471 = vector.extract_strided_slice %469 {offsets = [0, 32], sizes = [4, 32], strides = [1, 1]} : vector<4x64xf32> to vector<4x32xf32>
    %472 = vector.extract_strided_slice %470 {offsets = [0, 16], sizes = [4, 16], strides = [1, 1]} : vector<4x32xf32> to vector<4x16xf32>
    %c0_274 = arith.constant 0 : index
    %c0_275 = arith.constant 0 : index
    %473 = vector.load %arg18[%c0_274, %c0_275] : memref<8x32xf32, #tpu.memory_space<vmem>>, vector<4x16xf32>
    tpu.vector_store %arg18[%c0_274, %c0_275], %472 {strides = array<i32>} : memref<8x32xf32, #tpu.memory_space<vmem>>, vector<4x16xf32>,
    %474 = vector.extract_strided_slice %470 {offsets = [0, 0], sizes = [4, 16], strides = [1, 1]} : vector<4x32xf32> to vector<4x16xf32>
    %c0_276 = arith.constant 0 : index
    %c16_277 = arith.constant 16 : index
    %475 = vector.load %arg18[%c0_276, %c16_277] : memref<8x32xf32, #tpu.memory_space<vmem>>, vector<4x16xf32>
    tpu.vector_store %arg18[%c0_276, %c16_277], %474 {strides = array<i32>} : memref<8x32xf32, #tpu.memory_space<vmem>>, vector<4x16xf32>,
    %c0_278 = arith.constant 0 : index
    %c0_279 = arith.constant 0 : index
    %476 = vector.load %arg13[%c0_278, %c0_279] : memref<4x32xf32, #tpu.memory_space<vmem>>, vector<4x32xf32>
    %477 = arith.mulf %470, %476 : vector<4x32xf32>
    %c0_280 = arith.constant 0 : index
    %c0_281 = arith.constant 0 : index
    %478 = vector.load %arg18[%c0_280, %c0_281] : memref<8x32xf32, #tpu.memory_space<vmem>>, vector<4x32xf32>
    %c0_282 = arith.constant 0 : index
    %c0_283 = arith.constant 0 : index
    %479 = vector.load %arg14[%c0_282, %c0_283] : memref<4x32xf32, #tpu.memory_space<vmem>>, vector<4x32xf32>
    %480 = arith.mulf %478, %479 : vector<4x32xf32>
    %481 = arith.addf %477, %480 : vector<4x32xf32>
    %482 = vector.extract_strided_slice %471 {offsets = [0, 16], sizes = [4, 16], strides = [1, 1]} : vector<4x32xf32> to vector<4x16xf32>
    %c0_284 = arith.constant 0 : index
    %c0_285 = arith.constant 0 : index
    %483 = vector.load %arg18[%c0_284, %c0_285] : memref<8x32xf32, #tpu.memory_space<vmem>>, vector<4x16xf32>
    tpu.vector_store %arg18[%c0_284, %c0_285], %482 {strides = array<i32>} : memref<8x32xf32, #tpu.memory_space<vmem>>, vector<4x16xf32>,
    %484 = vector.extract_strided_slice %471 {offsets = [0, 0], sizes = [4, 16], strides = [1, 1]} : vector<4x32xf32> to vector<4x16xf32>
    %c0_286 = arith.constant 0 : index
    %c16_287 = arith.constant 16 : index
    %485 = vector.load %arg18[%c0_286, %c16_287] : memref<8x32xf32, #tpu.memory_space<vmem>>, vector<4x16xf32>
    tpu.vector_store %arg18[%c0_286, %c16_287], %484 {strides = array<i32>} : memref<8x32xf32, #tpu.memory_space<vmem>>, vector<4x16xf32>,
    %c0_288 = arith.constant 0 : index
    %c0_289 = arith.constant 0 : index
    %486 = vector.load %arg13[%c0_288, %c0_289] : memref<4x32xf32, #tpu.memory_space<vmem>>, vector<4x32xf32>
    %487 = arith.mulf %471, %486 : vector<4x32xf32>
    %c0_290 = arith.constant 0 : index
    %c0_291 = arith.constant 0 : index
    %488 = vector.load %arg18[%c0_290, %c0_291] : memref<8x32xf32, #tpu.memory_space<vmem>>, vector<4x32xf32>
    %c0_292 = arith.constant 0 : index
    %c0_293 = arith.constant 0 : index
    %489 = vector.load %arg14[%c0_292, %c0_293] : memref<4x32xf32, #tpu.memory_space<vmem>>, vector<4x32xf32>
    %490 = arith.mulf %488, %489 : vector<4x32xf32>
    %491 = arith.addf %487, %490 : vector<4x32xf32>
    %492 = vector.extract_strided_slice %466 {offsets = [0, 0], sizes = [3, 8], strides = [1, 1]} : vector<3x32xf32> to vector<3x8xf32>
    %493 = vector.extract_strided_slice %481 {offsets = [0, 0], sizes = [4, 8], strides = [1, 1]} : vector<4x32xf32> to vector<4x8xf32>
    %cst_294 = arith.constant dense<0.000000e+00> : vector<3x4xf32>
    %494 = tpu.matmul %492, %493, %cst_294 {dimension_numbers = #tpu.dot_dimension_numbers<[1], [1], [0], [0], [0, 0, 1, 0], [], []>} : vector<3x8xf32>, vector<4x8xf32>, vector<3x4xf32> -> vector<3x4xf32>
    %cst_295 = arith.constant 0.353553385 : f32
    %495 = vector.broadcast %cst_295 : f32 to vector<3x4xf32>
    %496 = arith.mulf %494, %495 : vector<3x4xf32>
    %cst_296 = arith.constant dense<0xFF800000> : vector<3xf32>
    %497 = vector.multi_reduction <maximumf>, %496, %cst_296 [1] : vector<3x4xf32> to vector<3xf32>
    %498 = vector.shape_cast %497 : vector<3xf32> to vector<3x1xf32>
    %499 = vector.broadcast %498 : vector<3x1xf32> to vector<3x4xf32>
    %500 = arith.subf %496, %499 : vector<3x4xf32>
    %501 = math.exp %500 : vector<3x4xf32>
    %cst_297 = arith.constant dense<0.000000e+00> : vector<3xf32>
    %502 = vector.multi_reduction <add>, %501, %cst_297 [1] : vector<3x4xf32> to vector<3xf32>
    %503 = vector.shape_cast %502 : vector<3xf32> to vector<3x1xf32>
    %504 = tpu.reciprocal %503 {approx = true} : vector<3x1xf32> -> vector<3x1xf32>
    %505 = vector.broadcast %504 : vector<3x1xf32> to vector<3x4xf32>
    %506 = arith.mulf %501, %505 : vector<3x4xf32>
    %507 = vector.extract_strided_slice %491 {offsets = [0, 0], sizes = [4, 8], strides = [1, 1]} : vector<4x32xf32> to vector<4x8xf32>
    %cst_298 = arith.constant dense<0.000000e+00> : vector<3x8xf32>
    %508 = tpu.matmul %506, %507, %cst_298 {dimension_numbers = #tpu.dot_dimension_numbers<[1], [0], [0], [1], [0, 0, 1, 1], [], []>} : vector<3x4xf32>, vector<4x8xf32>, vector<3x8xf32> -> vector<3x8xf32>
    %c0_299 = arith.constant 0 : index
    %c0_300 = arith.constant 0 : index
    %509 = vector.load %arg19[%c0_299, %c0_300] : memref<8x32xf32, #tpu.memory_space<vmem>>, vector<3x8xf32>
    tpu.vector_store %arg19[%c0_299, %c0_300], %508 {strides = array<i32>} : memref<8x32xf32, #tpu.memory_space<vmem>>, vector<3x8xf32>,
    %510 = vector.extract_strided_slice %466 {offsets = [0, 8], sizes = [3, 8], strides = [1, 1]} : vector<3x32xf32> to vector<3x8xf32>
    %511 = vector.extract_strided_slice %481 {offsets = [0, 8], sizes = [4, 8], strides = [1, 1]} : vector<4x32xf32> to vector<4x8xf32>
    %cst_301 = arith.constant dense<0.000000e+00> : vector<3x4xf32>
    %512 = tpu.matmul %510, %511, %cst_301 {dimension_numbers = #tpu.dot_dimension_numbers<[1], [1], [0], [0], [0, 0, 1, 0], [], []>} : vector<3x8xf32>, vector<4x8xf32>, vector<3x4xf32> -> vector<3x4xf32>
    %cst_302 = arith.constant 0.353553385 : f32
    %513 = vector.broadcast %cst_302 : f32 to vector<3x4xf32>
    %514 = arith.mulf %512, %513 : vector<3x4xf32>
    %cst_303 = arith.constant dense<0xFF800000> : vector<3xf32>
    %515 = vector.multi_reduction <maximumf>, %514, %cst_303 [1] : vector<3x4xf32> to vector<3xf32>
    %516 = vector.shape_cast %515 : vector<3xf32> to vector<3x1xf32>
    %517 = vector.broadcast %516 : vector<3x1xf32> to vector<3x4xf32>
    %518 = arith.subf %514, %517 : vector<3x4xf32>
    %519 = math.exp %518 : vector<3x4xf32>
    %cst_304 = arith.constant dense<0.000000e+00> : vector<3xf32>
    %520 = vector.multi_reduction <add>, %519, %cst_304 [1] : vector<3x4xf32> to vector<3xf32>
    %521 = vector.shape_cast %520 : vector<3xf32> to vector<3x1xf32>
    %522 = tpu.reciprocal %521 {approx = true} : vector<3x1xf32> -> vector<3x1xf32>
    %523 = vector.broadcast %522 : vector<3x1xf32> to vector<3x4xf32>
    %524 = arith.mulf %519, %523 : vector<3x4xf32>
    %525 = vector.extract_strided_slice %491 {offsets = [0, 8], sizes = [4, 8], strides = [1, 1]} : vector<4x32xf32> to vector<4x8xf32>
    %cst_305 = arith.constant dense<0.000000e+00> : vector<3x8xf32>
    %526 = tpu.matmul %524, %525, %cst_305 {dimension_numbers = #tpu.dot_dimension_numbers<[1], [0], [0], [1], [0, 0, 1, 1], [], []>} : vector<3x4xf32>, vector<4x8xf32>, vector<3x8xf32> -> vector<3x8xf32>
    %c0_306 = arith.constant 0 : index
    %c8_307 = arith.constant 8 : index
    %527 = vector.load %arg19[%c0_306, %c8_307] : memref<8x32xf32, #tpu.memory_space<vmem>>, vector<3x8xf32>
    tpu.vector_store %arg19[%c0_306, %c8_307], %526 {strides = array<i32>} : memref<8x32xf32, #tpu.memory_space<vmem>>, vector<3x8xf32>,
    %528 = vector.extract_strided_slice %466 {offsets = [0, 16], sizes = [3, 8], strides = [1, 1]} : vector<3x32xf32> to vector<3x8xf32>
    %529 = vector.extract_strided_slice %481 {offsets = [0, 16], sizes = [4, 8], strides = [1, 1]} : vector<4x32xf32> to vector<4x8xf32>
    %cst_308 = arith.constant dense<0.000000e+00> : vector<3x4xf32>
    %530 = tpu.matmul %528, %529, %cst_308 {dimension_numbers = #tpu.dot_dimension_numbers<[1], [1], [0], [0], [0, 0, 1, 0], [], []>} : vector<3x8xf32>, vector<4x8xf32>, vector<3x4xf32> -> vector<3x4xf32>
    %cst_309 = arith.constant 0.353553385 : f32
    %531 = vector.broadcast %cst_309 : f32 to vector<3x4xf32>
    %532 = arith.mulf %530, %531 : vector<3x4xf32>
    %cst_310 = arith.constant dense<0xFF800000> : vector<3xf32>
    %533 = vector.multi_reduction <maximumf>, %532, %cst_310 [1] : vector<3x4xf32> to vector<3xf32>
    %534 = vector.shape_cast %533 : vector<3xf32> to vector<3x1xf32>
    %535 = vector.broadcast %534 : vector<3x1xf32> to vector<3x4xf32>
    %536 = arith.subf %532, %535 : vector<3x4xf32>
    %537 = math.exp %536 : vector<3x4xf32>
    %cst_311 = arith.constant dense<0.000000e+00> : vector<3xf32>
    %538 = vector.multi_reduction <add>, %537, %cst_311 [1] : vector<3x4xf32> to vector<3xf32>
    %539 = vector.shape_cast %538 : vector<3xf32> to vector<3x1xf32>
    %540 = tpu.reciprocal %539 {approx = true} : vector<3x1xf32> -> vector<3x1xf32>
    %541 = vector.broadcast %540 : vector<3x1xf32> to vector<3x4xf32>
    %542 = arith.mulf %537, %541 : vector<3x4xf32>
    %543 = vector.extract_strided_slice %491 {offsets = [0, 16], sizes = [4, 8], strides = [1, 1]} : vector<4x32xf32> to vector<4x8xf32>
    %cst_312 = arith.constant dense<0.000000e+00> : vector<3x8xf32>
    %544 = tpu.matmul %542, %543, %cst_312 {dimension_numbers = #tpu.dot_dimension_numbers<[1], [0], [0], [1], [0, 0, 1, 1], [], []>} : vector<3x4xf32>, vector<4x8xf32>, vector<3x8xf32> -> vector<3x8xf32>
    %c0_313 = arith.constant 0 : index
    %c16_314 = arith.constant 16 : index
    %545 = vector.load %arg19[%c0_313, %c16_314] : memref<8x32xf32, #tpu.memory_space<vmem>>, vector<3x8xf32>
    tpu.vector_store %arg19[%c0_313, %c16_314], %544 {strides = array<i32>} : memref<8x32xf32, #tpu.memory_space<vmem>>, vector<3x8xf32>,
    %546 = vector.extract_strided_slice %466 {offsets = [0, 24], sizes = [3, 8], strides = [1, 1]} : vector<3x32xf32> to vector<3x8xf32>
    %547 = vector.extract_strided_slice %481 {offsets = [0, 24], sizes = [4, 8], strides = [1, 1]} : vector<4x32xf32> to vector<4x8xf32>
    %cst_315 = arith.constant dense<0.000000e+00> : vector<3x4xf32>
    %548 = tpu.matmul %546, %547, %cst_315 {dimension_numbers = #tpu.dot_dimension_numbers<[1], [1], [0], [0], [0, 0, 1, 0], [], []>} : vector<3x8xf32>, vector<4x8xf32>, vector<3x4xf32> -> vector<3x4xf32>
    %cst_316 = arith.constant 0.353553385 : f32
    %549 = vector.broadcast %cst_316 : f32 to vector<3x4xf32>
    %550 = arith.mulf %548, %549 : vector<3x4xf32>
    %cst_317 = arith.constant dense<0xFF800000> : vector<3xf32>
    %551 = vector.multi_reduction <maximumf>, %550, %cst_317 [1] : vector<3x4xf32> to vector<3xf32>
    %552 = vector.shape_cast %551 : vector<3xf32> to vector<3x1xf32>
    %553 = vector.broadcast %552 : vector<3x1xf32> to vector<3x4xf32>
    %554 = arith.subf %550, %553 : vector<3x4xf32>
    %555 = math.exp %554 : vector<3x4xf32>
    %cst_318 = arith.constant dense<0.000000e+00> : vector<3xf32>
    %556 = vector.multi_reduction <add>, %555, %cst_318 [1] : vector<3x4xf32> to vector<3xf32>
    %557 = vector.shape_cast %556 : vector<3xf32> to vector<3x1xf32>
    %558 = tpu.reciprocal %557 {approx = true} : vector<3x1xf32> -> vector<3x1xf32>
    %559 = vector.broadcast %558 : vector<3x1xf32> to vector<3x4xf32>
    %560 = arith.mulf %555, %559 : vector<3x4xf32>
    %561 = vector.extract_strided_slice %491 {offsets = [0, 24], sizes = [4, 8], strides = [1, 1]} : vector<4x32xf32> to vector<4x8xf32>
    %cst_319 = arith.constant dense<0.000000e+00> : vector<3x8xf32>
    %562 = tpu.matmul %560, %561, %cst_319 {dimension_numbers = #tpu.dot_dimension_numbers<[1], [0], [0], [1], [0, 0, 1, 1], [], []>} : vector<3x4xf32>, vector<4x8xf32>, vector<3x8xf32> -> vector<3x8xf32>
    %c0_320 = arith.constant 0 : index
    %c24_321 = arith.constant 24 : index
    %563 = vector.load %arg19[%c0_320, %c24_321] : memref<8x32xf32, #tpu.memory_space<vmem>>, vector<3x8xf32>
    tpu.vector_store %arg19[%c0_320, %c24_321], %562 {strides = array<i32>} : memref<8x32xf32, #tpu.memory_space<vmem>>, vector<3x8xf32>,
    %c0_322 = arith.constant 0 : index
    %c0_323 = arith.constant 0 : index
    %564 = vector.load %arg19[%c0_322, %c0_323] : memref<8x32xf32, #tpu.memory_space<vmem>>, vector<3x32xf32>
    %c4_324 = arith.constant 4 : index
    %c0_325 = arith.constant 0 : index
    %c0_326 = arith.constant 0 : index
    %565 = vector.load %arg6[%c4_324, %c0_325, %c0_326] : memref<7x32x32xf32, #tpu.memory_space<vmem>>, vector<1x32x32xf32>
    %566 = vector.shape_cast %565 : vector<1x32x32xf32> to vector<32x32xf32>
    %cst_327 = arith.constant dense<0.000000e+00> : vector<3x32xf32>
    %567 = tpu.matmul %564, %566, %cst_327 {dimension_numbers = #tpu.dot_dimension_numbers<[1], [0], [0], [1], [0, 0, 1, 1], [], []>} : vector<3x32xf32>, vector<32x32xf32>, vector<3x32xf32> -> vector<3x32xf32>
    %c4_328 = arith.constant 4 : index
    %c0_329 = arith.constant 0 : index
    %c0_330 = arith.constant 0 : index
    %568 = vector.load %arg7[%c4_328, %c0_329, %c0_330] : memref<7x1x32xf32, #tpu.memory_space<vmem>>, vector<1x1x32xf32>
    %569 = vector.shape_cast %568 : vector<1x1x32xf32> to vector<1x32xf32>
    %570 = vector.broadcast %569 : vector<1x32xf32> to vector<3x32xf32>
    %571 = arith.addf %567, %570 : vector<3x32xf32>
    %c4_331 = arith.constant 4 : index
    %c0_332 = arith.constant 0 : index
    %572 = memref.load %arg12[%c4_331, %c0_332] : memref<7x2xf32, #tpu.memory_space<smem>>
    %573 = vector.broadcast %572 : f32 to vector<3x32xf32>
    %574 = arith.mulf %571, %573 : vector<3x32xf32>
    %575 = arith.addf %229, %574 : vector<3x32xf32>
    %c4_333 = arith.constant 4 : index
    %c0_334 = arith.constant 0 : index
    %c0_335 = arith.constant 0 : index
    %576 = vector.load %arg8[%c4_333, %c0_334, %c0_335] : memref<7x32x64xf32, #tpu.memory_space<vmem>>, vector<1x32x64xf32>
    %577 = vector.shape_cast %576 : vector<1x32x64xf32> to vector<32x64xf32>
    %cst_336 = arith.constant dense<0.000000e+00> : vector<3x64xf32>
    %578 = tpu.matmul %575, %577, %cst_336 {dimension_numbers = #tpu.dot_dimension_numbers<[1], [0], [0], [1], [0, 0, 1, 1], [], []>} : vector<3x32xf32>, vector<32x64xf32>, vector<3x64xf32> -> vector<3x64xf32>
    %c4_337 = arith.constant 4 : index
    %c0_338 = arith.constant 0 : index
    %c0_339 = arith.constant 0 : index
    %579 = vector.load %arg9[%c4_337, %c0_338, %c0_339] : memref<7x1x64xf32, #tpu.memory_space<vmem>>, vector<1x1x64xf32>
    %580 = vector.shape_cast %579 : vector<1x1x64xf32> to vector<1x64xf32>
    %581 = vector.broadcast %580 : vector<1x64xf32> to vector<3x64xf32>
    %582 = arith.addf %578, %581 : vector<3x64xf32>
    %cst_340 = arith.constant 0.000000e+00 : f32
    %583 = vector.broadcast %cst_340 : f32 to vector<3x64xf32>
    %584 = arith.maximumf %582, %583 : vector<3x64xf32>
    %c4_341 = arith.constant 4 : index
    %c0_342 = arith.constant 0 : index
    %c0_343 = arith.constant 0 : index
    %585 = vector.load %arg10[%c4_341, %c0_342, %c0_343] : memref<7x64x32xf32, #tpu.memory_space<vmem>>, vector<1x64x32xf32>
    %586 = vector.shape_cast %585 : vector<1x64x32xf32> to vector<64x32xf32>
    %cst_344 = arith.constant dense<0.000000e+00> : vector<3x32xf32>
    %587 = tpu.matmul %584, %586, %cst_344 {dimension_numbers = #tpu.dot_dimension_numbers<[1], [0], [0], [1], [0, 0, 1, 1], [], []>} : vector<3x64xf32>, vector<64x32xf32>, vector<3x32xf32> -> vector<3x32xf32>
    %c4_345 = arith.constant 4 : index
    %c0_346 = arith.constant 0 : index
    %c0_347 = arith.constant 0 : index
    %588 = vector.load %arg11[%c4_345, %c0_346, %c0_347] : memref<7x1x32xf32, #tpu.memory_space<vmem>>, vector<1x1x32xf32>
    %589 = vector.shape_cast %588 : vector<1x1x32xf32> to vector<1x32xf32>
    %590 = vector.broadcast %589 : vector<1x32xf32> to vector<3x32xf32>
    %591 = arith.addf %587, %590 : vector<3x32xf32>
    %c4_348 = arith.constant 4 : index
    %c1_349 = arith.constant 1 : index
    %592 = memref.load %arg12[%c4_348, %c1_349] : memref<7x2xf32, #tpu.memory_space<smem>>
    %593 = vector.broadcast %592 : f32 to vector<3x32xf32>
    %594 = arith.mulf %591, %593 : vector<3x32xf32>
    %595 = arith.addf %575, %594 : vector<3x32xf32>
    %c5 = arith.constant 5 : index
    %c0_350 = arith.constant 0 : index
    %c0_351 = arith.constant 0 : index
    %596 = vector.load %arg4[%c5, %c0_350, %c0_351] : memref<7x32x32xf32, #tpu.memory_space<vmem>>, vector<1x32x32xf32>
    %597 = vector.shape_cast %596 : vector<1x32x32xf32> to vector<32x32xf32>
    %cst_352 = arith.constant dense<0.000000e+00> : vector<4x32xf32>
    %598 = tpu.matmul %463, %597, %cst_352 {dimension_numbers = #tpu.dot_dimension_numbers<[1], [0], [0], [1], [0, 0, 1, 1], [], []>} : vector<4x32xf32>, vector<32x32xf32>, vector<4x32xf32> -> vector<4x32xf32>
    %c5_353 = arith.constant 5 : index
    %c0_354 = arith.constant 0 : index
    %c0_355 = arith.constant 0 : index
    %599 = vector.load %arg5[%c5_353, %c0_354, %c0_355] : memref<7x32x64xf32, #tpu.memory_space<vmem>>, vector<1x32x64xf32>
    %600 = vector.shape_cast %599 : vector<1x32x64xf32> to vector<32x64xf32>
    %cst_356 = arith.constant dense<0.000000e+00> : vector<8x64xf32>
    %601 = tpu.matmul %341, %600, %cst_356 {dimension_numbers = #tpu.dot_dimension_numbers<[1], [0], [0], [1], [0, 0, 1, 1], [], []>} : vector<8x32xf32>, vector<32x64xf32>, vector<8x64xf32> -> vector<8x64xf32>
    %602 = vector.extract_strided_slice %601 {offsets = [0, 0], sizes = [8, 32], strides = [1, 1]} : vector<8x64xf32> to vector<8x32xf32>
    %603 = vector.extract_strided_slice %601 {offsets = [0, 32], sizes = [8, 32], strides = [1, 1]} : vector<8x64xf32> to vector<8x32xf32>
    %604 = vector.extract_strided_slice %598 {offsets = [0, 16], sizes = [4, 16], strides = [1, 1]} : vector<4x32xf32> to vector<4x16xf32>
    %c0_357 = arith.constant 0 : index
    %c0_358 = arith.constant 0 : index
    %605 = vector.load %arg18[%c0_357, %c0_358] : memref<8x32xf32, #tpu.memory_space<vmem>>, vector<4x16xf32>
    tpu.vector_store %arg18[%c0_357, %c0_358], %604 {strides = array<i32>} : memref<8x32xf32, #tpu.memory_space<vmem>>, vector<4x16xf32>,
    %606 = vector.extract_strided_slice %598 {offsets = [0, 0], sizes = [4, 16], strides = [1, 1]} : vector<4x32xf32> to vector<4x16xf32>
    %c0_359 = arith.constant 0 : index
    %c16_360 = arith.constant 16 : index
    %607 = vector.load %arg18[%c0_359, %c16_360] : memref<8x32xf32, #tpu.memory_space<vmem>>, vector<4x16xf32>
    tpu.vector_store %arg18[%c0_359, %c16_360], %606 {strides = array<i32>} : memref<8x32xf32, #tpu.memory_space<vmem>>, vector<4x16xf32>,
    %c0_361 = arith.constant 0 : index
    %c0_362 = arith.constant 0 : index
    %608 = vector.load %arg13[%c0_361, %c0_362] : memref<4x32xf32, #tpu.memory_space<vmem>>, vector<4x32xf32>
    %609 = arith.mulf %598, %608 : vector<4x32xf32>
    %c0_363 = arith.constant 0 : index
    %c0_364 = arith.constant 0 : index
    %610 = vector.load %arg18[%c0_363, %c0_364] : memref<8x32xf32, #tpu.memory_space<vmem>>, vector<4x32xf32>
    %c0_365 = arith.constant 0 : index
    %c0_366 = arith.constant 0 : index
    %611 = vector.load %arg14[%c0_365, %c0_366] : memref<4x32xf32, #tpu.memory_space<vmem>>, vector<4x32xf32>
    %612 = arith.mulf %610, %611 : vector<4x32xf32>
    %613 = arith.addf %609, %612 : vector<4x32xf32>
    %614 = vector.extract_strided_slice %613 {offsets = [0, 0], sizes = [4, 8], strides = [1, 1]} : vector<4x32xf32> to vector<4x8xf32>
    %615 = vector.extract_strided_slice %602 {offsets = [0, 0], sizes = [8, 8], strides = [1, 1]} : vector<8x32xf32> to vector<8x8xf32>
    %cst_367 = arith.constant dense<0.000000e+00> : vector<4x8xf32>
    %616 = tpu.matmul %614, %615, %cst_367 {dimension_numbers = #tpu.dot_dimension_numbers<[1], [1], [0], [0], [0, 0, 1, 0], [], []>} : vector<4x8xf32>, vector<8x8xf32>, vector<4x8xf32> -> vector<4x8xf32>
    %cst_368 = arith.constant 0.353553385 : f32
    %617 = vector.broadcast %cst_368 : f32 to vector<4x8xf32>
    %618 = arith.mulf %616, %617 : vector<4x8xf32>
    %cst_369 = arith.constant dense<0xFF800000> : vector<4xf32>
    %619 = vector.multi_reduction <maximumf>, %618, %cst_369 [1] : vector<4x8xf32> to vector<4xf32>
    %620 = vector.shape_cast %619 : vector<4xf32> to vector<4x1xf32>
    %621 = vector.broadcast %620 : vector<4x1xf32> to vector<4x8xf32>
    %622 = arith.subf %618, %621 : vector<4x8xf32>
    %623 = math.exp %622 : vector<4x8xf32>
    %cst_370 = arith.constant dense<0.000000e+00> : vector<4xf32>
    %624 = vector.multi_reduction <add>, %623, %cst_370 [1] : vector<4x8xf32> to vector<4xf32>
    %625 = vector.shape_cast %624 : vector<4xf32> to vector<4x1xf32>
    %626 = tpu.reciprocal %625 {approx = true} : vector<4x1xf32> -> vector<4x1xf32>
    %627 = vector.broadcast %626 : vector<4x1xf32> to vector<4x8xf32>
    %628 = arith.mulf %623, %627 : vector<4x8xf32>
    %629 = vector.extract_strided_slice %603 {offsets = [0, 0], sizes = [8, 8], strides = [1, 1]} : vector<8x32xf32> to vector<8x8xf32>
    %cst_371 = arith.constant dense<0.000000e+00> : vector<4x8xf32>
    %630 = tpu.matmul %628, %629, %cst_371 {dimension_numbers = #tpu.dot_dimension_numbers<[1], [0], [0], [1], [0, 0, 1, 1], [], []>} : vector<4x8xf32>, vector<8x8xf32>, vector<4x8xf32> -> vector<4x8xf32>
    %c0_372 = arith.constant 0 : index
    %c0_373 = arith.constant 0 : index
    %631 = vector.load %arg19[%c0_372, %c0_373] : memref<8x32xf32, #tpu.memory_space<vmem>>, vector<4x8xf32>
    tpu.vector_store %arg19[%c0_372, %c0_373], %630 {strides = array<i32>} : memref<8x32xf32, #tpu.memory_space<vmem>>, vector<4x8xf32>,
    %632 = vector.extract_strided_slice %613 {offsets = [0, 8], sizes = [4, 8], strides = [1, 1]} : vector<4x32xf32> to vector<4x8xf32>
    %633 = vector.extract_strided_slice %602 {offsets = [0, 8], sizes = [8, 8], strides = [1, 1]} : vector<8x32xf32> to vector<8x8xf32>
    %cst_374 = arith.constant dense<0.000000e+00> : vector<4x8xf32>
    %634 = tpu.matmul %632, %633, %cst_374 {dimension_numbers = #tpu.dot_dimension_numbers<[1], [1], [0], [0], [0, 0, 1, 0], [], []>} : vector<4x8xf32>, vector<8x8xf32>, vector<4x8xf32> -> vector<4x8xf32>
    %cst_375 = arith.constant 0.353553385 : f32
    %635 = vector.broadcast %cst_375 : f32 to vector<4x8xf32>
    %636 = arith.mulf %634, %635 : vector<4x8xf32>
    %cst_376 = arith.constant dense<0xFF800000> : vector<4xf32>
    %637 = vector.multi_reduction <maximumf>, %636, %cst_376 [1] : vector<4x8xf32> to vector<4xf32>
    %638 = vector.shape_cast %637 : vector<4xf32> to vector<4x1xf32>
    %639 = vector.broadcast %638 : vector<4x1xf32> to vector<4x8xf32>
    %640 = arith.subf %636, %639 : vector<4x8xf32>
    %641 = math.exp %640 : vector<4x8xf32>
    %cst_377 = arith.constant dense<0.000000e+00> : vector<4xf32>
    %642 = vector.multi_reduction <add>, %641, %cst_377 [1] : vector<4x8xf32> to vector<4xf32>
    %643 = vector.shape_cast %642 : vector<4xf32> to vector<4x1xf32>
    %644 = tpu.reciprocal %643 {approx = true} : vector<4x1xf32> -> vector<4x1xf32>
    %645 = vector.broadcast %644 : vector<4x1xf32> to vector<4x8xf32>
    %646 = arith.mulf %641, %645 : vector<4x8xf32>
    %647 = vector.extract_strided_slice %603 {offsets = [0, 8], sizes = [8, 8], strides = [1, 1]} : vector<8x32xf32> to vector<8x8xf32>
    %cst_378 = arith.constant dense<0.000000e+00> : vector<4x8xf32>
    %648 = tpu.matmul %646, %647, %cst_378 {dimension_numbers = #tpu.dot_dimension_numbers<[1], [0], [0], [1], [0, 0, 1, 1], [], []>} : vector<4x8xf32>, vector<8x8xf32>, vector<4x8xf32> -> vector<4x8xf32>
    %c0_379 = arith.constant 0 : index
    %c8_380 = arith.constant 8 : index
    %649 = vector.load %arg19[%c0_379, %c8_380] : memref<8x32xf32, #tpu.memory_space<vmem>>, vector<4x8xf32>
    tpu.vector_store %arg19[%c0_379, %c8_380], %648 {strides = array<i32>} : memref<8x32xf32, #tpu.memory_space<vmem>>, vector<4x8xf32>,
    %650 = vector.extract_strided_slice %613 {offsets = [0, 16], sizes = [4, 8], strides = [1, 1]} : vector<4x32xf32> to vector<4x8xf32>
    %651 = vector.extract_strided_slice %602 {offsets = [0, 16], sizes = [8, 8], strides = [1, 1]} : vector<8x32xf32> to vector<8x8xf32>
    %cst_381 = arith.constant dense<0.000000e+00> : vector<4x8xf32>
    %652 = tpu.matmul %650, %651, %cst_381 {dimension_numbers = #tpu.dot_dimension_numbers<[1], [1], [0], [0], [0, 0, 1, 0], [], []>} : vector<4x8xf32>, vector<8x8xf32>, vector<4x8xf32> -> vector<4x8xf32>
    %cst_382 = arith.constant 0.353553385 : f32
    %653 = vector.broadcast %cst_382 : f32 to vector<4x8xf32>
    %654 = arith.mulf %652, %653 : vector<4x8xf32>
    %cst_383 = arith.constant dense<0xFF800000> : vector<4xf32>
    %655 = vector.multi_reduction <maximumf>, %654, %cst_383 [1] : vector<4x8xf32> to vector<4xf32>
    %656 = vector.shape_cast %655 : vector<4xf32> to vector<4x1xf32>
    %657 = vector.broadcast %656 : vector<4x1xf32> to vector<4x8xf32>
    %658 = arith.subf %654, %657 : vector<4x8xf32>
    %659 = math.exp %658 : vector<4x8xf32>
    %cst_384 = arith.constant dense<0.000000e+00> : vector<4xf32>
    %660 = vector.multi_reduction <add>, %659, %cst_384 [1] : vector<4x8xf32> to vector<4xf32>
    %661 = vector.shape_cast %660 : vector<4xf32> to vector<4x1xf32>
    %662 = tpu.reciprocal %661 {approx = true} : vector<4x1xf32> -> vector<4x1xf32>
    %663 = vector.broadcast %662 : vector<4x1xf32> to vector<4x8xf32>
    %664 = arith.mulf %659, %663 : vector<4x8xf32>
    %665 = vector.extract_strided_slice %603 {offsets = [0, 16], sizes = [8, 8], strides = [1, 1]} : vector<8x32xf32> to vector<8x8xf32>
    %cst_385 = arith.constant dense<0.000000e+00> : vector<4x8xf32>
    %666 = tpu.matmul %664, %665, %cst_385 {dimension_numbers = #tpu.dot_dimension_numbers<[1], [0], [0], [1], [0, 0, 1, 1], [], []>} : vector<4x8xf32>, vector<8x8xf32>, vector<4x8xf32> -> vector<4x8xf32>
    %c0_386 = arith.constant 0 : index
    %c16_387 = arith.constant 16 : index
    %667 = vector.load %arg19[%c0_386, %c16_387] : memref<8x32xf32, #tpu.memory_space<vmem>>, vector<4x8xf32>
    tpu.vector_store %arg19[%c0_386, %c16_387], %666 {strides = array<i32>} : memref<8x32xf32, #tpu.memory_space<vmem>>, vector<4x8xf32>,
    %668 = vector.extract_strided_slice %613 {offsets = [0, 24], sizes = [4, 8], strides = [1, 1]} : vector<4x32xf32> to vector<4x8xf32>
    %669 = vector.extract_strided_slice %602 {offsets = [0, 24], sizes = [8, 8], strides = [1, 1]} : vector<8x32xf32> to vector<8x8xf32>
    %cst_388 = arith.constant dense<0.000000e+00> : vector<4x8xf32>
    %670 = tpu.matmul %668, %669, %cst_388 {dimension_numbers = #tpu.dot_dimension_numbers<[1], [1], [0], [0], [0, 0, 1, 0], [], []>} : vector<4x8xf32>, vector<8x8xf32>, vector<4x8xf32> -> vector<4x8xf32>
    %cst_389 = arith.constant 0.353553385 : f32
    %671 = vector.broadcast %cst_389 : f32 to vector<4x8xf32>
    %672 = arith.mulf %670, %671 : vector<4x8xf32>
    %cst_390 = arith.constant dense<0xFF800000> : vector<4xf32>
    %673 = vector.multi_reduction <maximumf>, %672, %cst_390 [1] : vector<4x8xf32> to vector<4xf32>
    %674 = vector.shape_cast %673 : vector<4xf32> to vector<4x1xf32>
    %675 = vector.broadcast %674 : vector<4x1xf32> to vector<4x8xf32>
    %676 = arith.subf %672, %675 : vector<4x8xf32>
    %677 = math.exp %676 : vector<4x8xf32>
    %cst_391 = arith.constant dense<0.000000e+00> : vector<4xf32>
    %678 = vector.multi_reduction <add>, %677, %cst_391 [1] : vector<4x8xf32> to vector<4xf32>
    %679 = vector.shape_cast %678 : vector<4xf32> to vector<4x1xf32>
    %680 = tpu.reciprocal %679 {approx = true} : vector<4x1xf32> -> vector<4x1xf32>
    %681 = vector.broadcast %680 : vector<4x1xf32> to vector<4x8xf32>
    %682 = arith.mulf %677, %681 : vector<4x8xf32>
    %683 = vector.extract_strided_slice %603 {offsets = [0, 24], sizes = [8, 8], strides = [1, 1]} : vector<8x32xf32> to vector<8x8xf32>
    %cst_392 = arith.constant dense<0.000000e+00> : vector<4x8xf32>
    %684 = tpu.matmul %682, %683, %cst_392 {dimension_numbers = #tpu.dot_dimension_numbers<[1], [0], [0], [1], [0, 0, 1, 1], [], []>} : vector<4x8xf32>, vector<8x8xf32>, vector<4x8xf32> -> vector<4x8xf32>
    %c0_393 = arith.constant 0 : index
    %c24_394 = arith.constant 24 : index
    %685 = vector.load %arg19[%c0_393, %c24_394] : memref<8x32xf32, #tpu.memory_space<vmem>>, vector<4x8xf32>
    tpu.vector_store %arg19[%c0_393, %c24_394], %684 {strides = array<i32>} : memref<8x32xf32, #tpu.memory_space<vmem>>, vector<4x8xf32>,
    %c0_395 = arith.constant 0 : index
    %c0_396 = arith.constant 0 : index
    %686 = vector.load %arg19[%c0_395, %c0_396] : memref<8x32xf32, #tpu.memory_space<vmem>>, vector<4x32xf32>
    %c5_397 = arith.constant 5 : index
    %c0_398 = arith.constant 0 : index
    %c0_399 = arith.constant 0 : index
    %687 = vector.load %arg6[%c5_397, %c0_398, %c0_399] : memref<7x32x32xf32, #tpu.memory_space<vmem>>, vector<1x32x32xf32>
    %688 = vector.shape_cast %687 : vector<1x32x32xf32> to vector<32x32xf32>
    %cst_400 = arith.constant dense<0.000000e+00> : vector<4x32xf32>
    %689 = tpu.matmul %686, %688, %cst_400 {dimension_numbers = #tpu.dot_dimension_numbers<[1], [0], [0], [1], [0, 0, 1, 1], [], []>} : vector<4x32xf32>, vector<32x32xf32>, vector<4x32xf32> -> vector<4x32xf32>
    %c5_401 = arith.constant 5 : index
    %c0_402 = arith.constant 0 : index
    %c0_403 = arith.constant 0 : index
    %690 = vector.load %arg7[%c5_401, %c0_402, %c0_403] : memref<7x1x32xf32, #tpu.memory_space<vmem>>, vector<1x1x32xf32>
    %691 = vector.shape_cast %690 : vector<1x1x32xf32> to vector<1x32xf32>
    %692 = vector.broadcast %691 : vector<1x32xf32> to vector<4x32xf32>
    %693 = arith.addf %689, %692 : vector<4x32xf32>
    %c5_404 = arith.constant 5 : index
    %c0_405 = arith.constant 0 : index
    %694 = memref.load %arg12[%c5_404, %c0_405] : memref<7x2xf32, #tpu.memory_space<smem>>
    %695 = vector.broadcast %694 : f32 to vector<4x32xf32>
    %696 = arith.mulf %693, %695 : vector<4x32xf32>
    %697 = arith.addf %463, %696 : vector<4x32xf32>
    %c5_406 = arith.constant 5 : index
    %c0_407 = arith.constant 0 : index
    %c0_408 = arith.constant 0 : index
    %698 = vector.load %arg8[%c5_406, %c0_407, %c0_408] : memref<7x32x64xf32, #tpu.memory_space<vmem>>, vector<1x32x64xf32>
    %699 = vector.shape_cast %698 : vector<1x32x64xf32> to vector<32x64xf32>
    %cst_409 = arith.constant dense<0.000000e+00> : vector<4x64xf32>
    %700 = tpu.matmul %697, %699, %cst_409 {dimension_numbers = #tpu.dot_dimension_numbers<[1], [0], [0], [1], [0, 0, 1, 1], [], []>} : vector<4x32xf32>, vector<32x64xf32>, vector<4x64xf32> -> vector<4x64xf32>
    %c5_410 = arith.constant 5 : index
    %c0_411 = arith.constant 0 : index
    %c0_412 = arith.constant 0 : index
    %701 = vector.load %arg9[%c5_410, %c0_411, %c0_412] : memref<7x1x64xf32, #tpu.memory_space<vmem>>, vector<1x1x64xf32>
    %702 = vector.shape_cast %701 : vector<1x1x64xf32> to vector<1x64xf32>
    %703 = vector.broadcast %702 : vector<1x64xf32> to vector<4x64xf32>
    %704 = arith.addf %700, %703 : vector<4x64xf32>
    %cst_413 = arith.constant 0.000000e+00 : f32
    %705 = vector.broadcast %cst_413 : f32 to vector<4x64xf32>
    %706 = arith.maximumf %704, %705 : vector<4x64xf32>
    %c5_414 = arith.constant 5 : index
    %c0_415 = arith.constant 0 : index
    %c0_416 = arith.constant 0 : index
    %707 = vector.load %arg10[%c5_414, %c0_415, %c0_416] : memref<7x64x32xf32, #tpu.memory_space<vmem>>, vector<1x64x32xf32>
    %708 = vector.shape_cast %707 : vector<1x64x32xf32> to vector<64x32xf32>
    %cst_417 = arith.constant dense<0.000000e+00> : vector<4x32xf32>
    %709 = tpu.matmul %706, %708, %cst_417 {dimension_numbers = #tpu.dot_dimension_numbers<[1], [0], [0], [1], [0, 0, 1, 1], [], []>} : vector<4x64xf32>, vector<64x32xf32>, vector<4x32xf32> -> vector<4x32xf32>
    %c5_418 = arith.constant 5 : index
    %c0_419 = arith.constant 0 : index
    %c0_420 = arith.constant 0 : index
    %710 = vector.load %arg11[%c5_418, %c0_419, %c0_420] : memref<7x1x32xf32, #tpu.memory_space<vmem>>, vector<1x1x32xf32>
    %711 = vector.shape_cast %710 : vector<1x1x32xf32> to vector<1x32xf32>
    %712 = vector.broadcast %711 : vector<1x32xf32> to vector<4x32xf32>
    %713 = arith.addf %709, %712 : vector<4x32xf32>
    %c5_421 = arith.constant 5 : index
    %c1_422 = arith.constant 1 : index
    %714 = memref.load %arg12[%c5_421, %c1_422] : memref<7x2xf32, #tpu.memory_space<smem>>
    %715 = vector.broadcast %714 : f32 to vector<4x32xf32>
    %716 = arith.mulf %713, %715 : vector<4x32xf32>
    %717 = arith.addf %697, %716 : vector<4x32xf32>
    %c6 = arith.constant 6 : index
    %c0_423 = arith.constant 0 : index
    %c0_424 = arith.constant 0 : index
    %718 = vector.load %arg4[%c6, %c0_423, %c0_424] : memref<7x32x32xf32, #tpu.memory_space<vmem>>, vector<1x32x32xf32>
    %719 = vector.shape_cast %718 : vector<1x32x32xf32> to vector<32x32xf32>
    %cst_425 = arith.constant dense<0.000000e+00> : vector<8x32xf32>
    %720 = tpu.matmul %341, %719, %cst_425 {dimension_numbers = #tpu.dot_dimension_numbers<[1], [0], [0], [1], [0, 0, 1, 1], [], []>} : vector<8x32xf32>, vector<32x32xf32>, vector<8x32xf32> -> vector<8x32xf32>
    %c6_426 = arith.constant 6 : index
    %c0_427 = arith.constant 0 : index
    %c0_428 = arith.constant 0 : index
    %721 = vector.load %arg5[%c6_426, %c0_427, %c0_428] : memref<7x32x64xf32, #tpu.memory_space<vmem>>, vector<1x32x64xf32>
    %722 = vector.shape_cast %721 : vector<1x32x64xf32> to vector<32x64xf32>
    %cst_429 = arith.constant dense<0.000000e+00> : vector<4x64xf32>
    %723 = tpu.matmul %717, %722, %cst_429 {dimension_numbers = #tpu.dot_dimension_numbers<[1], [0], [0], [1], [0, 0, 1, 1], [], []>} : vector<4x32xf32>, vector<32x64xf32>, vector<4x64xf32> -> vector<4x64xf32>
    %724 = vector.extract_strided_slice %723 {offsets = [0, 0], sizes = [4, 32], strides = [1, 1]} : vector<4x64xf32> to vector<4x32xf32>
    %725 = vector.extract_strided_slice %723 {offsets = [0, 32], sizes = [4, 32], strides = [1, 1]} : vector<4x64xf32> to vector<4x32xf32>
    %726 = vector.extract_strided_slice %724 {offsets = [0, 16], sizes = [4, 16], strides = [1, 1]} : vector<4x32xf32> to vector<4x16xf32>
    %c0_430 = arith.constant 0 : index
    %c0_431 = arith.constant 0 : index
    %727 = vector.load %arg18[%c0_430, %c0_431] : memref<8x32xf32, #tpu.memory_space<vmem>>, vector<4x16xf32>
    tpu.vector_store %arg18[%c0_430, %c0_431], %726 {strides = array<i32>} : memref<8x32xf32, #tpu.memory_space<vmem>>, vector<4x16xf32>,
    %728 = vector.extract_strided_slice %724 {offsets = [0, 0], sizes = [4, 16], strides = [1, 1]} : vector<4x32xf32> to vector<4x16xf32>
    %c0_432 = arith.constant 0 : index
    %c16_433 = arith.constant 16 : index
    %729 = vector.load %arg18[%c0_432, %c16_433] : memref<8x32xf32, #tpu.memory_space<vmem>>, vector<4x16xf32>
    tpu.vector_store %arg18[%c0_432, %c16_433], %728 {strides = array<i32>} : memref<8x32xf32, #tpu.memory_space<vmem>>, vector<4x16xf32>,
    %c0_434 = arith.constant 0 : index
    %c0_435 = arith.constant 0 : index
    %730 = vector.load %arg13[%c0_434, %c0_435] : memref<4x32xf32, #tpu.memory_space<vmem>>, vector<4x32xf32>
    %731 = arith.mulf %724, %730 : vector<4x32xf32>
    %c0_436 = arith.constant 0 : index
    %c0_437 = arith.constant 0 : index
    %732 = vector.load %arg18[%c0_436, %c0_437] : memref<8x32xf32, #tpu.memory_space<vmem>>, vector<4x32xf32>
    %c0_438 = arith.constant 0 : index
    %c0_439 = arith.constant 0 : index
    %733 = vector.load %arg14[%c0_438, %c0_439] : memref<4x32xf32, #tpu.memory_space<vmem>>, vector<4x32xf32>
    %734 = arith.mulf %732, %733 : vector<4x32xf32>
    %735 = arith.addf %731, %734 : vector<4x32xf32>
    %736 = vector.extract_strided_slice %725 {offsets = [0, 16], sizes = [4, 16], strides = [1, 1]} : vector<4x32xf32> to vector<4x16xf32>
    %c0_440 = arith.constant 0 : index
    %c0_441 = arith.constant 0 : index
    %737 = vector.load %arg18[%c0_440, %c0_441] : memref<8x32xf32, #tpu.memory_space<vmem>>, vector<4x16xf32>
    tpu.vector_store %arg18[%c0_440, %c0_441], %736 {strides = array<i32>} : memref<8x32xf32, #tpu.memory_space<vmem>>, vector<4x16xf32>,
    %738 = vector.extract_strided_slice %725 {offsets = [0, 0], sizes = [4, 16], strides = [1, 1]} : vector<4x32xf32> to vector<4x16xf32>
    %c0_442 = arith.constant 0 : index
    %c16_443 = arith.constant 16 : index
    %739 = vector.load %arg18[%c0_442, %c16_443] : memref<8x32xf32, #tpu.memory_space<vmem>>, vector<4x16xf32>
    tpu.vector_store %arg18[%c0_442, %c16_443], %738 {strides = array<i32>} : memref<8x32xf32, #tpu.memory_space<vmem>>, vector<4x16xf32>,
    %c0_444 = arith.constant 0 : index
    %c0_445 = arith.constant 0 : index
    %740 = vector.load %arg13[%c0_444, %c0_445] : memref<4x32xf32, #tpu.memory_space<vmem>>, vector<4x32xf32>
    %741 = arith.mulf %725, %740 : vector<4x32xf32>
    %c0_446 = arith.constant 0 : index
    %c0_447 = arith.constant 0 : index
    %742 = vector.load %arg18[%c0_446, %c0_447] : memref<8x32xf32, #tpu.memory_space<vmem>>, vector<4x32xf32>
    %c0_448 = arith.constant 0 : index
    %c0_449 = arith.constant 0 : index
    %743 = vector.load %arg14[%c0_448, %c0_449] : memref<4x32xf32, #tpu.memory_space<vmem>>, vector<4x32xf32>
    %744 = arith.mulf %742, %743 : vector<4x32xf32>
    %745 = arith.addf %741, %744 : vector<4x32xf32>
    %746 = vector.extract_strided_slice %720 {offsets = [0, 0], sizes = [8, 8], strides = [1, 1]} : vector<8x32xf32> to vector<8x8xf32>
    %747 = vector.extract_strided_slice %735 {offsets = [0, 0], sizes = [4, 8], strides = [1, 1]} : vector<4x32xf32> to vector<4x8xf32>
    %cst_450 = arith.constant dense<0.000000e+00> : vector<8x4xf32>
    %748 = tpu.matmul %746, %747, %cst_450 {dimension_numbers = #tpu.dot_dimension_numbers<[1], [1], [0], [0], [0, 0, 1, 0], [], []>} : vector<8x8xf32>, vector<4x8xf32>, vector<8x4xf32> -> vector<8x4xf32>
    %cst_451 = arith.constant 1.000000e+00 : f32
    %749 = vector.broadcast %cst_451 : f32 to vector<8x4xf32>
    %750 = arith.mulf %748, %749 : vector<8x4xf32>
    %cst_452 = arith.constant dense<0xFF800000> : vector<8xf32>
    %751 = vector.multi_reduction <maximumf>, %750, %cst_452 [1] : vector<8x4xf32> to vector<8xf32>
    %752 = vector.shape_cast %751 : vector<8xf32> to vector<8x1xf32>
    %753 = vector.broadcast %752 : vector<8x1xf32> to vector<8x4xf32>
    %754 = arith.subf %750, %753 : vector<8x4xf32>
    %755 = math.exp %754 : vector<8x4xf32>
    %cst_453 = arith.constant dense<0.000000e+00> : vector<8xf32>
    %756 = vector.multi_reduction <add>, %755, %cst_453 [1] : vector<8x4xf32> to vector<8xf32>
    %757 = vector.shape_cast %756 : vector<8xf32> to vector<8x1xf32>
    %758 = tpu.reciprocal %757 {approx = true} : vector<8x1xf32> -> vector<8x1xf32>
    %759 = vector.broadcast %758 : vector<8x1xf32> to vector<8x4xf32>
    %760 = arith.mulf %755, %759 : vector<8x4xf32>
    %761 = vector.extract_strided_slice %745 {offsets = [0, 0], sizes = [4, 8], strides = [1, 1]} : vector<4x32xf32> to vector<4x8xf32>
    %cst_454 = arith.constant dense<0.000000e+00> : vector<8x8xf32>
    %762 = tpu.matmul %760, %761, %cst_454 {dimension_numbers = #tpu.dot_dimension_numbers<[1], [0], [0], [1], [0, 0, 1, 1], [], []>} : vector<8x4xf32>, vector<4x8xf32>, vector<8x8xf32> -> vector<8x8xf32>
    %c0_455 = arith.constant 0 : index
    %c0_456 = arith.constant 0 : index
    %763 = vector.load %arg19[%c0_455, %c0_456] : memref<8x32xf32, #tpu.memory_space<vmem>>, vector<8x8xf32>
    tpu.vector_store %arg19[%c0_455, %c0_456], %762 {strides = array<i32>} : memref<8x32xf32, #tpu.memory_space<vmem>>, vector<8x8xf32>,
    %764 = vector.extract_strided_slice %720 {offsets = [0, 8], sizes = [8, 8], strides = [1, 1]} : vector<8x32xf32> to vector<8x8xf32>
    %765 = vector.extract_strided_slice %735 {offsets = [0, 8], sizes = [4, 8], strides = [1, 1]} : vector<4x32xf32> to vector<4x8xf32>
    %cst_457 = arith.constant dense<0.000000e+00> : vector<8x4xf32>
    %766 = tpu.matmul %764, %765, %cst_457 {dimension_numbers = #tpu.dot_dimension_numbers<[1], [1], [0], [0], [0, 0, 1, 0], [], []>} : vector<8x8xf32>, vector<4x8xf32>, vector<8x4xf32> -> vector<8x4xf32>
    %cst_458 = arith.constant 1.000000e+00 : f32
    %767 = vector.broadcast %cst_458 : f32 to vector<8x4xf32>
    %768 = arith.mulf %766, %767 : vector<8x4xf32>
    %cst_459 = arith.constant dense<0xFF800000> : vector<8xf32>
    %769 = vector.multi_reduction <maximumf>, %768, %cst_459 [1] : vector<8x4xf32> to vector<8xf32>
    %770 = vector.shape_cast %769 : vector<8xf32> to vector<8x1xf32>
    %771 = vector.broadcast %770 : vector<8x1xf32> to vector<8x4xf32>
    %772 = arith.subf %768, %771 : vector<8x4xf32>
    %773 = math.exp %772 : vector<8x4xf32>
    %cst_460 = arith.constant dense<0.000000e+00> : vector<8xf32>
    %774 = vector.multi_reduction <add>, %773, %cst_460 [1] : vector<8x4xf32> to vector<8xf32>
    %775 = vector.shape_cast %774 : vector<8xf32> to vector<8x1xf32>
    %776 = tpu.reciprocal %775 {approx = true} : vector<8x1xf32> -> vector<8x1xf32>
    %777 = vector.broadcast %776 : vector<8x1xf32> to vector<8x4xf32>
    %778 = arith.mulf %773, %777 : vector<8x4xf32>
    %779 = vector.extract_strided_slice %745 {offsets = [0, 8], sizes = [4, 8], strides = [1, 1]} : vector<4x32xf32> to vector<4x8xf32>
    %cst_461 = arith.constant dense<0.000000e+00> : vector<8x8xf32>
    %780 = tpu.matmul %778, %779, %cst_461 {dimension_numbers = #tpu.dot_dimension_numbers<[1], [0], [0], [1], [0, 0, 1, 1], [], []>} : vector<8x4xf32>, vector<4x8xf32>, vector<8x8xf32> -> vector<8x8xf32>
    %c0_462 = arith.constant 0 : index
    %c8_463 = arith.constant 8 : index
    %781 = vector.load %arg19[%c0_462, %c8_463] : memref<8x32xf32, #tpu.memory_space<vmem>>, vector<8x8xf32>
    tpu.vector_store %arg19[%c0_462, %c8_463], %780 {strides = array<i32>} : memref<8x32xf32, #tpu.memory_space<vmem>>, vector<8x8xf32>,
    %782 = vector.extract_strided_slice %720 {offsets = [0, 16], sizes = [8, 8], strides = [1, 1]} : vector<8x32xf32> to vector<8x8xf32>
    %783 = vector.extract_strided_slice %735 {offsets = [0, 16], sizes = [4, 8], strides = [1, 1]} : vector<4x32xf32> to vector<4x8xf32>
    %cst_464 = arith.constant dense<0.000000e+00> : vector<8x4xf32>
    %784 = tpu.matmul %782, %783, %cst_464 {dimension_numbers = #tpu.dot_dimension_numbers<[1], [1], [0], [0], [0, 0, 1, 0], [], []>} : vector<8x8xf32>, vector<4x8xf32>, vector<8x4xf32> -> vector<8x4xf32>
    %cst_465 = arith.constant 1.000000e+00 : f32
    %785 = vector.broadcast %cst_465 : f32 to vector<8x4xf32>
    %786 = arith.mulf %784, %785 : vector<8x4xf32>
    %cst_466 = arith.constant dense<0xFF800000> : vector<8xf32>
    %787 = vector.multi_reduction <maximumf>, %786, %cst_466 [1] : vector<8x4xf32> to vector<8xf32>
    %788 = vector.shape_cast %787 : vector<8xf32> to vector<8x1xf32>
    %789 = vector.broadcast %788 : vector<8x1xf32> to vector<8x4xf32>
    %790 = arith.subf %786, %789 : vector<8x4xf32>
    %791 = math.exp %790 : vector<8x4xf32>
    %cst_467 = arith.constant dense<0.000000e+00> : vector<8xf32>
    %792 = vector.multi_reduction <add>, %791, %cst_467 [1] : vector<8x4xf32> to vector<8xf32>
    %793 = vector.shape_cast %792 : vector<8xf32> to vector<8x1xf32>
    %794 = tpu.reciprocal %793 {approx = true} : vector<8x1xf32> -> vector<8x1xf32>
    %795 = vector.broadcast %794 : vector<8x1xf32> to vector<8x4xf32>
    %796 = arith.mulf %791, %795 : vector<8x4xf32>
    %797 = vector.extract_strided_slice %745 {offsets = [0, 16], sizes = [4, 8], strides = [1, 1]} : vector<4x32xf32> to vector<4x8xf32>
    %cst_468 = arith.constant dense<0.000000e+00> : vector<8x8xf32>
    %798 = tpu.matmul %796, %797, %cst_468 {dimension_numbers = #tpu.dot_dimension_numbers<[1], [0], [0], [1], [0, 0, 1, 1], [], []>} : vector<8x4xf32>, vector<4x8xf32>, vector<8x8xf32> -> vector<8x8xf32>
    %c0_469 = arith.constant 0 : index
    %c16_470 = arith.constant 16 : index
    %799 = vector.load %arg19[%c0_469, %c16_470] : memref<8x32xf32, #tpu.memory_space<vmem>>, vector<8x8xf32>
    tpu.vector_store %arg19[%c0_469, %c16_470], %798 {strides = array<i32>} : memref<8x32xf32, #tpu.memory_space<vmem>>, vector<8x8xf32>,
    %800 = vector.extract_strided_slice %720 {offsets = [0, 24], sizes = [8, 8], strides = [1, 1]} : vector<8x32xf32> to vector<8x8xf32>
    %801 = vector.extract_strided_slice %735 {offsets = [0, 24], sizes = [4, 8], strides = [1, 1]} : vector<4x32xf32> to vector<4x8xf32>
    %cst_471 = arith.constant dense<0.000000e+00> : vector<8x4xf32>
    %802 = tpu.matmul %800, %801, %cst_471 {dimension_numbers = #tpu.dot_dimension_numbers<[1], [1], [0], [0], [0, 0, 1, 0], [], []>} : vector<8x8xf32>, vector<4x8xf32>, vector<8x4xf32> -> vector<8x4xf32>
    %cst_472 = arith.constant 1.000000e+00 : f32
    %803 = vector.broadcast %cst_472 : f32 to vector<8x4xf32>
    %804 = arith.mulf %802, %803 : vector<8x4xf32>
    %cst_473 = arith.constant dense<0xFF800000> : vector<8xf32>
    %805 = vector.multi_reduction <maximumf>, %804, %cst_473 [1] : vector<8x4xf32> to vector<8xf32>
    %806 = vector.shape_cast %805 : vector<8xf32> to vector<8x1xf32>
    %807 = vector.broadcast %806 : vector<8x1xf32> to vector<8x4xf32>
    %808 = arith.subf %804, %807 : vector<8x4xf32>
    %809 = math.exp %808 : vector<8x4xf32>
    %cst_474 = arith.constant dense<0.000000e+00> : vector<8xf32>
    %810 = vector.multi_reduction <add>, %809, %cst_474 [1] : vector<8x4xf32> to vector<8xf32>
    %811 = vector.shape_cast %810 : vector<8xf32> to vector<8x1xf32>
    %812 = tpu.reciprocal %811 {approx = true} : vector<8x1xf32> -> vector<8x1xf32>
    %813 = vector.broadcast %812 : vector<8x1xf32> to vector<8x4xf32>
    %814 = arith.mulf %809, %813 : vector<8x4xf32>
    %815 = vector.extract_strided_slice %745 {offsets = [0, 24], sizes = [4, 8], strides = [1, 1]} : vector<4x32xf32> to vector<4x8xf32>
    %cst_475 = arith.constant dense<0.000000e+00> : vector<8x8xf32>
    %816 = tpu.matmul %814, %815, %cst_475 {dimension_numbers = #tpu.dot_dimension_numbers<[1], [0], [0], [1], [0, 0, 1, 1], [], []>} : vector<8x4xf32>, vector<4x8xf32>, vector<8x8xf32> -> vector<8x8xf32>
    %c0_476 = arith.constant 0 : index
    %c24_477 = arith.constant 24 : index
    %817 = vector.load %arg19[%c0_476, %c24_477] : memref<8x32xf32, #tpu.memory_space<vmem>>, vector<8x8xf32>
    tpu.vector_store %arg19[%c0_476, %c24_477], %816 {strides = array<i32>} : memref<8x32xf32, #tpu.memory_space<vmem>>, vector<8x8xf32>,
    %c0_478 = arith.constant 0 : index
    %c0_479 = arith.constant 0 : index
    %818 = vector.load %arg19[%c0_478, %c0_479] : memref<8x32xf32, #tpu.memory_space<vmem>>, vector<8x32xf32>
    %c6_480 = arith.constant 6 : index
    %c0_481 = arith.constant 0 : index
    %c0_482 = arith.constant 0 : index
    %819 = vector.load %arg6[%c6_480, %c0_481, %c0_482] : memref<7x32x32xf32, #tpu.memory_space<vmem>>, vector<1x32x32xf32>
    %820 = vector.shape_cast %819 : vector<1x32x32xf32> to vector<32x32xf32>
    %cst_483 = arith.constant dense<0.000000e+00> : vector<8x32xf32>
    %821 = tpu.matmul %818, %820, %cst_483 {dimension_numbers = #tpu.dot_dimension_numbers<[1], [0], [0], [1], [0, 0, 1, 1], [], []>} : vector<8x32xf32>, vector<32x32xf32>, vector<8x32xf32> -> vector<8x32xf32>
    %c6_484 = arith.constant 6 : index
    %c0_485 = arith.constant 0 : index
    %c0_486 = arith.constant 0 : index
    %822 = vector.load %arg7[%c6_484, %c0_485, %c0_486] : memref<7x1x32xf32, #tpu.memory_space<vmem>>, vector<1x1x32xf32>
    %823 = vector.shape_cast %822 : vector<1x1x32xf32> to vector<1x32xf32>
    %824 = vector.broadcast %823 : vector<1x32xf32> to vector<8x32xf32>
    %825 = arith.addf %821, %824 : vector<8x32xf32>
    %c6_487 = arith.constant 6 : index
    %c0_488 = arith.constant 0 : index
    %826 = memref.load %arg12[%c6_487, %c0_488] : memref<7x2xf32, #tpu.memory_space<smem>>
    %827 = vector.broadcast %826 : f32 to vector<8x32xf32>
    %828 = arith.mulf %825, %827 : vector<8x32xf32>
    %829 = arith.addf %341, %828 : vector<8x32xf32>
    %c6_489 = arith.constant 6 : index
    %c0_490 = arith.constant 0 : index
    %c0_491 = arith.constant 0 : index
    %830 = vector.load %arg8[%c6_489, %c0_490, %c0_491] : memref<7x32x64xf32, #tpu.memory_space<vmem>>, vector<1x32x64xf32>
    %831 = vector.shape_cast %830 : vector<1x32x64xf32> to vector<32x64xf32>
    %cst_492 = arith.constant dense<0.000000e+00> : vector<8x64xf32>
    %832 = tpu.matmul %829, %831, %cst_492 {dimension_numbers = #tpu.dot_dimension_numbers<[1], [0], [0], [1], [0, 0, 1, 1], [], []>} : vector<8x32xf32>, vector<32x64xf32>, vector<8x64xf32> -> vector<8x64xf32>
    %c6_493 = arith.constant 6 : index
    %c0_494 = arith.constant 0 : index
    %c0_495 = arith.constant 0 : index
    %833 = vector.load %arg9[%c6_493, %c0_494, %c0_495] : memref<7x1x64xf32, #tpu.memory_space<vmem>>, vector<1x1x64xf32>
    %834 = vector.shape_cast %833 : vector<1x1x64xf32> to vector<1x64xf32>
    %835 = vector.broadcast %834 : vector<1x64xf32> to vector<8x64xf32>
    %836 = arith.addf %832, %835 : vector<8x64xf32>
    %cst_496 = arith.constant 0.000000e+00 : f32
    %837 = vector.broadcast %cst_496 : f32 to vector<8x64xf32>
    %838 = arith.maximumf %836, %837 : vector<8x64xf32>
    %c6_497 = arith.constant 6 : index
    %c0_498 = arith.constant 0 : index
    %c0_499 = arith.constant 0 : index
    %839 = vector.load %arg10[%c6_497, %c0_498, %c0_499] : memref<7x64x32xf32, #tpu.memory_space<vmem>>, vector<1x64x32xf32>
    %840 = vector.shape_cast %839 : vector<1x64x32xf32> to vector<64x32xf32>
    %cst_500 = arith.constant dense<0.000000e+00> : vector<8x32xf32>
    %841 = tpu.matmul %838, %840, %cst_500 {dimension_numbers = #tpu.dot_dimension_numbers<[1], [0], [0], [1], [0, 0, 1, 1], [], []>} : vector<8x64xf32>, vector<64x32xf32>, vector<8x32xf32> -> vector<8x32xf32>
    %c6_501 = arith.constant 6 : index
    %c0_502 = arith.constant 0 : index
    %c0_503 = arith.constant 0 : index
    %842 = vector.load %arg11[%c6_501, %c0_502, %c0_503] : memref<7x1x32xf32, #tpu.memory_space<vmem>>, vector<1x1x32xf32>
    %843 = vector.shape_cast %842 : vector<1x1x32xf32> to vector<1x32xf32>
    %844 = vector.broadcast %843 : vector<1x32xf32> to vector<8x32xf32>
    %845 = arith.addf %841, %844 : vector<8x32xf32>
    %c6_504 = arith.constant 6 : index
    %c1_505 = arith.constant 1 : index
    %846 = memref.load %arg12[%c6_504, %c1_505] : memref<7x2xf32, #tpu.memory_space<smem>>
    %847 = vector.broadcast %846 : f32 to vector<8x32xf32>
    %848 = arith.mulf %845, %847 : vector<8x32xf32>
    %849 = arith.addf %829, %848 : vector<8x32xf32>
    %c0_506 = arith.constant 0 : index
    %c0_507 = arith.constant 0 : index
    %c0_508 = arith.constant 0 : index
    %850 = vector.load %arg15[%c0_506, %c0_507, %c0_508] : memref<1x4x32xf32, #tpu.memory_space<vmem>>, vector<1x4x32xf32>
    %851 = vector.shape_cast %850 : vector<1x4x32xf32> to vector<4x32xf32>
    %852 = vector.shape_cast %717 : vector<4x32xf32> to vector<1x4x32xf32>
    tpu.vector_store %arg15[%c0_506, %c0_507, %c0_508], %852 {strides = array<i32>} : memref<1x4x32xf32, #tpu.memory_space<vmem>>, vector<1x4x32xf32>,
    %c0_509 = arith.constant 0 : index
    %c0_510 = arith.constant 0 : index
    %c0_511 = arith.constant 0 : index
    %853 = vector.load %arg16[%c0_509, %c0_510, %c0_511] : memref<1x3x32xf32, #tpu.memory_space<vmem>>, vector<1x3x32xf32>
    %854 = vector.shape_cast %853 : vector<1x3x32xf32> to vector<3x32xf32>
    %855 = vector.shape_cast %595 : vector<3x32xf32> to vector<1x3x32xf32>
    tpu.vector_store %arg16[%c0_509, %c0_510, %c0_511], %855 {strides = array<i32>} : memref<1x3x32xf32, #tpu.memory_space<vmem>>, vector<1x3x32xf32>,
    %c0_512 = arith.constant 0 : index
    %c0_513 = arith.constant 0 : index
    %c0_514 = arith.constant 0 : index
    %856 = vector.load %arg17[%c0_512, %c0_513, %c0_514] : memref<1x8x32xf32, #tpu.memory_space<vmem>>, vector<1x8x32xf32>
    %857 = vector.shape_cast %856 : vector<1x8x32xf32> to vector<8x32xf32>
    %858 = vector.shape_cast %849 : vector<8x32xf32> to vector<1x8x32xf32>
    tpu.vector_store %arg17[%c0_512, %c0_513, %c0_514], %858 {strides = array<i32>} : memref<1x8x32xf32, #tpu.memory_space<vmem>>, vector<1x8x32xf32>,
    return
  }
  func.func @transform_0(%arg0: i32) -> (i32, i32, i32) {
    %c0_i32 = arith.constant 0 : i32
    %c0_i32_0 = arith.constant 0 : i32
    %c0_i32_1 = arith.constant 0 : i32
    return %arg0, %c0_i32, %c0_i32_0 : i32, i32, i32
  }
  func.func @transform_1(%arg0: i32) -> (i32, i32, i32) {
    %c0_i32 = arith.constant 0 : i32
    %c0_i32_0 = arith.constant 0 : i32
    %c0_i32_1 = arith.constant 0 : i32
    return %arg0, %c0_i32, %c0_i32_0 : i32, i32, i32
  }
  func.func @transform_2(%arg0: i32) -> (i32, i32, i32) {
    %c0_i32 = arith.constant 0 : i32
    %c0_i32_0 = arith.constant 0 : i32
    %c0_i32_1 = arith.constant 0 : i32
    return %arg0, %c0_i32, %c0_i32_0 : i32, i32, i32
  }
  func.func @transform_3(%arg0: i32) -> (i32, i32, i32) {
    %c0_i32 = arith.constant 0 : i32
    %c0_i32_0 = arith.constant 0 : i32
    %c0_i32_1 = arith.constant 0 : i32
    %c0_i32_2 = arith.constant 0 : i32
    return %c0_i32, %c0_i32_0, %c0_i32_1 : i32, i32, i32
  }
  func.func @transform_4(%arg0: i32) -> (i32, i32, i32) {
    %c0_i32 = arith.constant 0 : i32
    %c0_i32_0 = arith.constant 0 : i32
    %c0_i32_1 = arith.constant 0 : i32
    %c0_i32_2 = arith.constant 0 : i32
    return %c0_i32, %c0_i32_0, %c0_i32_1 : i32, i32, i32
  }
  func.func @transform_5(%arg0: i32) -> (i32, i32, i32) {
    %c0_i32 = arith.constant 0 : i32
    %c0_i32_0 = arith.constant 0 : i32
    %c0_i32_1 = arith.constant 0 : i32
    %c0_i32_2 = arith.constant 0 : i32
    return %c0_i32, %c0_i32_0, %c0_i32_1 : i32, i32, i32
  }
  func.func @transform_6(%arg0: i32) -> (i32, i32, i32) {
    %c0_i32 = arith.constant 0 : i32
    %c0_i32_0 = arith.constant 0 : i32
    %c0_i32_1 = arith.constant 0 : i32
    %c0_i32_2 = arith.constant 0 : i32
    return %c0_i32, %c0_i32_0, %c0_i32_1 : i32, i32, i32
  }
  func.func @transform_7(%arg0: i32) -> (i32, i32, i32) {
    %c0_i32 = arith.constant 0 : i32
    %c0_i32_0 = arith.constant 0 : i32
    %c0_i32_1 = arith.constant 0 : i32
    %c0_i32_2 = arith.constant 0 : i32
    return %c0_i32, %c0_i32_0, %c0_i32_1 : i32, i32, i32
  }
  func.func @transform_8(%arg0: i32) -> (i32, i32, i32) {
    %c0_i32 = arith.constant 0 : i32
    %c0_i32_0 = arith.constant 0 : i32
    %c0_i32_1 = arith.constant 0 : i32
    %c0_i32_2 = arith.constant 0 : i32
    return %c0_i32, %c0_i32_0, %c0_i32_1 : i32, i32, i32
  }
  func.func @transform_9(%arg0: i32) -> (i32, i32, i32) {
    %c0_i32 = arith.constant 0 : i32
    %c0_i32_0 = arith.constant 0 : i32
    %c0_i32_1 = arith.constant 0 : i32
    %c0_i32_2 = arith.constant 0 : i32
    return %c0_i32, %c0_i32_0, %c0_i32_1 : i32, i32, i32
  }
  func.func @transform_10(%arg0: i32) -> (i32, i32, i32) {
    %c0_i32 = arith.constant 0 : i32
    %c0_i32_0 = arith.constant 0 : i32
    %c0_i32_1 = arith.constant 0 : i32
    %c0_i32_2 = arith.constant 0 : i32
    return %c0_i32, %c0_i32_0, %c0_i32_1 : i32, i32, i32
  }
  func.func @transform_11(%arg0: i32) -> (i32, i32) {
    %c0_i32 = arith.constant 0 : i32
    %c0_i32_0 = arith.constant 0 : i32
    %c0_i32_1 = arith.constant 0 : i32
    return %c0_i32, %c0_i32_0 : i32, i32
  }
  func.func @transform_12(%arg0: i32) -> (i32, i32) {
    %c0_i32 = arith.constant 0 : i32
    %c0_i32_0 = arith.constant 0 : i32
    %c0_i32_1 = arith.constant 0 : i32
    return %c0_i32, %c0_i32_0 : i32, i32
  }
  func.func @transform_13(%arg0: i32) -> (i32, i32) {
    %c0_i32 = arith.constant 0 : i32
    %c0_i32_0 = arith.constant 0 : i32
    %c0_i32_1 = arith.constant 0 : i32
    return %c0_i32, %c0_i32_0 : i32, i32
  }
  func.func @transform_14(%arg0: i32) -> (i32, i32, i32) {
    %c0_i32 = arith.constant 0 : i32
    %c0_i32_0 = arith.constant 0 : i32
    %c0_i32_1 = arith.constant 0 : i32
    return %arg0, %c0_i32, %c0_i32_0 : i32, i32, i32
  }
  func.func @transform_15(%arg0: i32) -> (i32, i32, i32) {
    %c0_i32 = arith.constant 0 : i32
    %c0_i32_0 = arith.constant 0 : i32
    %c0_i32_1 = arith.constant 0 : i32
    return %arg0, %c0_i32, %c0_i32_0 : i32, i32, i32
  }
  func.func @transform_16(%arg0: i32) -> (i32, i32, i32) {
    %c0_i32 = arith.constant 0 : i32
    %c0_i32_0 = arith.constant 0 : i32
    %c0_i32_1 = arith.constant 0 : i32
    return %arg0, %c0_i32, %c0_i32_0 : i32, i32, i32
  }
}

</mosaic_0001>

<bundles_post_ra>
// kernel: forward.1
= control target key start
LH: loop header
LB: loop body
LE: loop exit
PB: predicated region body
PF: predicated region fallthrough
CT: control target
= control target key end

     0   :  { %s6229_s0 = inlined_call_operand.vmem [shape: f32[2,4,32], index: 0, kind: input, shape index: {}]   ;;  %s6230_s1 = inlined_call_operand.vmem [shape: f32[2,3,32], index: 1, kind: input, shape index: {}]   ;;  %s6231_s2 = inlined_call_operand.vmem [shape: f32[2,8,32], index: 2, kind: input, shape index: {}]   ;;  %s6232_s3 = inlined_call_operand.vmem [shape: f32[7,32,32], index: 3, kind: input, shape index: {}]   ;;  %s6233_s4 = inlined_call_operand.vmem [shape: f32[7,32,64], index: 4, kind: input, shape index: {}]   ;;  %s6234_s5 = inlined_call_operand.vmem [shape: f32[7,32,32], index: 5, kind: input, shape index: {}]   ;;  %s6235_s6 = inlined_call_operand.hbm [shape: f32[7,1,32], index: 6, kind: input, shape index: {}]   ;;  %s6236_s7 = inlined_call_operand.hbm [shape: f32[7,32,64], index: 7, kind: input, shape index: {}]   ;;  %s6237_s8 = inlined_call_operand.hbm [shape: f32[7,1,64], index: 8, kind: input, shape index: {}]   ;;  %s6238_s9 = inlined_call_operand.vmem [shape: f32[7,64,32], index: 9, kind: input, shape index: {}]   ;;  %s6239_s10 = inlined_call_operand.hbm [shape: f32[7,1,32], index: 10, kind: input, shape index: {}]   ;;  %s6240_s11 = inlined_call_operand.vmem [shape: f32[7,2], index: 11, kind: input, shape index: {}]   ;;  %s6241_s12 = inlined_call_operand.hbm [shape: f32[4,32], index: 12, kind: input, shape index: {}]   ;;  %s6242_s13 = inlined_call_operand.hbm [shape: f32[4,32], index: 13, kind: input, shape index: {}]   ;;  %s6243_s14 = inlined_call_operand.hbm [shape: f32[2,4,32], index: 14, kind: output, shape index: {0}]   ;;  %s6244_s15 = inlined_call_operand.vmem [shape: f32[2,3,32], index: 15, kind: output, shape index: {1}]   ;;  %s6245_s16 = inlined_call_operand.hbm [shape: f32[2,8,32], index: 16, kind: output, shape index: {2}]  }
   0x1   :  { %6280 = sst [smem:[#allocation35_spill]] %s6229_s0 }
   0x2   :  { %6281 = sst [smem:[#allocation36_spill]] %s6230_s1 }
   0x3   :  { %6282 = sst [smem:[#allocation37_spill]] %s6231_s2 }
   0x4   :  { %6283 = sst [smem:[#allocation38_spill]] %s6235_s6 }
   0x5   :  { %6284 = sst [smem:[#allocation39_spill]] %s6236_s7 }
   0x6   :  { %6285 = sst [smem:[#allocation40_spill]] %s6237_s8 }
   0x7   :  { %6286 = sst [smem:[#allocation41_spill]] %s6239_s10 }
   0x8   :  { %6287 = sst [smem:[#allocation42_spill]] %s6243_s14 }
   0x9   :  { %6288 = sst [smem:[#allocation43_spill]] %s6245_s16 }
   0xa   :  { %22 = vsyncpa [#allocation5], 0 }
   0xb   :  { %23 = vsyncpa [#allocation9], 0 }
   0xc   :  { %24 = vsyncpa [#allocation12], 0 }
   0xd   :  { %25 = vsyncpa [#allocation7], 0 }
   0xe   :  { %26 = vsyncpa [#allocation16], 0 }
   0xf   :  { %27 = vsyncpa [#allocation6], 0 }
  0x10   :  { %29 = vsyncpa [#allocation6 + $0x1], 0 }
  0x11   :  { %30 = vsyncpa [#allocation19], 0 }
  0x12   :  { %32 = vsyncpa [#allocation19 + $0x1], 0  ;;  %s5156_s21 = smov 0   ;;  %s5158_s22 = smov 0  }
  0x13   :  { %s5160_s23 = smov 0   ;;  %s5162_s24 = smov 0  }
  0x14 LB: > { %6289 = sst [smem:[#allocation28_spill]] %s5035_s21  ;;  %s5177_s25 = sadd.s32 4294967295, %s5047_s24   ;;  %s5047_s24 = sphi %s5162_s24, %s6327_s24   ;;  %s5043_s23 = sphi %s5160_s23, %s6332_s23   ;;  %s5039_s22 = sphi %s5158_s22, %s6331_s22   ;;  %s5035_s21 = sphi %s5156_s21, %s6330_s21  }
  0x15   : > { %6290 = sst [smem:[#allocation29_spill]] %s5043_s23  ;;  %s4173_s26 = sadd.s32 4294967294, %s5047_s24  }
  0x16   : > { %6291 = sst [smem:[#allocation30_spill]] %s5047_s24  ;;  %s5181_s27 = sadd.s32 1, %s5047_s24  }
  0x17   : > { %6292 = sst [smem:[#allocation31_spill]] %s5181_s27  ;;  %s354_s28 = sadd.s32 1, %s5043_s23 }
  0x18   : > { %s351_s29 = ssub.s32 %s5047_s24, %s5181_s27  ;;  %p364_p0 = scmp.ne.s32.totalorder %s5043_s23, %s5039_s22 }
  0x19   : > { %p352_p1 = scmp.eq.s32.totalorder %s351_s29, 0  ;;  %p365_p2 = scmp.eq.s32.totalorder %s5177_s25, 1 }
  0x1a   : > { %p370_p3 = scmp.ne.s32.totalorder %s5039_s22, %s5035_s21  ;;  %p371_p4 = scmp.eq.s32.totalorder %s4173_s26, 1 }
  0x1b   : > { %s5192_s30 = scalar_select %p352_p1, %s5043_s23, %s354_s28  }
  0x1c   : > { %p5194_p5 = por %p365_p2, %p364_p0  ;;  %p5198_p6 = por %p371_p4, %p370_p3 }
  0x1d   : > { %6293 = sst [smem:[#allocation32_spill]] %s5192_s30  ;;  %p4174_p7 = scmp.ge.s32.totalorder %s5047_s24, 1 }
  0x1e   : > { %s6294_s0 = scalar_select %p5194_p5, 1, 0 }
  0x1f   : > { %s6296_s17 = scalar_select %p5198_p6, 1, 0 }
  0x20   : > { %6295 = sst [smem:[#allocation33_spill]] %s6294_s0  ;;  %p430_p8 = scmp.lt.s32.totalorder %s5047_s24, 3 }
  0x21   : > { %6297 = sst [smem:[#allocation34_spill]] %s6296_s17  ;;  %p4532_p9 = scmp.eq.s32.totalorder %s5177_s25, 0 }
  0x22   : > { %p5205_p10 = pnand %p4174_p7, %p430_p8  ;;  %s6299_s7 = sld [smem:[#allocation39_spill]] }
  0x23   : > { %s5049_s28 = smov [#allocation8]   ;;  %s6301_s10 = sld [smem:[#allocation41_spill]] }
  0x24   : > { %p4503_p11 = pneg %p5205_p10  ;;  %s466_s29 = sshll.u32 %s5049_s28, 4  ;;  %s467_s29 = int_to_ptr.vmem [resolvable:$true] %s466_s29 }
  0x25   : > { %s5050_s19 = smov 128   ;;  %s5051_s20 = smov 8  }
  0x26   : > { %p5216_p12 = pnand %p4532_p9, %p4503_p11  ;;  %s6302_s6 = sld [smem:[#allocation38_spill]] }
  0x27   : > { %s5053_s14 = smov 16   ;;  %s5054_s23 = smov 1  }
  0x28   : > { %s464_s26 = sshll.u32 %s6299_s7, 4  ;;  %s5052_s7 = smov [#allocation11]   ;;  %s465_s26 = int_to_ptr.hbm [resolvable:$true] %s464_s26 }
  0x29   : > { %s495_s17 = sshll.u32 %s6301_s10, 4  ;;  %s497_s28 = sshll.u32 %s5052_s7, 4  ;;  %s496_s17 = int_to_ptr.hbm [resolvable:$true] %s495_s17  ;;  %s498_s28 = int_to_ptr.vmem [resolvable:$true] %s497_s28 }
  0x2a   : > { %4509 = dma.hbm_to_vmem [thread:$0]  (!%p5216_p12), %s465_s26, 3584, %s467_s29, [#allocation9], %s5050_s19, %s5050_s19, %s5051_s20  }
  0x2b   : > { %4515 = dma.hbm_to_vmem [thread:$0]  (!%p5216_p12), %s496_s17, 112, %s498_s28, [#allocation12], %s5053_s14, %s5053_s14, %s5054_s23  }
  0x2c   : > { %s450_s16 = sshll.u32 %s6302_s6, 4  ;;  %s6303_s8 = sld [smem:[#allocation40_spill]]  ;;  %s451_s16 = int_to_ptr.hbm [resolvable:$true] %s450_s16 }
  0x2d   : > { %s5055_s26 = smov [#allocation4]   ;;  %s5056_s7 = smov [#allocation10]  }
  0x2e   : > { %s452_s29 = sshll.u32 %s5055_s26, 4  ;;  %s480_s21 = sshll.u32 %s5056_s7, 4  ;;  %s453_s29 = int_to_ptr.vmem [resolvable:$true] %s452_s29  ;;  %s481_s21 = int_to_ptr.vmem [resolvable:$true] %s480_s21 }
  0x2f   : > { %4506 = dma.hbm_to_vmem [thread:$0]  (!%p5216_p12), %s451_s16, 112, %s453_s29, [#allocation5], %s5053_s14, %s5053_s14, %s5054_s23  }
  0x30   : > { %s510_s20 = sshll.u32 %s6240_s11, 4  ;;  %s520_s28 = sshll.u32 %s6241_s12, 4  ;;  %s511_s20 = int_to_ptr.vmem [resolvable:$true] %s510_s20  ;;  %s521_s28 = int_to_ptr.hbm [resolvable:$true] %s520_s28 }
  0x31   : > { %s5057_s27 = smov [#allocation13]   ;;  %s5058_s16 = smov [#allocation14]  }
  0x32   : > { %s478_s0 = sshll.u32 %s6303_s8, 4  ;;  %s522_s26 = sshll.u32 %s5058_s16, 4  ;;  %s479_s0 = int_to_ptr.hbm [resolvable:$true] %s478_s0  ;;  %s523_s26 = int_to_ptr.vmem [resolvable:$true] %s522_s26 }
  0x33   : > { %4512 = dma.hbm_to_vmem [thread:$0]  (!%p5216_p12), %s479_s0, 112, %s481_s21, [#allocation9], %s5053_s14, %s5053_s14, %s5054_s23  }
  0x34   : > { %4518 = dma.vmem_to_smem (!%p5216_p12), %s511_s20, 128, %s5057_s27, [#allocation7]  }
  0x35   : > { %s532_s24 = sshll.u32 %s6242_s13, 4  ;;  %s5059_s19 = smov [#allocation15]   ;;  %s533_s24 = int_to_ptr.hbm [resolvable:$true] %s532_s24 }
  0x36   : > { %4521 = dma.hbm_to_vmem [thread:$0]  (!%p5216_p12), %s521_s28, 64, %s523_s26, [#allocation12]  }
  0x37   : > { %s534_s14 = sshll.u32 %s5059_s19, 4  ;;  %568 = sbr.rel (%p5205_p10) target bundleno = 8793 (0x2259), region = 76  ;;  %s535_s14 = int_to_ptr.vmem [resolvable:$true] %s534_s14 }
  0x38   : > { %4524 = dma.hbm_to_vmem [thread:$0]  (!%p5216_p12), %s533_s24, 64, %s535_s14, [#allocation16]  }
  0x3c   : > { %5002 = dma.done.wait (%p4532_p9), [#allocation5], 112  }
  0x3d   : > { %5004 = vsyncadd (%p4532_p9), [#allocation5], 4294967184 }
  0x3e   : > { %5006 = dma.done.wait (%p4532_p9), [#allocation9], 3696  }
  0x3f   : > { %5008 = vsyncadd (%p4532_p9), [#allocation9], 4294963600 }
  0x40   : > { %5010 = dma.done.wait (%p4532_p9), [#allocation12], 112  }
  0x41   : > { %5012 = vsyncadd (%p4532_p9), [#allocation12], 4294967184 }
  0x42   : > { %5014 = dma.done.wait (%p4532_p9), [#allocation7], 128  }
  0x43   : > { %5016 = vsyncadd (%p4532_p9), [#allocation7], 4294967168 }
  0x44   : > { %5018 = dma.done.wait (%p4532_p9), [#allocation12], 64  }
  0x45   : > { %5020 = vsyncadd (%p4532_p9), [#allocation12], 4294967232 }
  0x46   : > { %5022 = dma.done.wait (%p4532_p9), [#allocation16], 64  }
  0x47   : > { %5024 = vsyncadd (%p4532_p9), [#allocation16], 4294967232 }
  0x48   : > { %605 = sfence }
  0x49   : > { %v716_v0 = vld [vmem:[%s6233_s4 + $0x18] sm:$0xff]  ;;  %v715_v1 = vld [vmem:[%s6233_s4 + $0x10] sm:$0xff]  ;;  %p666_p13 = scmp.lt.s32.totalorder %s5177_s25, 1  ;;  %v714_v3 = vld [vmem:[%s6233_s4 + $0x8] sm:$0xff]  ;;  %vm689_vm0 = vcmask 261120   ;;  %s6304_s2 = sld [smem:[#allocation37_spill]] }
  0x4a   : > { %v688_v2 = vld [vmem:[%s6232_s3 + $0x18] sm:$0xff]  ;;  %729 = vmatpush.msra.mxu1 %v716_v0  ;;  %v687_v4 = vld [vmem:[%s6232_s3 + $0x10] sm:$0xff]  ;;  %v713_v5 = vld [vmem:[%s6233_s4] sm:$0xff]  ;;  %vm737_vm1 = vcmask 64512   ;;  %s6270_s21 = smov 112   ;;  %s6274_s20 = smov 104  }
  0x4b   : > { %705 = vmatpush.msra.mxu0 %v688_v2  ;;  %v686_v6 = vld [vmem:[%s6232_s3 + $0x8] sm:$0xff]  ;;  %s5301_s24 = scalar_select %p666_p13, %s5177_s25, 1  ;;  %v685_v7 = vld [vmem:[%s6232_s3] sm:$0xff]  ;;  %vm873_vm2 = vcmask 130112   ;;  %vm6277_vm3 = vcmask 195712   ;;  %vm6276_vm4 = vcmask 261312  }
  0x4c   : > { %730 = vmatpush.msra.mxu1 %v715_v1  ;;  %s6272_s10 = smov 120   ;;  %s6266_s17 = smov 96   ;;  %vm1099_vm5 = vcmask 523264   ;;  %vm1210_vm6 = vcmask 59392   ;;  %vm1319_vm7 = vcmask 124992   ;;  %vm1391_vm8 = vcmask 190592  }
  0x4d   : > { %706 = vmatpush.msra.mxu0 %v687_v4  ;;  %s4195_s19 = sshll.u32 %s5301_s24, 3  ;;  %s6262_s28 = smov 80   ;;  %vm1463_vm9 = vcmask 256192   ;;  %vm1657_vm10 = vcmask 23552   ;;  %vm1674_vm11 = vcmask 1042432   ;;  %vm2081_vm12 = vcmask 125952  }
  0x4e   : > { %731 = vmatpush.msra.mxu1 %v714_v3  ;;  %s6264_s27 = smov 88   ;;  %s6268_s16 = smov 72   ;;  %vm2086_vm13 = vcmask 257152   ;;  %vm2120_vm14 = vcmask 19456   ;;  %vm2159_vm15 = vcmask 60416  }
  0x4f   : > { %707 = vmatpush.msra.mxu0 %v686_v6  ;;  %s677_s23 = scalar_lea.vmem %s6304_s2, %s4195_s19  ;;  %s6256_s26 = smov 16   ;;  %v1022_v6 = vld [vmem:[%s6234_s5 + $0x10] sm:$0xff] }
  0x50   : > { %v5310_v8 = vld [vmem:[%s677_s23] sm:$0xff]  ;;  %732 = vmatpush.msra.mxu1 %v713_v5  ;;  %s6258_s29 = smov 8   ;;  %s6260_s7 = smov 24   ;;  %v1023_v5 = vld [vmem:[%s6234_s5 + $0x18] sm:$0xff] }
  0x51   : > { %708 = vmatpush.msra.mxu0 %v685_v7  ;;  %4198 = vmatmul.msk.f32.vlgmr.msra.gmra.mxu1 %vm689_vm0, %v5310_v8  ;;  %v1021_v7 = vld [vmem:[%s6234_s5 + $0x8] sm:$0xff]  ;;  %s5403_s0 = sshll.u32 %s5301_s24, 2  ;;  %s6305_s1 = sld [smem:[#allocation36_spill]] }
  0x52   : > { %4197 = vmatmul.msk.f32.vlgmr.msra.gmra.mxu0 %vm689_vm0, %v5310_v8  ;;  %s4214_s14 = sld [smem:[#allocation13 + $0x1]]  ;;  %s6307_s30 = smov 80  }
  0x53   : > { %s6309_s18 = smov 24   ;;  %s6310_s23 = smov 16  }
  0x54   : > { %s6312_s19 = smov 112   ;;  %s6316_s8 = smov 104  }
  0x57   : > { %s673_s24 = scalar_lea.vmem %s6305_s1, %s5403_s0 }
  0xce   : > { %v5316_v9 = vpop.f32.mrf.mxu1 }
  0xcf   : > { %877 = vrot.lane.b32.xlu2 %v5316_v9, %s6270_s21  ;;  %949 = vrot.lane.b32.xlu1 %v5316_v9, %s6274_s20  ;;  %v710_v10 = vpop.f32.mrf.mxu0 }
  0xd0   : > { %805 = vrot.lane.b32.xlu0 %v5316_v9, %s6272_s10  ;;  %4199 = vmatpush.xpose.msk.msra.mxu2 %vm737_vm1, %v5316_v9 }
  0xd3   : > { %4200 = vmatmul.msk.f32.vlgmr.msra.gmra.mxu2 %vm737_vm1, %v710_v10 }
  0xd7   : > { %875 = vrot.lane.b32.xlu2 %v710_v10, %s6270_s21  ;;  %947 = vrot.lane.b32.xlu1 %v710_v10, %s6274_s20 }
  0xd8   : > { %803 = vrot.lane.b32.xlu0 %v710_v10, %s6272_s10 }
 0x129   : > { %v878_v11 = vpop.permute.xlu2 %877 }
 0x12a   : > { %4205 = vmatpush.xpose.msk.msrb.mxu0 %vm737_vm1, %v878_v11 }
 0x12e   : > { %1043 = vmatpush.msra.mxu0 %v1023_v5 }
 0x130   : > { %1044 = vmatpush.msra.mxu0 %v1022_v6 }
 0x131   : > { %v876_v12 = vpop.permute.xlu2 %875 }
 0x132   : > { %4206 = vmatmul.msk.f32.vlgmr.msrb.gmra.mxu0 %vm737_vm1, %v876_v12 }
 0x133   : > { %1045 = vmatpush.msra.mxu0 %v1021_v7 }
 0x141   : > { %v950_v13 = vpop.permute.xlu1 %949 }
 0x142   : > { %v806_v14 = vpop.permute.xlu0 %805 }
 0x143   : > { %4202 = vmatpush.xpose.msk.msra.mxu3 %vm737_vm1, %v806_v14  ;;  %v1058_v14 = vld [vmem:[#allocation8 + $0x18] sm:$0xff] }
 0x147   : > { %4208 = vmatpush.xpose.msk.msrb.mxu3 %vm737_vm1, %v950_v13 }
 0x149   : > { %v948_v16 = vpop.permute.xlu1 %947 }
 0x14a   : > { %v804_v15 = vpop.permute.xlu0 %803 }
 0x14b   : > { %4203 = vmatmul.msk.f32.vlgmr.msra.gmra.mxu3 %vm737_vm1, %v804_v15  ;;  %v1057_v15 = vld [vmem:[#allocation8 + $0x10] sm:$0xff] }
 0x153   : > { %4209 = vmatmul.msk.f32.vlgmr.msrb.gmra.mxu3 %vm737_vm1, %v948_v16  ;;  %v1056_v16 = vld [vmem:[#allocation8 + $0x8] sm:$0xff] }
 0x156   : > { %v761_v17 = vpop.f32.mrf.mxu2 }
 0x157   : > { %v764_v18 = vmul.f32 0.35355338, %v761_v17  ;;  %v1055_v17 = vld [vmem:[#allocation8] sm:$0xff] }
 0x159   : > { %v765_v19 = vsel %vm737_vm1, %v764_v18, -inf }
 0x15a   : > { %766 = vmax.xlane.f32.xlu0 %v765_v19  ;;  %v1093_v19 = vld [vmem:[%s6238_s9 + $0x30] sm:$0xff] }
 0x1af   : > { %v900_v31 = vpop.f32.mrf.mxu0 }
 0x1b0   : > { %v903_v32 = vmul.f32 0.35355338, %v900_v31  ;;  %v1087_v31 = vld [vmem:[%s6238_s9] sm:$0xff] }
 0x1b2   : > { %v904_v33 = vsel %vm737_vm1, %v903_v32, -inf }
 0x1cd   : > { %v767_v20 = vpop.xlane.xlu0 %766 }
 0x1ce   : > { %v768_v21 = vsub.f32 %v764_v18, %v767_v20  ;;  %v828_v22 = vpop.f32.mrf.mxu3  ;;  %v1094_v18 = vld [vmem:[%s6238_s9 + $0x38] sm:$0xff]  ;;  %v1092_v20 = vld [vmem:[%s6238_s9 + $0x28] sm:$0xff] }
 0x1cf   : > { %v831_v23 = vmul.f32 0.35355338, %v828_v22  ;;  %1111 = vmatpush.msra.mxu3 %v1094_v18  ;;  %v1090_v22 = vld [vmem:[%s6238_s9 + $0x18] sm:$0xff] }
 0x1d0   : > { %v769_v24 = vmul.f32 1.442695, %v768_v21  ;;  %v1091_v21 = vld [vmem:[%s6238_s9 + $0x20] sm:$0xff] }
 0x1d1   : > { %v832_v25 = vsel %vm737_vm1, %v831_v23, -inf  ;;  %1112 = vmatpush.msra.mxu3 %v1093_v19 }
 0x1d2   : > { %4622 = vpow2.f32 %v769_v24  ;;  %833 = vmax.xlane.f32.xlu1 %v832_v25 }
 0x1d3   : > { %1113 = vmatpush.msra.mxu3 %v1092_v20 }
 0x1d5   : > { %1114 = vmatpush.msra.mxu3 %v1091_v21 }
 0x1d6   : > { %v972_v26 = vpop.f32.mrf.mxu3 }
 0x1d7   : > { %v975_v27 = vmul.f32 0.35355338, %v972_v26  ;;  %1115 = vmatpush.msra.mxu3 %v1090_v22 }
 0x1d8   : > { %v4623_v28 = vpop.eup %4622 }
 0x1d9   : > { %v976_v29 = vsel %vm737_vm1, %v975_v27, -inf  ;;  %v771_v30 = vsel %vm737_vm1, %v4623_v28, 0.0 }
 0x1da   : > { %977 = vmax.xlane.f32.xlu2 %v976_v29  ;;  %772 = vadd.xlane.f32.xlu0 %v771_v30  ;;  %v1089_v29 = vld [vmem:[%s6238_s9 + $0x10] sm:$0xff]  ;;  %v1088_v30 = vld [vmem:[%s6238_s9 + $0x8] sm:$0xff] }
 0x1db   : > { %1116 = vmatpush.msra.mxu3 %v1089_v29 }
 0x1dd   : > { %1117 = vmatpush.msra.mxu3 %v1088_v30 }
 0x1df   : > { %1118 = vmatpush.msra.mxu3 %v1087_v31 }
 0x1e2   : > { %905 = vmax.xlane.f32.xlu2 %v904_v33  ;;  %v4216_v33 = vld [vmem:[%s6232_s3 + $0x28] sm:$0xff] }
 0x1fa   : > { %776 = vrot.lane.b32.xlu2 %v5316_v9, %s6266_s17 }
 0x202   : > { %915 = vrot.lane.b32.xlu2 %v5316_v9, %s6262_s28  ;;  %s6313_s28 = smov 72  }
 0x245   : > { %v834_v34 = vpop.xlane.xlu1 %833 }
 0x246   : > { %v835_v35 = vsub.f32 %v831_v23, %v834_v34  ;;  %v4601_v23 = vld [vmem:[#allocation4] ss:$0 sm:$0xff]  ;;  %v4215_v34 = vld [vmem:[%s6232_s3 + $0x20] sm:$0xff] }
 0x248   : > { %v836_v36 = vmul.f32 1.442695, %v835_v35  ;;  %v5421_v35 = vld [vmem:[%s673_s24] sm:$0x7]  ;;  %s6306_s24 = smov 88  }
 0x24a   : > { %4624 = vpow2.f32 %v836_v36  ;;  %v4602_v36 = vld [vmem:[#allocation10] ss:$0 sm:$0xff] }
 0x24d   : > { %v978_v37 = vpop.xlane.xlu2 %977  ;;  %v773_v39 = vpop.xlane.xlu0 %772 }
 0x24e   : > { %4626 = vrcp.f32 %v773_v39  ;;  %v979_v43 = vsub.f32 %v975_v27, %v978_v37 }
 0x250   : > { %v4625_v38 = vpop.eup %4624  ;;  %v980_v46 = vmul.f32 1.442695, %v979_v43  ;;  %v4220_v43 = vld [vmem:[%s6233_s4 + $0x20] sm:$0xff] }
 0x251   : > { %v838_v40 = vsel %vm737_vm1, %v4625_v38, 0.0 }
 0x252   : > { %839 = vadd.xlane.f32.xlu1 %v838_v40  ;;  %v4223_v40 = vld [vmem:[%s6233_s4 + $0x38] sm:$0xff] }
 0x254   : > { %v4627_v45 = vpop.eup %4626 }
 0x255   : > { %v906_v41 = vpop.xlane.xlu2 %905  ;;  %v775_v48 = vmul.f32 %v4627_v45, %v4623_v28  ;;  %v4603_v45 = vld [vmem:[#allocation11] ss:$0 sm:$0xff] }
 0x256   : > { %v907_v42 = vsub.f32 %v903_v32, %v906_v41  ;;  %v4217_v32 = vld [vmem:[%s6232_s3 + $0x30] sm:$0xff] }
 0x257   : > { %v4222_v41 = vld [vmem:[%s6233_s4 + $0x30] sm:$0xff] }
 0x258   : > { %v908_v44 = vmul.f32 1.442695, %v907_v42  ;;  %v4221_v42 = vld [vmem:[%s6233_s4 + $0x28] sm:$0xff] }
 0x25a   : > { %4628 = vpow2.f32 %v908_v44 }
 0x25b   : > { %4630 = vpow2.f32 %v980_v46 }
 0x25d   : > { %v777_v47 = vpop.permute.xlu2 %776 }
 0x25e   : > { %797 = vmatpush.msrb.mxu2 %v777_v47  ;;  %v1124_v47 = vstv %s4214_s14  ;;  %s6308_s14 = smov 8  }
 0x25f   : > { %4201 = vmatmul.msk.f32.vlgmr.msrb.gmra.mxu2 %vm737_vm1, %v775_v48 }
 0x260   : > { %v4629_v49 = vpop.eup %4628 }
 0x261   : > { %v910_v50 = vsel %vm737_vm1, %v4629_v49, 0.0  ;;  %v4631_v52 = vpop.eup %4630 }
 0x262   : > { %911 = vadd.xlane.f32.xlu0 %v910_v50  ;;  %v982_v53 = vsel %vm737_vm1, %v4631_v52, 0.0 }
 0x265   : > { %v916_v51 = vpop.permute.xlu2 %915 }
 0x266   : > { %936 = vmatpush.msrb.mxu1 %v916_v51 }
 0x268   : > { %1078 = vmatpush.msra.mxu1 %v1058_v14 }
 0x26a   : > { %983 = vadd.xlane.f32.xlu0 %v982_v53  ;;  %1079 = vmatpush.msra.mxu1 %v1057_v15 }
 0x26b   : > { %843 = vrot.lane.b32.xlu1 %v5316_v9, %s6264_s27  ;;  %s4328_s27 = sld [smem:[#allocation13 + $0x180]] }
 0x26c   : > { %1080 = vmatpush.msra.mxu1 %v1056_v16 }
 0x26e   : > { %1081 = vmatpush.msra.mxu1 %v1055_v17 }
 0x27e   : > { %987 = vrot.lane.b32.xlu0 %v5316_v9, %s6268_s16  ;;  %v1020_v9 = vld [vmem:[%s6234_s5] sm:$0xff] }
 0x27f   : > { %1046 = vmatpush.msra.mxu0 %v1020_v9 }
 0x281   : > { %1175 = vmatpush.msrb.mxu0 %v4223_v40 }
 0x283   : > { %1176 = vmatpush.msrb.mxu0 %v4222_v41  ;;  %v4255_v41 = vld [vmem:[%s6232_s3 + $0x48] sm:$0xff] }
 0x285   : > { %1177 = vmatpush.msrb.mxu0 %v4221_v42 }
 0x287   : > { %1178 = vmatpush.msrb.mxu0 %v4220_v43  ;;  %v4254_v43 = vld [vmem:[%s6232_s3 + $0x40] sm:$0xff] }
 0x2c5   : > { %v840_v54 = vpop.xlane.xlu1 %839 }
 0x2c6   : > { %4632 = vrcp.f32 %v840_v54 }
 0x2cc   : > { %v4633_v56 = vpop.eup %4632 }
 0x2cd   : > { %v842_v58 = vmul.f32 %v4633_v56, %v4625_v38 }
 0x2d5   : > { %v912_v55 = vpop.xlane.xlu0 %911 }
 0x2d6   : > { %4634 = vrcp.f32 %v912_v55 }
 0x2dc   : > { %v4635_v57 = vpop.eup %4634 }
 0x2dd   : > { %v844_v59 = vpop.permute.xlu1 %843  ;;  %v914_v60 = vmul.f32 %v4635_v57, %v4629_v49  ;;  %v984_v62 = vpop.xlane.xlu0 %983 }
 0x2de   : > { %864 = vmatpush.msra.mxu2 %v844_v59  ;;  %4636 = vrcp.f32 %v984_v62 }
 0x2df   : > { %4204 = vmatmul.msk.f32.vlgmr.msra.gmra.mxu2 %vm737_vm1, %v842_v58  ;;  %4207 = vmatmul.msk.f32.vlgmr.msrb.gmra.mxu1 %vm737_vm1, %v914_v60 }
 0x2e2   : > { %v799_v61 = vpop.f32.mrf.mxu2 }
 0x2e3   : > { %802 = vst.msk [vmem:[#allocation3] sm:$0xff] %vm737_vm1, %v799_v61 }
 0x2e4   : > { %v4637_v63 = vpop.eup %4636 }
 0x2e5   : > { %v986_v0 = vmul.f32 %v4637_v63, %v4631_v52 }
 0x2f0   : > { %v988_v1 = vpop.permute.xlu0 %987 }
 0x2f1   : > { %1008 = vmatpush.msrb.mxu2 %v988_v1 }
 0x2f2   : > { %4210 = vmatmul.msk.f32.vlgmr.msrb.gmra.mxu2 %vm737_vm1, %v986_v0 }
 0x35c   : > { %v938_v2 = vpop.f32.mrf.mxu1 }
 0x35d   : > { %942 = vrot.lane.b32.xlu2 %v938_v2, %s6256_s26  ;;  %s1051_s26 = sld [smem:[#allocation13]] }
 0x362   : > { %v866_v3 = vpop.f32.mrf.mxu2 }
 0x363   : > { %870 = vrot.lane.b32.xlu1 %v866_v3, %s6258_s29  ;;  %v1052_v25 = vstv %s1051_s26  ;;  %s6311_s29 = smov 120   ;;  %s4421_s26 = sld [smem:[#allocation13 + $0x281]] }
 0x375   : > { %v1010_v4 = vpop.f32.mrf.mxu2 }
 0x376   : > { %1014 = vrot.lane.b32.xlu1 %v1010_v4, %s6260_s7  ;;  %s6314_s7 = smov 96  }
 0x3b7   : > { %v943_v11 = vpop.permute.xlu2 %942 }
 0x3d5   : > { %v871_v10 = vpop.permute.xlu1 %870 }
 0x3d6   : > { %874 = vst.msk [vmem:[#allocation3] sm:$0xff] %vm873_vm2, %v871_v10 }
 0x3d7   : > { %946 = vst.msk [vmem:[#allocation3] sm:$0xff] %vm6277_vm3, %v943_v11 }
 0x3e8   : > { %v1015_v12 = vpop.permute.xlu1 %1014 }
 0x3e9   : > { %1018 = vst.msk [vmem:[#allocation3] sm:$0xff] %vm6276_vm4, %v1015_v12 }
 0x3f0   : > { %v1019_v13 = vld [vmem:[#allocation3] sm:$0xff] }
 0x3f1   : > { %4211 = vmatmul.msk.f32.vlgmr.msra.gmra.mxu0 %vm689_vm0, %v1019_v13 }
 0x46e   : > { %v1048_v24 = vpop.f32.mrf.mxu0 }
 0x46f   : > { %v1049_v26 = vadd.f32 %v4601_v23, %v1048_v24 }
 0x471   : > { %v1053_v27 = vmul.f32 %v1052_v25, %v1049_v26 }
 0x473   : > { %v1054_v28 = vadd.f32 %v1053_v27, %v5310_v8  ;;  %v4218_v8 = vld [vmem:[%s6232_s3 + $0x38] sm:$0xff] }
 0x474   : > { %1147 = vmatpush.msra.mxu2 %v4218_v8 }
 0x475   : > { %4212 = vmatmul.msk.f32.vlgmr.msra.gmra.mxu1 %vm689_vm0, %v1054_v28 }
 0x476   : > { %1148 = vmatpush.msra.mxu2 %v4217_v32 }
 0x478   : > { %1149 = vmatpush.msra.mxu2 %v4216_v33 }
 0x47a   : > { %1150 = vmatpush.msra.mxu2 %v4215_v34 }
 0x47b   : > { %4219 = vmatmul.msk.f32.vlgmr.msra.gmra.mxu2 %vm689_vm0, %v5421_v35 }
 0x4f2   : > { %v1083_v37 = vpop.f32.mrf.mxu1 }
 0x4f3   : > { %v1084_v38 = vadd.f32 %v4602_v36, %v1083_v37  ;;  %v4257_v37 = vld [vmem:[%s6232_s3 + $0x58] sm:$0xff] }
 0x4f5   : > { %v1086_v39 = vmax.f32 %v1084_v38, 0.0 }
 0x4f7   : > { %4213 = vmatmul.msk.f32.vlgmr.msra.gmra.mxu3 %vm1099_vm5, %v1086_v39  ;;  %v4256_v39 = vld [vmem:[%s6232_s3 + $0x50] sm:$0xff] }
 0x4fe   : > { %v1152_v44 = vpop.f32.mrf.mxu2 }
 0x4ff   : > { %1321 = vrot.lane.b32.xlu2 %v1152_v44, %s6270_s21 }
 0x559   : > { %v1322_v52 = vpop.permute.xlu2 %1321 }
 0x57a   : > { %v1120_v46 = vpop.f32.mrf.mxu3 }
 0x57b   : > { %v1121_v48 = vadd.f32 %v4603_v45, %v1120_v46 }
 0x57d   : > { %v1125_v49 = vmul.f32 %v1124_v47, %v1121_v48 }
 0x57f   : > { %v5439_v50 = vadd.f32 %v1125_v49, %v1054_v28 }
 0x581   : > { %4224 = vmatmul.msk.f32.vlgmr.msrb.gmra.mxu0 %vm689_vm0, %v5439_v50 }
 0x5fe   : > { %v5443_v51 = vpop.f32.mrf.mxu0 }
 0x5ff   : > { %1251 = vrot.lane.b32.xlu1 %v5443_v51, %s6272_s10  ;;  %1323 = vrot.lane.b32.xlu0 %v5443_v51, %s6270_s21  ;;  %s6321_s21 = sld [smem:[#allocation42_spill]] }
 0x600   : > { %4225 = vmatpush.xpose.msk.msrb.mxu1 %vm737_vm1, %v5443_v51  ;;  %1395 = vrot.lane.b32.xlu2 %v5443_v51, %s6274_s20 }
 0x603   : > { %4226 = vmatmul.msk.f32.vlgmr.msrb.gmra.mxu1 %vm737_vm1, %v1152_v44 }
 0x607   : > { %1249 = vrot.lane.b32.xlu0 %v1152_v44, %s6272_s10  ;;  %1393 = vrot.lane.b32.xlu1 %v1152_v44, %s6274_s20 }
 0x65a   : > { %v1396_v55 = vpop.permute.xlu2 %1395 }
 0x671   : > { %v1252_v53 = vpop.permute.xlu1 %1251  ;;  %v1324_v54 = vpop.permute.xlu0 %1323 }
 0x672   : > { %4228 = vmatpush.xpose.msk.msra.mxu0 %vm737_vm1, %v1252_v53  ;;  %4231 = vmatpush.xpose.msk.msrb.mxu3 %vm737_vm1, %v1324_v54  ;;  %v4240_v53 = vld [vmem:[%s6234_s5 + $0x38] sm:$0xff]  ;;  %v4239_v54 = vld [vmem:[%s6234_s5 + $0x30] sm:$0xff] }
 0x675   : > { %4232 = vmatmul.msk.f32.vlgmr.msrb.gmra.mxu3 %vm737_vm1, %v1322_v52 }
 0x676   : > { %4234 = vmatpush.xpose.msk.msrb.mxu0 %vm737_vm1, %v1396_v55  ;;  %1491 = vmatpush.msra.mxu3 %v4240_v53  ;;  %v4238_v55 = vld [vmem:[%s6234_s5 + $0x28] sm:$0xff] }
 0x678   : > { %1492 = vmatpush.msra.mxu3 %v4239_v54 }
 0x679   : > { %v1250_v56 = vpop.permute.xlu0 %1249  ;;  %v1394_v57 = vpop.permute.xlu1 %1393 }
 0x67a   : > { %4229 = vmatmul.msk.f32.vlgmr.msra.gmra.mxu0 %vm737_vm1, %v1250_v56  ;;  %v4237_v56 = vld [vmem:[%s6234_s5 + $0x20] sm:$0xff]  ;;  %1493 = vmatpush.msra.mxu3 %v4238_v55 }
 0x67c   : > { %1494 = vmatpush.msra.mxu3 %v4237_v56 }
 0x680   : > { %v1206_v58 = vpop.f32.mrf.mxu1 }
 0x681   : > { %v1209_v59 = vmul.f32 0.35355338, %v1206_v58 }
 0x682   : > { %4235 = vmatmul.msk.f32.vlgmr.msrb.gmra.mxu0 %vm737_vm1, %v1394_v57 }
 0x683   : > { %v1211_v60 = vsel %vm1210_vm6, %v1209_v59, -inf }
 0x684   : > { %1212 = vmax.xlane.f32.xlu0 %v1211_v60 }
 0x6f7   : > { %v1274_v61 = vpop.f32.mrf.mxu0  ;;  %v1213_v6 = vpop.xlane.xlu0 %1212 }
 0x6f8   : > { %v1277_v62 = vmul.f32 0.35355338, %v1274_v61  ;;  %v1346_v63 = vpop.f32.mrf.mxu3  ;;  %v1214_v7 = vsub.f32 %v1209_v59, %v1213_v6  ;;  %v1507_v61 = vld [vmem:[#allocation8 + $0x38] sm:$0xff] }
 0x6f9   : > { %v1349_v0 = vmul.f32 0.35355338, %v1346_v63  ;;  %v1505_v63 = vld [vmem:[#allocation8 + $0x28] sm:$0xff]  ;;  %v4604_v6 = vld [vmem:[#allocation4 + $0x1] ss:$0 sm:$0xff] }
 0x6fa   : > { %v1278_v1 = vsel %vm1210_vm6, %v1277_v62, -inf  ;;  %v1215_v9 = vmul.f32 1.442695, %v1214_v7 }
 0x6fb   : > { %1279 = vmax.xlane.f32.xlu2 %v1278_v1  ;;  %v1350_v2 = vsel %vm1210_vm6, %v1349_v0, -inf  ;;  %v4251_v1 = vld [vmem:[%s6238_s9 + $0x78] sm:$0xff] }
 0x6fc   : > { %1351 = vmax.xlane.f32.xlu1 %v1350_v2  ;;  %4638 = vpow2.f32 %v1215_v9  ;;  %v4250_v2 = vld [vmem:[%s6238_s9 + $0x70] sm:$0xff]  ;;  %1562 = vmatpush.msra.mxu0 %v4251_v1 }
 0x6fe   : > { %1563 = vmatpush.msra.mxu0 %v4250_v2 }
 0x6ff   : > { %v1418_v3 = vpop.f32.mrf.mxu0 }
 0x700   : > { %v1421_v4 = vmul.f32 0.35355338, %v1418_v3  ;;  %v4249_v3 = vld [vmem:[%s6238_s9 + $0x68] sm:$0xff] }
 0x701   : > { %1564 = vmatpush.msra.mxu0 %v4249_v3 }
 0x702   : > { %v1422_v5 = vsel %vm1210_vm6, %v1421_v4, -inf  ;;  %v4639_v10 = vpop.eup %4638 }
 0x703   : > { %1423 = vmax.xlane.f32.xlu0 %v1422_v5  ;;  %v1217_v11 = vsel %vm1210_vm6, %v4639_v10, 0.0  ;;  %v4247_v5 = vld [vmem:[%s6238_s9 + $0x58] sm:$0xff] }
 0x713   : > { %1222 = vrot.lane.b32.xlu2 %v5443_v51, %s6266_s17  ;;  %s4242_s17 = sld [smem:[#allocation13 + $0x80]] }
 0x719   : > { %v1500_v9 = vstv %s4242_s17  ;;  %s4285_s17 = sld [smem:[#allocation13 + $0x100]] }
 0x73c   : > { %1218 = vadd.xlane.f32.xlu2 %v1217_v11 }
 0x754   : > { %1433 = vrot.lane.b32.xlu2 %v5443_v51, %s6268_s16  ;;  %s6315_s16 = sld [smem:[#allocation35_spill]] }
 0x75a   : > { %s669_s1 = scalar_lea.vmem %s6315_s16, %s5403_s0  ;;  %s4410_s16 = sld [smem:[#allocation13 + $0x280]] }
 0x76e   : > { %v1280_v12 = vpop.xlane.xlu2 %1279 }
 0x76f   : > { %v1281_v13 = vsub.f32 %v1277_v62, %v1280_v12  ;;  %v1352_v14 = vpop.xlane.xlu1 %1351  ;;  %v1506_v62 = vld [vmem:[#allocation8 + $0x30] sm:$0xff] }
 0x770   : > { %v1353_v15 = vsub.f32 %v1349_v0, %v1352_v14  ;;  %v1504_v0 = vld [vmem:[#allocation8 + $0x20] sm:$0xff]  ;;  %v4245_v14 = vld [vmem:[%s6238_s9 + $0x48] sm:$0xff] }
 0x771   : > { %v1282_v16 = vmul.f32 1.442695, %v1281_v13  ;;  %v4246_v13 = vld [vmem:[%s6238_s9 + $0x50] sm:$0xff] }
 0x772   : > { %v1354_v17 = vmul.f32 1.442695, %v1353_v15  ;;  %v4244_v15 = vld [vmem:[%s6238_s9 + $0x40] sm:$0xff] }
 0x773   : > { %4640 = vpow2.f32 %v1282_v16  ;;  %v4605_v16 = vld [vmem:[#allocation10 + $0x1] ss:$0 sm:$0xff] }
 0x774   : > { %4642 = vpow2.f32 %v1354_v17 }
 0x776   : > { %v1223_v18 = vpop.permute.xlu2 %1222  ;;  %v1424_v19 = vpop.xlane.xlu0 %1423 }
 0x777   : > { %v1425_v20 = vsub.f32 %v1421_v4, %v1424_v19  ;;  %1243 = vmatpush.msrb.mxu2 %v1223_v18  ;;  %v4248_v4 = vld [vmem:[%s6238_s9 + $0x60] sm:$0xff]  ;;  %v4262_v19 = vld [vmem:[%s6233_s4 + $0x58] sm:$0xff] }
 0x778   : > { %1565 = vmatpush.msra.mxu0 %v4248_v4  ;;  %1623 = vmatpush.msrb.mxu3 %v4262_v19  ;;  %v5624_v19 = vld [vmem:[%s669_s1] sm:$0xf]  ;;  %s4371_s1 = sld [smem:[#allocation13 + $0x200]] }
 0x779   : > { %v4641_v21 = vpop.eup %4640  ;;  %v1426_v22 = vmul.f32 1.442695, %v1425_v20  ;;  %v4261_v20 = vld [vmem:[%s6233_s4 + $0x50] sm:$0xff] }
 0x77a   : > { %v4643_v23 = vpop.eup %4642  ;;  %v1284_v24 = vsel %vm1210_vm6, %v4641_v21, 0.0  ;;  %1566 = vmatpush.msra.mxu0 %v4247_v5  ;;  %1624 = vmatpush.msrb.mxu3 %v4261_v20 }
 0x77b   : > { %4644 = vpow2.f32 %v1426_v22  ;;  %1285 = vadd.xlane.f32.xlu1 %v1284_v24  ;;  %v1356_v25 = vsel %vm1210_vm6, %v4643_v23, 0.0  ;;  %v4259_v22 = vld [vmem:[%s6233_s4 + $0x40] sm:$0xff] }
 0x77c   : > { %1357 = vadd.xlane.f32.xlu0 %v1356_v25  ;;  %1567 = vmatpush.msra.mxu0 %v4246_v13 }
 0x77e   : > { %1568 = vmatpush.msra.mxu0 %v4245_v14  ;;  %v4299_v14 = vld [vmem:[%s6232_s3 + $0x70] sm:$0xff] }
 0x780   : > { %1569 = vmatpush.msra.mxu0 %v4244_v15 }
 0x781   : > { %v4645_v26 = vpop.eup %4644 }
 0x782   : > { %v1428_v27 = vsel %vm1210_vm6, %v4645_v26, 0.0 }
 0x783   : > { %1429 = vadd.xlane.f32.xlu1 %v1428_v27 }
 0x790   : > { %1289 = vrot.lane.b32.xlu0 %v5443_v51, %s6306_s24 }
 0x79c   : > { %1361 = vrot.lane.b32.xlu1 %v5443_v51, %s6307_s30 }
 0x7af   : > { %v1219_v28 = vpop.xlane.xlu2 %1218 }
 0x7b0   : > { %4646 = vrcp.f32 %v1219_v28 }
 0x7b6   : > { %v4647_v29 = vpop.eup %4646 }
 0x7b7   : > { %v1221_v30 = vmul.f32 %v4647_v29, %v4639_v10  ;;  %v1434_v38 = vpop.permute.xlu2 %1433 }
 0x7b9   : > { %4227 = vmatmul.msk.f32.vlgmr.msrb.gmra.mxu2 %vm737_vm1, %v1221_v30 }
 0x7ee   : > { %v1286_v31 = vpop.xlane.xlu1 %1285 }
 0x7ef   : > { %4648 = vrcp.f32 %v1286_v31  ;;  %v1358_v8 = vpop.xlane.xlu0 %1357 }
 0x7f5   : > { %v4649_v33 = vpop.eup %4648 }
 0x7f6   : > { %v1430_v32 = vpop.xlane.xlu1 %1429  ;;  %v1288_v34 = vmul.f32 %v4649_v33, %v4641_v21  ;;  %v4260_v21 = vld [vmem:[%s6233_s4 + $0x48] sm:$0xff] }
 0x7f7   : > { %4650 = vrcp.f32 %v1430_v32  ;;  %1625 = vmatpush.msrb.mxu3 %v4260_v21 }
 0x7f8   : > { %4652 = vrcp.f32 %v1358_v8 }
 0x7f9   : > { %1626 = vmatpush.msrb.mxu3 %v4259_v22 }
 0x7fd   : > { %v4651_v40 = vpop.eup %4650 }
 0x7fe   : > { %v1432_v42 = vmul.f32 %v4651_v40, %v4645_v26  ;;  %v4653_v44 = vpop.eup %4652 }
 0x7ff   : > { %v1360_v45 = vmul.f32 %v4653_v44, %v4643_v23  ;;  %v4606_v23 = vld [vmem:[#allocation11 + $0x1] ss:$0 sm:$0xff] }
 0x802   : > { %v1290_v36 = vpop.permute.xlu0 %1289 }
 0x803   : > { %1310 = vmatpush.msra.mxu1 %v1290_v36 }
 0x804   : > { %4230 = vmatmul.msk.f32.vlgmr.msra.gmra.mxu1 %vm737_vm1, %v1288_v34 }
 0x805   : > { %1454 = vmatpush.msrb.mxu1 %v1434_v38 }
 0x807   : > { %1595 = vmatpush.msra.mxu1 %v4257_v37 }
 0x809   : > { %1596 = vmatpush.msra.mxu1 %v4256_v39 }
 0x80b   : > { %1597 = vmatpush.msra.mxu1 %v4255_v41 }
 0x80c   : > { %4236 = vmatmul.msk.f32.vlgmr.msrb.gmra.mxu1 %vm737_vm1, %v1432_v42 }
 0x80d   : > { %1598 = vmatpush.msra.mxu1 %v4254_v43 }
 0x80e   : > { %v1362_v46 = vpop.permute.xlu1 %1361 }
 0x80f   : > { %1382 = vmatpush.msra.mxu2 %v1362_v46 }
 0x810   : > { %4233 = vmatmul.msk.f32.vlgmr.msra.gmra.mxu2 %vm737_vm1, %v1360_v45 }
 0x811   : > { %1528 = vmatpush.msrb.mxu2 %v1507_v61 }
 0x813   : > { %1529 = vmatpush.msrb.mxu2 %v1506_v62 }
 0x814   : > { %4258 = vmatmul.msk.f32.vlgmr.msra.gmra.mxu1 %vm689_vm0, %v5439_v50 }
 0x815   : > { %1530 = vmatpush.msrb.mxu2 %v1505_v63 }
 0x817   : > { %1531 = vmatpush.msrb.mxu2 %v1504_v0 }
 0x83c   : > { %v1245_v47 = vpop.f32.mrf.mxu2 }
 0x83d   : > { %1248 = vst.msk [vmem:[#allocation3] sm:$0x7] %vm1210_vm6, %v1245_v47 }
 0x881   : > { %v1312_v48 = vpop.f32.mrf.mxu1 }
 0x882   : > { %1316 = vrot.lane.b32.xlu0 %v1312_v48, %s6308_s14 }
 0x889   : > { %v1456_v49 = vpop.f32.mrf.mxu1 }
 0x88a   : > { %1460 = vrot.lane.b32.xlu0 %v1456_v49, %s6309_s18 }
 0x891   : > { %v5500_v52 = vpop.f32.mrf.mxu1 }
 0x893   : > { %v1384_v51 = vpop.f32.mrf.mxu2 }
 0x894   : > { %1388 = vrot.lane.b32.xlu2 %v1384_v51, %s6310_s23 }
 0x89c   : > { %1698 = vrot.lane.b32.xlu2 %v5500_v52, %s6272_s10  ;;  %s4253_s10 = sld [smem:[#allocation13 + $0x81]] }
 0x8a2   : > { %v1575_v25 = vstv %s4253_s10  ;;  %s4339_s10 = sld [smem:[#allocation13 + $0x181]] }
 0x8ee   : > { %v1389_v58 = vpop.permute.xlu2 %1388 }
 0x8f4   : > { %v1317_v57 = vpop.permute.xlu0 %1316 }
 0x8f5   : > { %1320 = vst.msk [vmem:[#allocation3] sm:$0x7] %vm1319_vm7, %v1317_v57 }
 0x8f6   : > { %1392 = vst.msk [vmem:[#allocation3] sm:$0x7] %vm1391_vm8, %v1389_v58  ;;  %v1699_v30 = vpop.permute.xlu2 %1698 }
 0x8fc   : > { %v1461_v59 = vpop.permute.xlu0 %1460 }
 0x8fd   : > { %1464 = vst.msk [vmem:[#allocation3] sm:$0x7] %vm1463_vm9, %v1461_v59 }
 0x904   : > { %v1465_v60 = vld [vmem:[#allocation3] sm:$0x7] }
 0x905   : > { %4241 = vmatmul.msk.f32.vlgmr.msra.gmra.mxu3 %vm689_vm0, %v1465_v60 }
 0x988   : > { %v1496_v7 = vpop.f32.mrf.mxu3 }
 0x989   : > { %v1497_v10 = vadd.f32 %v4604_v6, %v1496_v7 }
 0x98b   : > { %v1501_v11 = vmul.f32 %v1500_v9, %v1497_v10 }
 0x98d   : > { %v1502_v12 = vadd.f32 %v1501_v11, %v5421_v35 }
 0x98f   : > { %4243 = vmatmul.msk.f32.vlgmr.msrb.gmra.mxu2 %vm689_vm0, %v1502_v12 }
 0xa12   : > { %v1533_v17 = vpop.f32.mrf.mxu2 }
 0xa13   : > { %v1534_v35 = vadd.f32 %v4605_v16, %v1533_v17  ;;  %v4298_v17 = vld [vmem:[%s6232_s3 + $0x68] sm:$0xff] }
 0xa15   : > { %v1536_v18 = vmax.f32 %v1534_v35, 0.0 }
 0xa17   : > { %4252 = vmatmul.msk.f32.vlgmr.msra.gmra.mxu0 %vm1099_vm5, %v1536_v18  ;;  %v4297_v18 = vld [vmem:[%s6232_s3 + $0x60] sm:$0xff] }
 0xa94   : > { %v1571_v24 = vpop.f32.mrf.mxu0 }
 0xa95   : > { %v1572_v26 = vadd.f32 %v4606_v23, %v1571_v24 }
 0xa97   : > { %v1576_v27 = vmul.f32 %v1575_v25, %v1572_v26 }
 0xa99   : > { %v5559_v28 = vadd.f32 %v1576_v27, %v1502_v12  ;;  %v4300_v12 = vld [vmem:[%s6232_s3 + $0x78] sm:$0xff] }
 0xa9a   : > { %v4283_v27 = vld [vmem:[%s6234_s5 + $0x58] sm:$0xff] }
 0xa9b   : > { %4263 = vmatmul.msk.f32.vlgmr.msrb.gmra.mxu3 %vm689_vm0, %v5559_v28 }
 0xb1e   : > { %v5563_v29 = vpop.f32.mrf.mxu3 }
 0xb1f   : > { %1842 = vrot.lane.b32.xlu0 %v5563_v29, %s6274_s20  ;;  %1700 = vrot.lane.b32.xlu1 %v5563_v29, %s6311_s29 }
 0xb20   : > { %4264 = vmatpush.xpose.msk.msra.mxu2 %vm737_vm1, %v5563_v29  ;;  %1771 = vrot.lane.b32.xlu2 %v5563_v29, %s6312_s19 }
 0xb23   : > { %4265 = vmatmul.msk.f32.vlgmr.msra.gmra.mxu2 %vm737_vm1, %v5500_v52 }
 0xb27   : > { %1769 = vrot.lane.b32.xlu0 %v5500_v52, %s6312_s19  ;;  %1840 = vrot.lane.b32.xlu1 %v5500_v52, %s6274_s20 }
 0xb7a   : > { %v1772_v31 = vpop.permute.xlu2 %1771 }
 0xb7b   : > { %4272 = vmatpush.xpose.msk.msrb.mxu0 %vm737_vm1, %v1772_v31  ;;  %v4281_v31 = vld [vmem:[%s6234_s5 + $0x48] sm:$0xff] }
 0xb7f   : > { %1937 = vmatpush.msra.mxu0 %v4283_v27 }
 0xb91   : > { %v1843_v8 = vpop.permute.xlu0 %1842  ;;  %v1701_v32 = vpop.permute.xlu1 %1700 }
 0xb92   : > { %4268 = vmatpush.xpose.msk.msra.mxu3 %vm737_vm1, %v1701_v32  ;;  %v4305_v32 = vld [vmem:[%s6233_s4 + $0x78] sm:$0xff] }
 0xb95   : > { %4269 = vmatmul.msk.f32.vlgmr.msra.gmra.mxu3 %vm737_vm1, %v1699_v30 }
 0xb96   : > { %4276 = vmatpush.xpose.msk.msrb.mxu3 %vm737_vm1, %v1843_v8  ;;  %v4280_v8 = vld [vmem:[%s6234_s5 + $0x40] sm:$0xff] }
 0xb99   : > { %v1770_v33 = vpop.permute.xlu0 %1769  ;;  %v1841_v34 = vpop.permute.xlu1 %1840 }
 0xb9a   : > { %4273 = vmatmul.msk.f32.vlgmr.msrb.gmra.mxu0 %vm737_vm1, %v1770_v33  ;;  %v4304_v33 = vld [vmem:[%s6233_s4 + $0x70] sm:$0xff] }
 0xb9d   : > { %4277 = vmatmul.msk.f32.vlgmr.msrb.gmra.mxu3 %vm737_vm1, %v1841_v34  ;;  %v4303_v34 = vld [vmem:[%s6233_s4 + $0x68] sm:$0xff] }
 0xba6   : > { %v1654_v36 = vpop.f32.mrf.mxu2 }
 0xba7   : > { %v1658_v37 = vsel %vm1657_vm10, %v1654_v36, -inf }
 0xba8   : > { %1659 = vmax.xlane.f32.xlu2 %v1658_v37 }
 0xbc0   : > { %1737 = vrot.lane.b32.xlu2 %v5563_v29, %s6306_s24 }
 0xc17   : > { %v1794_v42 = vpop.f32.mrf.mxu0 }
 0xc18   : > { %v1723_v38 = vpop.f32.mrf.mxu3  ;;  %v1797_v46 = vsel %vm1657_vm10, %v1794_v42, -inf }
 0xc19   : > { %v1726_v39 = vsel %vm1657_vm10, %v1723_v38, -inf }
 0xc1a   : > { %1727 = vmax.xlane.f32.xlu1 %v1726_v39 }
 0xc1b   : > { %v1660_v40 = vpop.xlane.xlu2 %1659 }
 0xc1c   : > { %v1661_v41 = vsub.f32 %v1654_v36, %v1660_v40  ;;  %v4302_v36 = vld [vmem:[%s6233_s4 + $0x60] sm:$0xff] }
 0xc1e   : > { %v1662_v43 = vmul.f32 1.442695, %v1661_v41 }
 0xc20   : > { %4654 = vpow2.f32 %v1662_v43  ;;  %v1865_v44 = vpop.f32.mrf.mxu3  ;;  %v2091_v43 = vld [vmem:[#allocation15] sm:$0xf] }
 0xc21   : > { %v1868_v45 = vsel %vm1657_vm10, %v1865_v44, -inf }
 0xc22   : > { %1869 = vmax.xlane.f32.xlu0 %v1868_v45  ;;  %1798 = vmax.xlane.f32.xlu1 %v1797_v46 }
 0xc23   : > { %v1738_v47 = vpop.permute.xlu2 %1737 }
 0xc24   : > { %4270 = vmatpush.msk.msrb.mxu2 %vm1674_vm11, %v1738_v47 }
 0xc26   : > { %v4655_v48 = vpop.eup %4654 }
 0xc27   : > { %v1664_v49 = vsel %vm1657_vm10, %v4655_v48, 0.0 }
 0xc2a   : > { %1665 = vadd.xlane.f32.xlu0 %v1664_v49  ;;  %v1952_v49 = vld [vmem:[#allocation8 + $0x50] sm:$0xff] }
 0xc8d   : > { %v1728_v51 = vpop.xlane.xlu1 %1727 }
 0xc8e   : > { %v1729_v52 = vsub.f32 %v1723_v38, %v1728_v51  ;;  %v1951_v51 = vld [vmem:[#allocation8 + $0x48] sm:$0xff] }
 0xc90   : > { %v1730_v53 = vmul.f32 1.442695, %v1729_v52  ;;  %v1950_v52 = vld [vmem:[#allocation8 + $0x40] sm:$0xff] }
 0xc92   : > { %4656 = vpow2.f32 %v1730_v53  ;;  %v4294_v53 = vld [vmem:[%s6238_s9 + $0xb8] sm:$0xff] }
 0xc93   : > { %2008 = vmatpush.msra.mxu3 %v4294_v53 }
 0xc95   : > { %v1870_v54 = vpop.xlane.xlu0 %1869  ;;  %v1799_v55 = vpop.xlane.xlu1 %1798 }
 0xc96   : > { %v1871_v56 = vsub.f32 %v1865_v44, %v1870_v54  ;;  %v1800_v57 = vsub.f32 %v1794_v42, %v1799_v55  ;;  %v2088_v42 = vld [vmem:[#allocation14] sm:$0xf]  ;;  %v4293_v54 = vld [vmem:[%s6238_s9 + $0xb0] sm:$0xff] }
 0xc97   : > { %v4292_v55 = vld [vmem:[%s6238_s9 + $0xa8] sm:$0xff]  ;;  %2009 = vmatpush.msra.mxu3 %v4293_v54 }
 0xc98   : > { %v4657_v58 = vpop.eup %4656  ;;  %v1872_v59 = vmul.f32 1.442695, %v1871_v56  ;;  %v1801_v60 = vmul.f32 1.442695, %v1800_v57  ;;  %v4291_v56 = vld [vmem:[%s6238_s9 + $0xa0] sm:$0xff]  ;;  %v4290_v57 = vld [vmem:[%s6238_s9 + $0x98] sm:$0xff] }
 0xc99   : > { %v1732_v61 = vsel %vm1657_vm10, %v4657_v58, 0.0  ;;  %2010 = vmatpush.msra.mxu3 %v4292_v55 }
 0xc9a   : > { %4658 = vpow2.f32 %v1872_v59  ;;  %1733 = vadd.xlane.f32.xlu2 %v1732_v61  ;;  %v4288_v59 = vld [vmem:[%s6238_s9 + $0x88] sm:$0xff]  ;;  %v4287_v61 = vld [vmem:[%s6238_s9 + $0x80] sm:$0xff] }
 0xc9b   : > { %4660 = vpow2.f32 %v1801_v60  ;;  %2011 = vmatpush.msra.mxu3 %v4291_v56  ;;  %v4607_v60 = vld [vmem:[#allocation4 + $0x2] ss:$0 sm:$0xff] }
 0xc9d   : > { %v1666_v5 = vpop.xlane.xlu0 %1665  ;;  %2012 = vmatpush.msra.mxu3 %v4290_v57 }
 0xca0   : > { %v4659_v62 = vpop.eup %4658 }
 0xca1   : > { %v4661_v63 = vpop.eup %4660  ;;  %v1874_v0 = vsel %vm1657_vm10, %v4659_v62, 0.0 }
 0xca2   : > { %1875 = vadd.xlane.f32.xlu1 %v1874_v0  ;;  %v1803_v1 = vsel %vm1657_vm10, %v4661_v63, 0.0 }
 0xca3   : > { %1804 = vadd.xlane.f32.xlu0 %v1803_v1 }
 0xcb2   : > { %1808 = vrot.lane.b32.xlu2 %v5563_v29, %s6307_s30 }
 0xcb7   : > { %1879 = vrot.lane.b32.xlu0 %v5563_v29, %s6313_s28 }
 0xcbb   : > { %1669 = vrot.lane.b32.xlu1 %v5563_v29, %s6314_s7  ;;  %v4282_v29 = vld [vmem:[%s6234_s5 + $0x50] sm:$0xff] }
 0xcbc   : > { %1938 = vmatpush.msra.mxu0 %v4282_v29 }
 0xcbe   : > { %1939 = vmatpush.msra.mxu0 %v4281_v31 }
 0xcc0   : > { %1940 = vmatpush.msra.mxu0 %v4280_v8 }
 0xcc2   : > { %2069 = vmatpush.msrb.mxu0 %v4305_v32 }
 0xcc4   : > { %2070 = vmatpush.msrb.mxu0 %v4304_v33 }
 0xcc6   : > { %2071 = vmatpush.msrb.mxu0 %v4303_v34 }
 0xcc8   : > { %2072 = vmatpush.msrb.mxu0 %v4302_v36 }
 0xd0d   : > { %v1734_v2 = vpop.xlane.xlu2 %1733 }
 0xd0e   : > { %4662 = vrcp.f32 %v1734_v2 }
 0xd14   : > { %v4663_v3 = vpop.eup %4662 }
 0xd15   : > { %v1736_v4 = vmul.f32 %v4663_v3, %v4657_v58  ;;  %v1876_v6 = vpop.xlane.xlu1 %1875  ;;  %v1809_v35 = vpop.permute.xlu2 %1808  ;;  %v4289_v58 = vld [vmem:[%s6238_s9 + $0x90] sm:$0xff] }
 0xd16   : > { %4664 = vrcp.f32 %v1876_v6  ;;  %v1805_v7 = vpop.xlane.xlu0 %1804  ;;  %2013 = vmatpush.msra.mxu3 %v4289_v58  ;;  %v4343_v58 = vld [vmem:[%s6232_s3 + $0x98] sm:$0xff] }
 0xd17   : > { %4271 = vmatmul.msk.f32.vlgmr.msrb.gmra.mxu2 %vm1657_vm10, %v1736_v4  ;;  %4666 = vrcp.f32 %v1666_v5 }
 0xd18   : > { %4668 = vrcp.f32 %v1805_v7  ;;  %2014 = vmatpush.msra.mxu3 %v4288_v59 }
 0xd1a   : > { %2015 = vmatpush.msra.mxu3 %v4287_v61 }
 0xd1c   : > { %v4665_v9 = vpop.eup %4664 }
 0xd1d   : > { %v1878_v10 = vmul.f32 %v4665_v9, %v4659_v62  ;;  %v4667_v13 = vpop.eup %4666  ;;  %v4608_v9 = vld [vmem:[#allocation10 + $0x2] ss:$0 sm:$0xff] }
 0xd1e   : > { %v1668_v15 = vmul.f32 %v4667_v13, %v4655_v48  ;;  %v4669_v20 = vpop.eup %4668  ;;  %v1953_v48 = vld [vmem:[#allocation8 + $0x58] sm:$0xff] }
 0xd1f   : > { %v1807_v21 = vmul.f32 %v4669_v20, %v4661_v63  ;;  %v1946_v63 = vstv %s4285_s17  ;;  %s6278_s17 = smov 32  }
 0xd29   : > { %v1880_v11 = vpop.permute.xlu0 %1879 }
 0xd2a   : > { %4278 = vmatpush.msk.msra.mxu2 %vm1674_vm11, %v1880_v11 }
 0xd2b   : > { %4279 = vmatmul.msk.f32.vlgmr.msra.gmra.mxu2 %vm1657_vm10, %v1878_v10 }
 0xd2c   : > { %2044 = vmatpush.msrb.mxu2 %v4300_v12 }
 0xd2d   : > { %v1670_v16 = vpop.permute.xlu1 %1669 }
 0xd2e   : > { %4266 = vmatpush.msk.msrb.mxu1 %vm1674_vm11, %v1670_v16  ;;  %2045 = vmatpush.msrb.mxu2 %v4299_v14 }
 0xd2f   : > { %4267 = vmatmul.msk.f32.vlgmr.msrb.gmra.mxu1 %vm1657_vm10, %v1668_v15 }
 0xd30   : > { %4274 = vmatpush.msk.msra.mxu1 %vm1674_vm11, %v1809_v35  ;;  %2046 = vmatpush.msrb.mxu2 %v4298_v17 }
 0xd32   : > { %2047 = vmatpush.msrb.mxu2 %v4297_v18  ;;  %1974 = vmatpush.msrb.mxu1 %v1953_v48 }
 0xd33   : > { %4301 = vmatmul.msk.f32.vlgmr.msrb.gmra.mxu2 %vm689_vm0, %v5624_v19 }
 0xd34   : > { %1975 = vmatpush.msrb.mxu1 %v1952_v49 }
 0xd36   : > { %1976 = vmatpush.msrb.mxu1 %v1951_v51 }
 0xd37   : > { %4275 = vmatmul.msk.f32.vlgmr.msra.gmra.mxu1 %vm1657_vm10, %v1807_v21 }
 0xd38   : > { %1977 = vmatpush.msrb.mxu1 %v1950_v52 }
 0xd9a   : > { %v1761_v22 = vpop.f32.mrf.mxu2 }
 0xd9b   : > { %1765 = vrot.lane.b32.xlu1 %v1761_v22, %s6308_s14 }
 0xdac   : > { %v1694_v23 = vpop.f32.mrf.mxu1 }
 0xdad   : > { %1697 = vst.msk [vmem:[#allocation3] sm:$0xff] %vm737_vm1, %v1694_v23 }
 0xdae   : > { %v1903_v24 = vpop.f32.mrf.mxu2 }
 0xdaf   : > { %1907 = vrot.lane.b32.xlu2 %v1903_v24, %s6309_s18 }
 0xdb4   : > { %v1832_v25 = vpop.f32.mrf.mxu1 }
 0xdb5   : > { %1836 = vrot.lane.b32.xlu0 %v1832_v25, %s6310_s23 }
 0xdb6   : > { %v2049_v26 = vpop.f32.mrf.mxu2 }
 0xdb7   : > { %2078 = vrot.lane.b32.xlu1 %v2049_v26, %s6312_s19  ;;  %v2089_v44 = vmul.f32 %v2088_v42, %v2049_v26 }
 0xdbd   : > { %2083 = vrot.lane.b32.xlu0 %v2049_v26, %s6310_s23 }
 0xe09   : > { %v1908_v38 = vpop.permute.xlu2 %1907 }
 0xe0d   : > { %v1766_v30 = vpop.permute.xlu1 %1765 }
 0xe0e   : > { %1768 = vst.msk [vmem:[#allocation3] sm:$0xff] %vm873_vm2, %v1766_v30 }
 0xe27   : > { %v1837_v37 = vpop.permute.xlu0 %1836 }
 0xe28   : > { %1839 = vst.msk [vmem:[#allocation3] sm:$0xff] %vm6277_vm3, %v1837_v37  ;;  %vm2623_vm3 = vcmask 1043456  }
 0xe29   : > { %1910 = vst.msk [vmem:[#allocation3] sm:$0xff] %vm6276_vm4, %v1908_v38  ;;  %v2079_v39 = vpop.permute.xlu1 %2078  ;;  %vm2604_vm4 = vcmask 26624  }
 0xe2a   : > { %2082 = vst.msk [vmem:[#allocation2] sm:$0xf] %vm2081_vm12, %v2079_v39 }
 0xe2f   : > { %v2084_v40 = vpop.permute.xlu0 %2083 }
 0xe30   : > { %v1911_v41 = vld [vmem:[#allocation3] sm:$0xff]  ;;  %2087 = vst.msk [vmem:[#allocation2] sm:$0xf] %vm2086_vm13, %v2084_v40 }
 0xe31   : > { %4284 = vmatmul.msk.f32.vlgmr.msra.gmra.mxu0 %vm689_vm0, %v1911_v41 }
 0xe37   : > { %v2090_v45 = vld [vmem:[#allocation2] sm:$0xf] }
 0xe38   : > { %v2092_v46 = vmul.f32 %v2091_v43, %v2090_v45 }
 0xe39   : > { %4306 = vmatmul.msk.f32.vlgmr.msrb.gmra.mxu0 %vm689_vm0, %v5559_v28 }
 0xe3a   : > { %v2093_v47 = vadd.f32 %v2092_v46, %v2089_v44 }
 0xe3c   : > { %2233 = vrot.lane.b32.xlu1 %v2093_v47, %s6312_s19 }
 0xeae   : > { %v1942_v62 = vpop.f32.mrf.mxu0  ;;  %v2234_v4 = vpop.permute.xlu1 %2233 }
 0xeaf   : > { %v1943_v0 = vadd.f32 %v4607_v60, %v1942_v62  ;;  %v4342_v60 = vld [vmem:[%s6232_s3 + $0x90] sm:$0xff]  ;;  %v4341_v62 = vld [vmem:[%s6232_s3 + $0x88] sm:$0xff] }
 0xeb1   : > { %v1947_v1 = vmul.f32 %v1946_v63, %v1943_v0  ;;  %v4340_v0 = vld [vmem:[%s6232_s3 + $0x80] sm:$0xff] }
 0xeb3   : > { %v5693_v2 = vadd.f32 %v1947_v1, %v5439_v50 }
 0xeb5   : > { %4286 = vmatmul.msk.f32.vlgmr.msrb.gmra.mxu1 %vm689_vm0, %v5693_v2 }
 0xeb6   : > { %v5697_v3 = vpop.f32.mrf.mxu0 }
 0xeb7   : > { %2235 = vrot.lane.b32.xlu2 %v5697_v3, %s6312_s19  ;;  %4307 = vmatpush.xpose.msk.msra.mxu1 %vm737_vm1, %v5697_v3 }
 0xeb8   : > { %2163 = vrot.lane.b32.xlu0 %v5697_v3, %s6311_s29  ;;  %2307 = vrot.lane.b32.xlu1 %v5697_v3, %s6316_s8 }
 0xebd   : > { %4308 = vmatmul.msk.f32.vlgmr.msra.gmra.mxu1 %vm737_vm1, %v2093_v47 }
 0xebf   : > { %2161 = vrot.lane.b32.xlu2 %v2093_v47, %s6311_s29 }
 0xec0   : > { %2305 = vrot.lane.b32.xlu0 %v2093_v47, %s6316_s8 }
 0xf11   : > { %v2236_v50 = vpop.permute.xlu2 %2235 }
 0xf12   : > { %4315 = vmatpush.xpose.msk.msrb.mxu3 %vm737_vm1, %v2236_v50 }
 0xf19   : > { %v2162_v7 = vpop.permute.xlu2 %2161 }
 0xf2a   : > { %v2164_v5 = vpop.permute.xlu0 %2163  ;;  %v2308_v6 = vpop.permute.xlu1 %2307 }
 0xf2b   : > { %4311 = vmatpush.xpose.msk.msra.mxu0 %vm737_vm1, %v2164_v5 }
 0xf2e   : > { %4312 = vmatmul.msk.f32.vlgmr.msra.gmra.mxu0 %vm737_vm1, %v2162_v7  ;;  %v4325_v7 = vld [vmem:[%s6234_s5 + $0x70] sm:$0xff] }
 0xf2f   : > { %4319 = vmatpush.xpose.msk.msrb.mxu0 %vm737_vm1, %v2308_v6  ;;  %v4326_v6 = vld [vmem:[%s6234_s5 + $0x78] sm:$0xff] }
 0xf32   : > { %v1979_v10 = vpop.f32.mrf.mxu1  ;;  %v2306_v12 = vpop.permute.xlu0 %2305 }
 0xf33   : > { %v1980_v11 = vadd.f32 %v4608_v9, %v1979_v10  ;;  %v4324_v9 = vld [vmem:[%s6234_s5 + $0x68] sm:$0xff]  ;;  %v4323_v10 = vld [vmem:[%s6234_s5 + $0x60] sm:$0xff] }
 0xf35   : > { %v1982_v13 = vmax.f32 %v1980_v11, 0.0 }
 0xf36   : > { %4320 = vmatmul.msk.f32.vlgmr.msrb.gmra.mxu0 %vm737_vm1, %v2306_v12 }
 0xf37   : > { %4295 = vmatmul.msk.f32.vlgmr.msra.gmra.mxu3 %vm1099_vm5, %v1982_v13 }
 0xf38   : > { %2403 = vmatpush.msra.mxu3 %v4326_v6 }
 0xf3a   : > { %v2117_v14 = vpop.f32.mrf.mxu1  ;;  %2404 = vmatpush.msra.mxu3 %v4325_v7 }
 0xf3b   : > { %v2121_v15 = vsel %vm2120_vm14, %v2117_v14, -inf }
 0xf3c   : > { %2122 = vmax.xlane.f32.xlu2 %v2121_v15  ;;  %2405 = vmatpush.msra.mxu3 %v4324_v9  ;;  %v2418_v15 = vld [vmem:[#allocation8 + $0x70] sm:$0xff] }
 0xf3e   : > { %2406 = vmatpush.msra.mxu3 %v4323_v10 }
 0xf3f   : > { %4316 = vmatmul.msk.f32.vlgmr.msrb.gmra.mxu3 %vm737_vm1, %v2234_v4 }
 0xfab   : > { %v2186_v16 = vpop.f32.mrf.mxu0 }
 0xfac   : > { %v2189_v17 = vsel %vm2120_vm14, %v2186_v16, -inf }
 0xfad   : > { %2190 = vmax.xlane.f32.xlu1 %v2189_v17  ;;  %v2416_v17 = vld [vmem:[#allocation8 + $0x60] sm:$0xff] }
 0xfaf   : > { %v2123_v35 = vpop.xlane.xlu2 %2122 }
 0xfb0   : > { %v2124_v18 = vsub.f32 %v2117_v14, %v2123_v35  ;;  %v2419_v14 = vld [vmem:[#allocation8 + $0x78] sm:$0xff]  ;;  %v4337_v35 = vld [vmem:[%s6238_s9 + $0xf8] sm:$0xff] }
 0xfb1   : > { %2474 = vmatpush.msra.mxu0 %v4337_v35 }
 0xfb2   : > { %v2125_v20 = vmul.f32 1.442695, %v2124_v18  ;;  %v4336_v18 = vld [vmem:[%s6238_s9 + $0xf0] sm:$0xff] }
 0xfb3   : > { %v2330_v21 = vpop.f32.mrf.mxu0  ;;  %2475 = vmatpush.msra.mxu0 %v4336_v18 }
 0xfb4   : > { %4670 = vpow2.f32 %v2125_v20  ;;  %v2333_v22 = vsel %vm2120_vm14, %v2330_v21, -inf  ;;  %v4335_v20 = vld [vmem:[%s6238_s9 + $0xe8] sm:$0xff] }
 0xfb5   : > { %2334 = vmax.xlane.f32.xlu2 %v2333_v22  ;;  %2476 = vmatpush.msra.mxu0 %v4335_v20  ;;  %v4333_v22 = vld [vmem:[%s6238_s9 + $0xd8] sm:$0xff] }
 0xfba   : > { %v4671_v23 = vpop.eup %4670  ;;  %v5720_v24 = vpop.f32.mrf.mxu3 }
 0xfbb   : > { %v2127_v25 = vsel %vm2120_vm14, %v4671_v23, 0.0 }
 0xfbc   : > { %2128 = vadd.xlane.f32.xlu1 %v2127_v25 }
 0xfc2   : > { %v2258_v26 = vpop.f32.mrf.mxu3 }
 0xfc3   : > { %v2261_v27 = vsel %vm2120_vm14, %v2258_v26, -inf }
 0xfc4   : > { %2262 = vmax.xlane.f32.xlu0 %v2261_v27 }
 0xfd5   : > { %2132 = vrot.lane.b32.xlu1 %v5697_v3, %s6314_s7 }
 0xfdd   : > { %2344 = vrot.lane.b32.xlu1 %v5697_v3, %s6313_s28 }
0x1020   : > { %v2191_v29 = vpop.xlane.xlu1 %2190 }
0x1021   : > { %v2192_v30 = vsub.f32 %v2186_v16, %v2191_v29  ;;  %v2417_v16 = vld [vmem:[#allocation8 + $0x68] sm:$0xff] }
0x1023   : > { %v2193_v31 = vmul.f32 1.442695, %v2192_v30 }
0x1025   : > { %4672 = vpow2.f32 %v2193_v31  ;;  %v4332_v31 = vld [vmem:[%s6238_s9 + $0xd0] sm:$0xff] }
0x1028   : > { %v2335_v8 = vpop.xlane.xlu2 %2334 }
0x1029   : > { %v2336_v32 = vsub.f32 %v2330_v21, %v2335_v8  ;;  %v4334_v21 = vld [vmem:[%s6238_s9 + $0xe0] sm:$0xff]  ;;  %v4331_v8 = vld [vmem:[%s6238_s9 + $0xc8] sm:$0xff] }
0x102a   : > { %2477 = vmatpush.msra.mxu0 %v4334_v21  ;;  %v2570_v21 = vld [vmem:[#allocation15] sm:$0xf] }
0x102b   : > { %v4673_v33 = vpop.eup %4672  ;;  %v2337_v34 = vmul.f32 1.442695, %v2336_v32  ;;  %v4330_v32 = vld [vmem:[%s6238_s9 + $0xc0] sm:$0xff] }
0x102c   : > { %v2195_v36 = vsel %vm2120_vm14, %v4673_v33, 0.0  ;;  %2478 = vmatpush.msra.mxu0 %v4333_v22 }
0x102d   : > { %4674 = vpow2.f32 %v2337_v34  ;;  %2196 = vadd.xlane.f32.xlu0 %v2195_v36 }
0x102e   : > { %2479 = vmatpush.msra.mxu0 %v4332_v31 }
0x102f   : > { %v2129_v42 = vpop.xlane.xlu1 %2128 }
0x1030   : > { %2480 = vmatpush.msra.mxu0 %v4331_v8 }
0x1032   : > { %2481 = vmatpush.msra.mxu0 %v4330_v32 }
0x1033   : > { %v4675_v37 = vpop.eup %4674 }
0x1034   : > { %v2339_v38 = vsel %vm2120_vm14, %v4675_v37, 0.0 }
0x1035   : > { %2340 = vadd.xlane.f32.xlu0 %v2339_v38  ;;  %v4347_v38 = vld [vmem:[%s6233_s4 + $0x90] sm:$0xff] }
0x1037   : > { %v2263_v39 = vpop.xlane.xlu0 %2262 }
0x1038   : > { %v2264_v40 = vsub.f32 %v2258_v26, %v2263_v39  ;;  %v2412_v26 = vstv %s4328_s27  ;;  %v4346_v39 = vld [vmem:[%s6233_s4 + $0x88] sm:$0xff]  ;;  %s4382_s27 = sld [smem:[#allocation13 + $0x201]] }
0x103a   : > { %v2265_v41 = vmul.f32 1.442695, %v2264_v40  ;;  %v4345_v40 = vld [vmem:[%s6233_s4 + $0x80] sm:$0xff] }
0x103c   : > { %4676 = vpow2.f32 %v2265_v41  ;;  %v4612_v41 = vld [vmem:[#allocation11 + $0x3] ss:$0 sm:$0xff] }
0x103d   : > { %4678 = vrcp.f32 %v2129_v42 }
0x1042   : > { %v4677_v43 = vpop.eup %4676 }
0x1043   : > { %v2267_v44 = vsel %vm2120_vm14, %v4677_v43, 0.0  ;;  %v4679_v45 = vpop.eup %4678  ;;  %vm2375_vm14 = vcmask 257216  }
0x1044   : > { %2268 = vadd.xlane.f32.xlu2 %v2267_v44  ;;  %v2131_v46 = vmul.f32 %v4679_v45, %v4671_v23  ;;  %v4610_v23 = vld [vmem:[#allocation4 + $0x3] ss:$0 sm:$0xff] }
0x1047   : > { %v2133_v47 = vpop.permute.xlu1 %2132 }
0x1048   : > { %4309 = vmatpush.msk.msra.mxu2 %vm1674_vm11, %v2133_v47 }
0x1049   : > { %2272 = vrot.lane.b32.xlu0 %v5697_v3, %s6307_s30  ;;  %4310 = vmatmul.msk.f32.vlgmr.msra.gmra.mxu2 %vm1657_vm10, %v2131_v46 }
0x104f   : > { %v2345_v59 = vpop.permute.xlu1 %2344 }
0x105c   : > { %2200 = vrot.lane.b32.xlu2 %v5697_v3, %s6306_s24 }
0x10a0   : > { %v2197_v48 = vpop.xlane.xlu0 %2196 }
0x10a1   : > { %4680 = vrcp.f32 %v2197_v48 }
0x10a7   : > { %v4681_v53 = vpop.eup %4680 }
0x10a8   : > { %v2341_v49 = vpop.xlane.xlu0 %2340  ;;  %v2199_v55 = vmul.f32 %v4681_v53, %v4673_v33  ;;  %v4611_v33 = vld [vmem:[#allocation10 + $0x3] ss:$0 sm:$0xff]  ;;  %v2555_v53 = vld [vmem:[#allocation15] sm:$0xf] }
0x10b7   : > { %v2269_v51 = vpop.xlane.xlu2 %2268 }
0x10b8   : > { %4682 = vrcp.f32 %v2269_v51 }
0x10b9   : > { %4684 = vrcp.f32 %v2341_v49 }
0x10bb   : > { %v2273_v52 = vpop.permute.xlu0 %2272 }
0x10bc   : > { %4317 = vmatpush.msk.msrb.mxu2 %vm1674_vm11, %v2273_v52  ;;  %v2552_v52 = vld [vmem:[#allocation14] sm:$0xf] }
0x10be   : > { %v4683_v54 = vpop.eup %4682  ;;  %2440 = vmatpush.msra.mxu2 %v2419_v14 }
0x10bf   : > { %v2271_v56 = vmul.f32 %v4683_v54, %v4677_v43  ;;  %v2201_v57 = vpop.permute.xlu2 %2200  ;;  %v4685_v61 = vpop.eup %4684  ;;  %v2487_v43 = vstv %s4339_s10  ;;  %s6322_s10 = smov %s6321_s21 }
0x10c0   : > { %4313 = vmatpush.msk.msrb.mxu1 %vm1674_vm11, %v2201_v57  ;;  %v2343_v63 = vmul.f32 %v4685_v61, %v4675_v37  ;;  %2441 = vmatpush.msra.mxu2 %v2418_v15  ;;  %v4348_v37 = vld [vmem:[%s6233_s4 + $0x98] sm:$0xff] }
0x10c1   : > { %4314 = vmatmul.msk.f32.vlgmr.msrb.gmra.mxu1 %vm1657_vm10, %v2199_v55  ;;  %4318 = vmatmul.msk.f32.vlgmr.msrb.gmra.mxu2 %vm1657_vm10, %v2271_v56 }
0x10c2   : > { %4321 = vmatpush.msk.msra.mxu1 %vm1674_vm11, %v2345_v59  ;;  %vm2231_vm11 = vcmask 126016   ;;  %2442 = vmatpush.msra.mxu2 %v2417_v16 }
0x10c3   : > { %2535 = vmatpush.msrb.mxu3 %v4348_v37 }
0x10c4   : > { %2507 = vmatpush.msrb.mxu1 %v4343_v58  ;;  %2443 = vmatpush.msra.mxu2 %v2416_v17 }
0x10c5   : > { %2536 = vmatpush.msrb.mxu3 %v4347_v38 }
0x10c6   : > { %2508 = vmatpush.msrb.mxu1 %v4342_v60 }
0x10c7   : > { %2537 = vmatpush.msrb.mxu3 %v4346_v39 }
0x10c8   : > { %2509 = vmatpush.msrb.mxu1 %v4341_v62 }
0x10c9   : > { %4322 = vmatmul.msk.f32.vlgmr.msra.gmra.mxu1 %vm1657_vm10, %v2343_v63  ;;  %vm2303_vm10 = vcmask 191616   ;;  %2538 = vmatpush.msrb.mxu3 %v4345_v40 }
0x10ca   : > { %2510 = vmatpush.msrb.mxu1 %v4340_v0 }
0x10cc   : > { %v2156_v1 = vpop.f32.mrf.mxu2 }
0x10cd   : > { %2160 = vst.msk [vmem:[#allocation3] sm:$0xf] %vm2159_vm15, %v2156_v1 }
0x10d1   : > { %4344 = vmatmul.msk.f32.vlgmr.msrb.gmra.mxu1 %vm689_vm0, %v5559_v28 }
0x113e   : > { %v2224_v3 = vpop.f32.mrf.mxu1 }
0x113f   : > { %2228 = vrot.lane.b32.xlu2 %v2224_v3, %s6308_s14 }
0x1144   : > { %v2296_v50 = vpop.f32.mrf.mxu2 }
0x1145   : > { %2300 = vrot.lane.b32.xlu0 %v2296_v50, %s6310_s23 }
0x1146   : > { %v2368_v4 = vpop.f32.mrf.mxu1 }
0x1147   : > { %2372 = vrot.lane.b32.xlu1 %v2368_v4, %s6309_s18  ;;  %v2563_v4 = vld [vmem:[#allocation14] sm:$0xf] }
0x114e   : > { %v2512_v48 = vpop.f32.mrf.mxu1 }
0x1199   : > { %v2229_v5 = vpop.permute.xlu2 %2228 }
0x119a   : > { %2232 = vst.msk [vmem:[#allocation3] sm:$0xf] %vm2231_vm11, %v2229_v5 }
0x11b7   : > { %v2301_v11 = vpop.permute.xlu0 %2300 }
0x11b8   : > { %2304 = vst.msk [vmem:[#allocation3] sm:$0xf] %vm2303_vm10, %v2301_v11 }
0x11b9   : > { %v2373_v12 = vpop.permute.xlu1 %2372 }
0x11ba   : > { %2376 = vst.msk [vmem:[#allocation3] sm:$0xf] %vm2375_vm14, %v2373_v12 }
0x11c1   : > { %v2377_v13 = vld [vmem:[#allocation3] sm:$0xf] }
0x11c2   : > { %4327 = vmatmul.msk.f32.vlgmr.msra.gmra.mxu3 %vm689_vm0, %v2377_v13 }
0x1245   : > { %v2408_v25 = vpop.f32.mrf.mxu3 }
0x1246   : > { %v2409_v27 = vadd.f32 %v4610_v23, %v2408_v25 }
0x1248   : > { %v2413_v29 = vmul.f32 %v2412_v26, %v2409_v27 }
0x124a   : > { %v2414_v30 = vadd.f32 %v2413_v29, %v5624_v19 }
0x124c   : > { %4329 = vmatmul.msk.f32.vlgmr.msra.gmra.mxu2 %vm689_vm0, %v2414_v30 }
0x12cf   : > { %v2445_v34 = vpop.f32.mrf.mxu2 }
0x12d0   : > { %v2446_v19 = vadd.f32 %v4611_v33, %v2445_v34 }
0x12d2   : > { %v2448_v36 = vmax.f32 %v2446_v19, 0.0 }
0x12d4   : > { %4338 = vmatmul.msk.f32.vlgmr.msra.gmra.mxu0 %vm1099_vm5, %v2448_v36 }
0x1351   : > { %v2483_v42 = vpop.f32.mrf.mxu0 }
0x1352   : > { %v2484_v44 = vadd.f32 %v4612_v41, %v2483_v42 }
0x1354   : > { %v2488_v45 = vmul.f32 %v2487_v43, %v2484_v44 }
0x1356   : > { %v5816_v46 = vadd.f32 %v2488_v45, %v2414_v30 }
0x1358   : > { %4349 = vmatmul.msk.f32.vlgmr.msrb.gmra.mxu3 %vm689_vm0, %v5816_v46 }
0x13db   : > { %v5820_v47 = vpop.f32.mrf.mxu3 }
0x13dc   : > { %2548 = vrot.lane.b32.xlu0 %v5820_v47, %s6310_s23  ;;  %2544 = vrot.lane.b32.xlu2 %v5820_v47, %s6312_s19  ;;  %v2553_v55 = vmul.f32 %v2552_v52, %v5820_v47 }
0x13e4   : > { %2647 = vrot.lane.b32.xlu2 %v2512_v48, %s6311_s29 }
0x1436   : > { %v2545_v49 = vpop.permute.xlu2 %2544 }
0x1437   : > { %2547 = vst.msk [vmem:[#allocation2] sm:$0xf] %vm2081_vm12, %v2545_v49 }
0x143e   : > { %v2648_v58 = vpop.permute.xlu2 %2647 }
0x144e   : > { %v2549_v51 = vpop.permute.xlu0 %2548 }
0x144f   : > { %2551 = vst.msk [vmem:[#allocation2] sm:$0xf] %vm2086_vm13, %v2549_v51 }
0x1456   : > { %v2554_v54 = vld [vmem:[#allocation2] sm:$0xf] }
0x1457   : > { %v2556_v56 = vmul.f32 %v2555_v53, %v2554_v54 }
0x1459   : > { %v2557_v57 = vadd.f32 %v2556_v56, %v2553_v55 }
0x145b   : > { %2793 = vrot.lane.b32.xlu0 %v2557_v57, %s6316_s8  ;;  %2649 = vrot.lane.b32.xlu1 %v2557_v57, %s6311_s29 }
0x145c   : > { %4350 = vmatpush.xpose.msk.msrb.mxu2 %vm737_vm1, %v2557_v57  ;;  %2721 = vrot.lane.b32.xlu2 %v2557_v57, %s6312_s19 }
0x145f   : > { %4351 = vmatmul.msk.f32.vlgmr.msrb.gmra.mxu2 %vm737_vm1, %v2512_v48 }
0x1463   : > { %2719 = vrot.lane.b32.xlu0 %v2512_v48, %s6312_s19  ;;  %2791 = vrot.lane.b32.xlu1 %v2512_v48, %s6316_s8 }
0x146b   : > { %2558 = vrot.lane.b32.xlu1 %v5820_v47, %s6307_s30 }
0x14b6   : > { %v2722_v59 = vpop.permute.xlu2 %2721 }
0x14b7   : > { %4358 = vmatpush.xpose.msk.msrb.mxu0 %vm737_vm1, %v2722_v59  ;;  %v4385_v59 = vld [vmem:[%s6232_s3 + $0xb0] sm:$0xff] }
0x14cd   : > { %v2794_v60 = vpop.permute.xlu0 %2793  ;;  %v2650_v61 = vpop.permute.xlu1 %2649 }
0x14ce   : > { %4354 = vmatpush.xpose.msk.msra.mxu3 %vm737_vm1, %v2650_v61 }
0x14d1   : > { %4355 = vmatmul.msk.f32.vlgmr.msra.gmra.mxu3 %vm737_vm1, %v2648_v58  ;;  %v4386_v58 = vld [vmem:[%s6232_s3 + $0xb8] sm:$0xff] }
0x14d2   : > { %4362 = vmatpush.xpose.msk.msrb.mxu3 %vm737_vm1, %v2794_v60  ;;  %v4384_v60 = vld [vmem:[%s6232_s3 + $0xa8] sm:$0xff] }
0x14d5   : > { %v2720_v62 = vpop.permute.xlu0 %2719  ;;  %v2792_v63 = vpop.permute.xlu1 %2791 }
0x14d6   : > { %4359 = vmatmul.msk.f32.vlgmr.msrb.gmra.mxu0 %vm737_vm1, %v2720_v62  ;;  %v4383_v62 = vld [vmem:[%s6232_s3 + $0xa0] sm:$0xff] }
0x14d9   : > { %4363 = vmatmul.msk.f32.vlgmr.msrb.gmra.mxu3 %vm737_vm1, %v2792_v63 }
0x14dd   : > { %v2559_v0 = vpop.permute.xlu1 %2558 }
0x14de   : > { %2561 = vst.msk [vmem:[#allocation2] sm:$0xf] %vm2081_vm12, %v2559_v0 }
0x14df   : > { %2562 = vst.msk [vmem:[#allocation2] sm:$0xf] %vm2086_vm13, %v2545_v49 }
0x14e2   : > { %v2600_v1 = vpop.f32.mrf.mxu2 }
0x14e3   : > { %v2603_v3 = vmul.f32 0.35355338, %v2600_v1 }
0x14e5   : > { %v2605_v50 = vsel %vm2604_vm4, %v2603_v3, -inf }
0x14e6   : > { %2606 = vmax.xlane.f32.xlu0 %v2605_v50  ;;  %v2569_v20 = vld [vmem:[#allocation2] sm:$0xf] }
0x14e7   : > { %v2571_v22 = vmul.f32 %v2570_v21, %v2569_v20 }
0x14fa   : > { %2565 = vrot.lane.b32.xlu0 %v2563_v4, %s6278_s17 }
0x1553   : > { %v2744_v5 = vpop.f32.mrf.mxu0 }
0x1554   : > { %v2747_v6 = vmul.f32 0.35355338, %v2744_v5  ;;  %v2672_v7 = vpop.f32.mrf.mxu3 }
0x1555   : > { %v2675_v11 = vmul.f32 0.35355338, %v2672_v7  ;;  %v4368_v7 = vld [vmem:[%s6234_s5 + $0x90] sm:$0xff] }
0x1556   : > { %v2748_v9 = vsel %vm2604_vm4, %v2747_v6, -inf }
0x1557   : > { %2749 = vmax.xlane.f32.xlu2 %v2748_v9  ;;  %v2676_v16 = vsel %vm2604_vm4, %v2675_v11, -inf  ;;  %v4367_v9 = vld [vmem:[%s6234_s5 + $0x88] sm:$0xff] }
0x1559   : > { %v2607_v10 = vpop.xlane.xlu0 %2606 }
0x155a   : > { %v2608_v12 = vsub.f32 %v2603_v3, %v2607_v10  ;;  %v4366_v10 = vld [vmem:[%s6234_s5 + $0x80] sm:$0xff] }
0x155c   : > { %v2609_v13 = vmul.f32 1.442695, %v2608_v12  ;;  %v2816_v14 = vpop.f32.mrf.mxu3  ;;  %v4390_v12 = vld [vmem:[%s6233_s4 + $0xb0] sm:$0xff] }
0x155d   : > { %v2819_v15 = vmul.f32 0.35355338, %v2816_v14  ;;  %v4388_v14 = vld [vmem:[%s6233_s4 + $0xa0] sm:$0xff] }
0x155e   : > { %4686 = vpow2.f32 %v2609_v13  ;;  %v4389_v13 = vld [vmem:[%s6233_s4 + $0xa8] sm:$0xff] }
0x155f   : > { %2677 = vmax.xlane.f32.xlu2 %v2676_v16  ;;  %v2820_v17 = vsel %vm2604_vm4, %v2819_v15, -inf }
0x1560   : > { %2821 = vmax.xlane.f32.xlu1 %v2820_v17 }
0x1564   : > { %v4687_v35 = vpop.eup %4686 }
0x1565   : > { %v2611_v18 = vsel %vm2604_vm4, %v4687_v35, 0.0 }
0x1568   : > { %2612 = vadd.xlane.f32.xlu1 %v2611_v18 }
0x156c   : > { %v2566_v39 = vpop.permute.xlu0 %2565 }
0x156d   : > { %v2568_v41 = vmul.f32 %v2566_v39, %v5820_v47 }
0x1577   : > { %2573 = vrot.lane.b32.xlu2 %v2571_v22, %s6278_s17  ;;  %s4296_s17 = sld [smem:[#allocation13 + $0x101]] }
0x157d   : > { %v2021_v20 = vstv %s4296_s17  ;;  %s6075_s17 = sand.u32 1, %s5039_s22  }
0x15ca   : > { %v2750_v23 = vpop.xlane.xlu2 %2749 }
0x15cb   : > { %v2751_v25 = vsub.f32 %v2747_v6, %v2750_v23  ;;  %v4369_v6 = vld [vmem:[%s6234_s5 + $0x98] sm:$0xff] }
0x15cc   : > { %2889 = vmatpush.msra.mxu0 %v4369_v6 }
0x15cd   : > { %v2752_v26 = vmul.f32 1.442695, %v2751_v25 }
0x15ce   : > { %2890 = vmatpush.msra.mxu0 %v4368_v7  ;;  %v4615_v7 = vld [vmem:[#allocation11 + $0x4] ss:$0 sm:$0xff] }
0x15cf   : > { %4688 = vpow2.f32 %v2752_v26 }
0x15d0   : > { %2891 = vmatpush.msra.mxu0 %v4367_v9 }
0x15d2   : > { %v2678_v27 = vpop.xlane.xlu2 %2677  ;;  %2892 = vmatpush.msra.mxu0 %v4366_v10 }
0x15d3   : > { %v2679_v29 = vsub.f32 %v2675_v11, %v2678_v27  ;;  %v2822_v30 = vpop.xlane.xlu1 %2821  ;;  %v4391_v11 = vld [vmem:[%s6233_s4 + $0xb8] sm:$0xff]  ;;  %v3038_v27 = vld [vmem:[#allocation14] sm:$0xf] }
0x15d4   : > { %v2823_v31 = vsub.f32 %v2819_v15, %v2822_v30  ;;  %3021 = vmatpush.msrb.mxu0 %v4391_v11  ;;  %v2973_v11 = vstv %s4382_s27  ;;  %s3920_s27 = scalar_lea.sflag [#allocation6], %s6075_s17 }
0x15d5   : > { %v4689_v8 = vpop.eup %4688  ;;  %v2680_v32 = vmul.f32 1.442695, %v2679_v29  ;;  %v3041_v29 = vld [vmem:[#allocation15] sm:$0xf] }
0x15d6   : > { %v2824_v33 = vmul.f32 1.442695, %v2823_v31  ;;  %v2754_v34 = vsel %vm2604_vm4, %v4689_v8, 0.0  ;;  %3022 = vmatpush.msrb.mxu0 %v4390_v12 }
0x15d7   : > { %4690 = vpow2.f32 %v2680_v32  ;;  %2755 = vadd.xlane.f32.xlu2 %v2754_v34  ;;  %v2905_v32 = vld [vmem:[#allocation8 + $0x98] sm:$0xff]  ;;  %v2903_v34 = vld [vmem:[#allocation8 + $0x88] sm:$0xff] }
0x15d8   : > { %4692 = vpow2.f32 %v2824_v33  ;;  %3023 = vmatpush.msrb.mxu0 %v4389_v13  ;;  %v2904_v33 = vld [vmem:[#allocation8 + $0x90] sm:$0xff] }
0x15da   : > { %v2574_v40 = vpop.permute.xlu2 %2573  ;;  %3024 = vmatpush.msrb.mxu0 %v4388_v14 }
0x15db   : > { %v2576_v42 = vadd.f32 %v2574_v40, %v2568_v41  ;;  %v2613_v43 = vpop.xlane.xlu1 %2612 }
0x15dd   : > { %v4691_v19 = vpop.eup %4690 }
0x15de   : > { %v4693_v36 = vpop.eup %4692  ;;  %v2682_v37 = vsel %vm2604_vm4, %v4691_v19, 0.0 }
0x15df   : > { %2683 = vadd.xlane.f32.xlu1 %v2682_v37  ;;  %v2826_v38 = vsel %vm2604_vm4, %v4693_v36, 0.0  ;;  %vm2619_vm4 = vcmask 31744   ;;  %v2898_v37 = vstv %s4371_s1  ;;  %s681_s1 = scalar_lea.vmem %s6244_s15, %s5403_s0 }
0x15e0   : > { %2827 = vadd.xlane.f32.xlu0 %v2826_v38 }
0x15f8   : > { %2687 = vrot.lane.b32.xlu1 %v2576_v42, %s6306_s24 }
0x1600   : > { %2617 = vrot.lane.b32.xlu1 %v2576_v42, %s6314_s7 }
0x1608   : > { %2831 = vrot.lane.b32.xlu1 %v2576_v42, %s6313_s28 }
0x1610   : > { %2759 = vrot.lane.b32.xlu1 %v2576_v42, %s6307_s30  ;;  %v4379_v42 = vld [vmem:[%s6238_s9 + $0x130] sm:$0xff] }
0x164a   : > { %v2756_v54 = vpop.xlane.xlu2 %2755 }
0x1652   : > { %v2684_v44 = vpop.xlane.xlu1 %2683 }
0x1653   : > { %4694 = vrcp.f32 %v2684_v44  ;;  %v2828_v47 = vpop.xlane.xlu0 %2827  ;;  %v4377_v44 = vld [vmem:[%s6238_s9 + $0x120] sm:$0xff] }
0x1654   : > { %4696 = vrcp.f32 %v2613_v43  ;;  %v4378_v43 = vld [vmem:[%s6238_s9 + $0x128] sm:$0xff] }
0x1655   : > { %4698 = vrcp.f32 %v2828_v47  ;;  %v4373_v47 = vld [vmem:[%s6238_s9 + $0x100] sm:$0xff] }
0x1656   : > { %4700 = vrcp.f32 %v2756_v54 }
0x1659   : > { %v4695_v45 = vpop.eup %4694 }
0x165a   : > { %v2686_v48 = vmul.f32 %v4695_v45, %v4691_v19  ;;  %v4697_v51 = vpop.eup %4696  ;;  %v2902_v19 = vld [vmem:[#allocation8 + $0x80] sm:$0xff] }
0x165b   : > { %v2615_v52 = vmul.f32 %v4697_v51, %v4687_v35  ;;  %v4699_v55 = vpop.eup %4698  ;;  %v4609_v35 = vld [vmem:[#allocation11 + $0x2] ss:$0 sm:$0xff]  ;;  %v4376_v45 = vld [vmem:[%s6238_s9 + $0x118] sm:$0xff] }
0x165c   : > { %v2830_v56 = vmul.f32 %v4699_v55, %v4693_v36  ;;  %v4701_v61 = vpop.eup %4700  ;;  %v2018_v18 = vadd.f32 %v4609_v35, %v5720_v24  ;;  %v4614_v55 = vld [vmem:[#allocation10 + $0x4] ss:$0 sm:$0xff] }
0x165d   : > { %v2758_v63 = vmul.f32 %v4701_v61, %v4689_v8 }
0x165e   : > { %v2022_v25 = vmul.f32 %v2021_v20, %v2018_v18 }
0x1660   : > { %v5922_v26 = vadd.f32 %v2022_v25, %v5693_v2  ;;  %v4613_v2 = vld [vmem:[#allocation4 + $0x4] ss:$0 sm:$0xff] }
0x166a   : > { %v2688_v49 = vpop.permute.xlu1 %2687 }
0x166b   : > { %4356 = vmatpush.msk.msra.mxu2 %vm2623_vm3, %v2688_v49  ;;  %v4374_v49 = vld [vmem:[%s6238_s9 + $0x108] sm:$0xff] }
0x166c   : > { %4357 = vmatmul.msk.f32.vlgmr.msra.gmra.mxu2 %vm2619_vm4, %v2686_v48  ;;  %v4375_v48 = vld [vmem:[%s6238_s9 + $0x110] sm:$0xff] }
0x1672   : > { %v2618_v53 = vpop.permute.xlu1 %2617 }
0x1673   : > { %4352 = vmatpush.msk.msra.mxu1 %vm2623_vm3, %v2618_v53 }
0x1674   : > { %4353 = vmatmul.msk.f32.vlgmr.msra.gmra.mxu1 %vm2619_vm4, %v2615_v52 }
0x167a   : > { %v2832_v57 = vpop.permute.xlu1 %2831 }
0x167b   : > { %4364 = vmatpush.msk.msrb.mxu2 %vm2623_vm3, %v2832_v57 }
0x167c   : > { %4365 = vmatmul.msk.f32.vlgmr.msrb.gmra.mxu2 %vm2619_vm4, %v2830_v56 }
0x167d   : > { %2993 = vmatpush.msra.mxu2 %v4386_v58 }
0x167f   : > { %2994 = vmatpush.msra.mxu2 %v4385_v59 }
0x1681   : > { %2995 = vmatpush.msra.mxu2 %v4384_v60 }
0x1682   : > { %v2760_v0 = vpop.permute.xlu1 %2759 }
0x1683   : > { %4360 = vmatpush.msk.msrb.mxu1 %vm2623_vm3, %v2760_v0  ;;  %2996 = vmatpush.msra.mxu2 %v4383_v62 }
0x1684   : > { %4361 = vmatmul.msk.f32.vlgmr.msrb.gmra.mxu1 %vm2619_vm4, %v2758_v63  ;;  %4387 = vmatmul.msk.f32.vlgmr.msra.gmra.mxu2 %vm689_vm0, %v5816_v46 }
0x1685   : > { %2926 = vmatpush.msra.mxu1 %v2905_v32 }
0x1687   : > { %2927 = vmatpush.msra.mxu1 %v2904_v33 }
0x1689   : > { %2928 = vmatpush.msra.mxu1 %v2903_v34 }
0x168b   : > { %2929 = vmatpush.msra.mxu1 %v2902_v19 }
0x16ef   : > { %v2711_v1 = vpop.f32.mrf.mxu2 }
0x16f0   : > { %2715 = vrot.lane.b32.xlu0 %v2711_v1, %s6308_s14 }
0x16f1   : > { %v2643_v3 = vpop.f32.mrf.mxu1 }
0x16f2   : > { %2646 = vst.msk [vmem:[#allocation3] sm:$0x7] %vm1210_vm6, %v2643_v3  ;;  %vm3916_vm6 = vcmask 256000  }
0x16ff   : > { %v2855_v50 = vpop.f32.mrf.mxu2 }
0x1700   : > { %2859 = vrot.lane.b32.xlu1 %v2855_v50, %s6309_s18 }
0x1701   : > { %v2783_v4 = vpop.f32.mrf.mxu1 }
0x1702   : > { %2787 = vrot.lane.b32.xlu2 %v2783_v4, %s6310_s23 }
0x1707   : > { %v2998_v5 = vpop.f32.mrf.mxu2 }
0x1708   : > { %3034 = vrot.lane.b32.xlu0 %v2998_v5, %s6310_s23  ;;  %3030 = vrot.lane.b32.xlu1 %v2998_v5, %s6312_s19  ;;  %v3039_v30 = vmul.f32 %v3038_v27, %v2998_v5 }
0x175c   : > { %v2788_v16 = vpop.permute.xlu2 %2787 }
0x1762   : > { %v2716_v15 = vpop.permute.xlu0 %2715 }
0x1763   : > { %2718 = vst.msk [vmem:[#allocation3] sm:$0x7] %vm1319_vm7, %v2716_v15  ;;  %vm3914_vm7 = vcmask 257024  }
0x1764   : > { %2790 = vst.msk [vmem:[#allocation3] sm:$0x7] %vm1391_vm8, %v2788_v16 }
0x1772   : > { %v2860_v17 = vpop.permute.xlu1 %2859 }
0x1773   : > { %2862 = vst.msk [vmem:[#allocation3] sm:$0x7] %vm1463_vm9, %v2860_v17 }
0x177a   : > { %v3031_v21 = vpop.permute.xlu1 %3030  ;;  %v3035_v22 = vpop.permute.xlu0 %3034  ;;  %v2863_v23 = vld [vmem:[#allocation3] sm:$0x7] }
0x177b   : > { %3033 = vst.msk [vmem:[#allocation2] sm:$0xf] %vm2081_vm12, %v3031_v21  ;;  %4370 = vmatmul.msk.f32.vlgmr.msra.gmra.mxu0 %vm689_vm0, %v2863_v23 }
0x177c   : > { %3037 = vst.msk [vmem:[#allocation2] sm:$0xf] %vm2086_vm13, %v3035_v22 }
0x1783   : > { %4392 = vmatmul.msk.f32.vlgmr.msrb.gmra.mxu0 %vm689_vm0, %v5922_v26  ;;  %v3040_v24 = vld [vmem:[#allocation2] sm:$0xf] }
0x1784   : > { %v3042_v31 = vmul.f32 %v3041_v29, %v3040_v24 }
0x1786   : > { %v3043_v8 = vadd.f32 %v3042_v31, %v3039_v30 }
0x1788   : > { %3180 = vrot.lane.b32.xlu0 %v3043_v8, %s6312_s19 }
0x17f8   : > { %v2894_v36 = vpop.f32.mrf.mxu0 }
0x17f9   : > { %v2895_v38 = vadd.f32 %v4613_v2, %v2894_v36 }
0x17fa   : > { %v3181_v52 = vpop.permute.xlu0 %3180 }
0x17fb   : > { %v2899_v39 = vmul.f32 %v2898_v37, %v2895_v38 }
0x17fd   : > { %v5928_v40 = vadd.f32 %v2899_v39, %v5559_v28  ;;  %v4380_v28 = vld [vmem:[%s6238_s9 + $0x138] sm:$0xff] }
0x17fe   : > { %2960 = vmatpush.msra.mxu3 %v4380_v28 }
0x17ff   : > { %4372 = vmatmul.msk.f32.vlgmr.msra.gmra.mxu1 %vm689_vm0, %v5928_v40 }
0x1800   : > { %v5932_v41 = vpop.f32.mrf.mxu0  ;;  %2961 = vmatpush.msra.mxu3 %v4379_v42 }
0x1801   : > { %3111 = vrot.lane.b32.xlu2 %v5932_v41, %s6311_s29  ;;  %3182 = vrot.lane.b32.xlu1 %v5932_v41, %s6312_s19 }
0x1802   : > { %4393 = vmatpush.xpose.msk.msrb.mxu1 %vm737_vm1, %v5932_v41  ;;  %3253 = vrot.lane.b32.xlu0 %v5932_v41, %s6316_s8 }
0x1803   : > { %2962 = vmatpush.msra.mxu3 %v4378_v43 }
0x1805   : > { %2963 = vmatpush.msra.mxu3 %v4377_v44 }
0x1807   : > { %4394 = vmatmul.msk.f32.vlgmr.msrb.gmra.mxu1 %vm737_vm1, %v3043_v8  ;;  %2964 = vmatpush.msra.mxu3 %v4376_v45 }
0x1809   : > { %3251 = vrot.lane.b32.xlu2 %v3043_v8, %s6316_s8  ;;  %3109 = vrot.lane.b32.xlu1 %v3043_v8, %s6311_s29 }
0x180a   : > { %2965 = vmatpush.msra.mxu3 %v4375_v48 }
0x180c   : > { %2966 = vmatpush.msra.mxu3 %v4374_v49 }
0x180e   : > { %2967 = vmatpush.msra.mxu3 %v4373_v47 }
0x185b   : > { %v3112_v51 = vpop.permute.xlu2 %3111 }
0x185c   : > { %4396 = vmatpush.xpose.msk.msra.mxu0 %vm737_vm1, %v3112_v51 }
0x1863   : > { %v3252_v60 = vpop.permute.xlu2 %3251 }
0x1873   : > { %v3183_v53 = vpop.permute.xlu1 %3182 }
0x1874   : > { %v3254_v54 = vpop.permute.xlu0 %3253  ;;  %4399 = vmatpush.xpose.msk.msrb.mxu3 %vm737_vm1, %v3183_v53  ;;  %v4424_v53 = vld [vmem:[%s6232_s3 + $0xd0] sm:$0xff] }
0x1875   : > { %4402 = vmatpush.xpose.msk.msrb.mxu0 %vm737_vm1, %v3254_v54 }
0x187b   : > { %v3110_v56 = vpop.permute.xlu1 %3109 }
0x187c   : > { %v2931_v57 = vpop.f32.mrf.mxu1  ;;  %4397 = vmatmul.msk.f32.vlgmr.msra.gmra.mxu0 %vm737_vm1, %v3110_v56 }
0x187d   : > { %v2932_v58 = vadd.f32 %v4614_v55, %v2931_v57  ;;  %v4423_v55 = vld [vmem:[%s6232_s3 + $0xc8] sm:$0xff]  ;;  %v4422_v57 = vld [vmem:[%s6232_s3 + $0xc0] sm:$0xff] }
0x187f   : > { %v2934_v59 = vmax.f32 %v2932_v58, 0.0 }
0x1881   : > { %4381 = vmatmul.msk.f32.vlgmr.msra.gmra.mxu3 %vm1099_vm5, %v2934_v59 }
0x1884   : > { %v3067_v61 = vpop.f32.mrf.mxu1  ;;  %4403 = vmatmul.msk.f32.vlgmr.msrb.gmra.mxu0 %vm737_vm1, %v3252_v60 }
0x1885   : > { %v3070_v62 = vmul.f32 0.35355338, %v3067_v61  ;;  %v4408_v61 = vld [vmem:[%s6234_s5 + $0xb8] sm:$0xff] }
0x1886   : > { %3348 = vmatpush.msra.mxu3 %v4408_v61 }
0x1887   : > { %v3071_v63 = vsel %vm2159_vm15, %v3070_v62, -inf }
0x1888   : > { %3072 = vmax.xlane.f32.xlu1 %v3071_v63  ;;  %v4406_v63 = vld [vmem:[%s6234_s5 + $0xa8] sm:$0xff] }
0x1889   : > { %4400 = vmatmul.msk.f32.vlgmr.msrb.gmra.mxu3 %vm737_vm1, %v3181_v52 }
0x18f9   : > { %v3134_v0 = vpop.f32.mrf.mxu0 }
0x18fa   : > { %v3137_v1 = vmul.f32 0.35355338, %v3134_v0  ;;  %v4405_v0 = vld [vmem:[%s6234_s5 + $0xa0] sm:$0xff] }
0x18fb   : > { %v3073_v3 = vpop.xlane.xlu1 %3072 }
0x18fc   : > { %v3074_v50 = vsub.f32 %v3070_v62, %v3073_v3  ;;  %v3138_v4 = vsel %vm2159_vm15, %v3137_v1, -inf  ;;  %v4407_v62 = vld [vmem:[%s6234_s5 + $0xb0] sm:$0xff] }
0x18fd   : > { %3139 = vmax.xlane.f32.xlu0 %v3138_v4  ;;  %3349 = vmatpush.msra.mxu3 %v4407_v62 }
0x18fe   : > { %v3075_v5 = vmul.f32 1.442695, %v3074_v50 }
0x18ff   : > { %3350 = vmatpush.msra.mxu3 %v4406_v63 }
0x1900   : > { %4702 = vpow2.f32 %v3075_v5  ;;  %v3364_v5 = vld [vmem:[#allocation8 + $0xb8] sm:$0xff] }
0x1901   : > { %v3276_v6 = vpop.f32.mrf.mxu0  ;;  %3351 = vmatpush.msra.mxu3 %v4405_v0 }
0x1902   : > { %v3279_v9 = vmul.f32 0.35355338, %v3276_v6  ;;  %v3363_v6 = vld [vmem:[#allocation8 + $0xb0] sm:$0xff] }
0x1904   : > { %v2969_v10 = vpop.f32.mrf.mxu3  ;;  %v3280_v12 = vsel %vm2159_vm15, %v3279_v9, -inf }
0x1905   : > { %v2970_v13 = vadd.f32 %v4615_v7, %v2969_v10  ;;  %3281 = vmax.xlane.f32.xlu1 %v3280_v12  ;;  %v3362_v7 = vld [vmem:[#allocation8 + $0xa8] sm:$0xff]  ;;  %v4419_v10 = vld [vmem:[%s6238_s9 + $0x178] sm:$0xff]  ;;  %v4417_v12 = vld [vmem:[%s6238_s9 + $0x168] sm:$0xff] }
0x1906   : > { %v4703_v14 = vpop.eup %4702  ;;  %3419 = vmatpush.msra.mxu0 %v4419_v10 }
0x1907   : > { %v2974_v15 = vmul.f32 %v2973_v11, %v2970_v13  ;;  %v3077_v16 = vsel %vm2159_vm15, %v4703_v14, 0.0  ;;  %v4418_v11 = vld [vmem:[%s6238_s9 + $0x170] sm:$0xff]  ;;  %v4416_v13 = vld [vmem:[%s6238_s9 + $0x160] sm:$0xff] }
0x1908   : > { %3078 = vadd.xlane.f32.xlu0 %v3077_v16  ;;  %3420 = vmatpush.msra.mxu0 %v4418_v11 }
0x1909   : > { %v2975_v17 = vadd.f32 %v2974_v15, %v5928_v40  ;;  %v4616_v15 = vld [vmem:[#allocation4 + $0x5] ss:$0 sm:$0xff] }
0x190a   : > { %3421 = vmatpush.msra.mxu0 %v4417_v12 }
0x190b   : > { %3917 = vst.msk [vmem:[%s681_s1] sm:$0x7] %vm3916_vm6, %v2975_v17  ;;  %v3357_v17 = vstv %s4410_s16  ;;  %s4191_s1 = sshll.u32 %s6075_s17, 2 }
0x190c   : > { %v3205_v35 = vpop.f32.mrf.mxu3  ;;  %3422 = vmatpush.msra.mxu0 %v4416_v13  ;;  %s6079_s0 = scalar_lea.vmem [#allocation17], %s4191_s1 }
0x190d   : > { %v3208_v18 = vmul.f32 0.35355338, %v3205_v35  ;;  %s3941_s2 = sshll.u32 %s6079_s0, 4  ;;  %s3942_s2 = int_to_ptr.vmem [resolvable:$true] %s3941_s2 }
0x190f   : > { %v3209_v20 = vsel %vm2159_vm15, %v3208_v18, -inf }
0x1910   : > { %3210 = vmax.xlane.f32.xlu2 %v3209_v20 }
0x191c   : > { %3082 = vrot.lane.b32.xlu0 %v5932_v41, %s6314_s7 }
0x1924   : > { %3291 = vrot.lane.b32.xlu0 %v5932_v41, %s6313_s28 }
0x1970   : > { %v3140_v21 = vpop.xlane.xlu0 %3139 }
0x1971   : > { %v3141_v22 = vsub.f32 %v3137_v1, %v3140_v21  ;;  %v4414_v21 = vld [vmem:[%s6238_s9 + $0x150] sm:$0xff] }
0x1973   : > { %v3142_v23 = vmul.f32 1.442695, %v3141_v22  ;;  %v4413_v22 = vld [vmem:[%s6238_s9 + $0x148] sm:$0xff] }
0x1975   : > { %4704 = vpow2.f32 %v3142_v23  ;;  %v4412_v23 = vld [vmem:[%s6238_s9 + $0x140] sm:$0xff] }
0x1978   : > { %v3282_v25 = vpop.xlane.xlu1 %3281 }
0x1979   : > { %v3283_v27 = vsub.f32 %v3279_v9, %v3282_v25  ;;  %v3361_v9 = vld [vmem:[#allocation8 + $0xa0] sm:$0xff] }
0x197a   : > { %v4617_v25 = vld [vmem:[#allocation10 + $0x5] ss:$0 sm:$0xff] }
0x197b   : > { %v4705_v29 = vpop.eup %4704  ;;  %v3284_v24 = vmul.f32 1.442695, %v3283_v27  ;;  %v3079_v31 = vpop.xlane.xlu0 %3078 }
0x197c   : > { %v3144_v30 = vsel %vm2159_vm15, %v4705_v29, 0.0 }
0x197d   : > { %4706 = vpow2.f32 %v3284_v24  ;;  %3145 = vadd.xlane.f32.xlu2 %v3144_v30  ;;  %v4430_v24 = vld [vmem:[%s6233_s4 + $0xd8] sm:$0xff]  ;;  %v4429_v30 = vld [vmem:[%s6233_s4 + $0xd0] sm:$0xff] }
0x197e   : > { %4708 = vrcp.f32 %v3079_v31  ;;  %3480 = vmatpush.msrb.mxu3 %v4430_v24  ;;  %v4428_v31 = vld [vmem:[%s6233_s4 + $0xc8] sm:$0xff] }
0x1980   : > { %3481 = vmatpush.msrb.mxu3 %v4429_v30 }
0x1982   : > { %3482 = vmatpush.msrb.mxu3 %v4428_v31 }
0x1983   : > { %v4707_v8 = vpop.eup %4706  ;;  %v3211_v32 = vpop.xlane.xlu2 %3210 }
0x1984   : > { %v3212_v33 = vsub.f32 %v3208_v18, %v3211_v32  ;;  %v3286_v34 = vsel %vm2159_vm15, %v4707_v8, 0.0  ;;  %v4709_v2 = vpop.eup %4708  ;;  %v4618_v32 = vld [vmem:[#allocation11 + $0x5] ss:$0 sm:$0xff] }
0x1985   : > { %3287 = vadd.xlane.f32.xlu2 %v3286_v34  ;;  %v3081_v37 = vmul.f32 %v4709_v2, %v4703_v14  ;;  %v4415_v14 = vld [vmem:[%s6238_s9 + $0x158] sm:$0xff]  ;;  %v3432_v34 = vstv %s4421_s26 }
0x1986   : > { %v3213_v19 = vmul.f32 1.442695, %v3212_v33  ;;  %3423 = vmatpush.msra.mxu0 %v4415_v14 }
0x1988   : > { %4710 = vpow2.f32 %v3213_v19  ;;  %3424 = vmatpush.msra.mxu0 %v4414_v21 }
0x198a   : > { %3425 = vmatpush.msra.mxu0 %v4413_v22 }
0x198c   : > { %3426 = vmatpush.msra.mxu0 %v4412_v23 }
0x198e   : > { %v4711_v36 = vpop.eup %4710  ;;  %v3083_v38 = vpop.permute.xlu0 %3082 }
0x198f   : > { %3103 = vmatpush.msrb.mxu2 %v3083_v38  ;;  %v3215_v39 = vsel %vm2159_vm15, %v4711_v36, 0.0 }
0x1990   : > { %3216 = vadd.xlane.f32.xlu1 %v3215_v39  ;;  %4395 = vmatmul.msk.f32.vlgmr.msrb.gmra.mxu2 %vm737_vm1, %v3081_v37 }
0x1996   : > { %v3292_v52 = vpop.permute.xlu0 %3291 }
0x199d   : > { %3220 = vrot.lane.b32.xlu2 %v5932_v41, %s6307_s30 }
0x19a9   : > { %3149 = vrot.lane.b32.xlu1 %v5932_v41, %s6306_s24  ;;  %v4425_v41 = vld [vmem:[%s6232_s3 + $0xd8] sm:$0xff] }
0x19f0   : > { %v3146_v40 = vpop.xlane.xlu2 %3145 }
0x19f8   : > { %v3288_v28 = vpop.xlane.xlu2 %3287 }
0x1a00   : > { %v3221_v42 = vpop.permute.xlu2 %3220 }
0x1a01   : > { %3241 = vmatpush.msra.mxu2 %v3221_v42  ;;  %v3500_v42 = vld [vmem:[#allocation15] sm:$0xf] }
0x1a03   : > { %v3217_v43 = vpop.xlane.xlu1 %3216  ;;  %3385 = vmatpush.msrb.mxu2 %v3364_v5 }
0x1a04   : > { %4712 = vrcp.f32 %v3217_v43 }
0x1a05   : > { %4714 = vrcp.f32 %v3146_v40  ;;  %3386 = vmatpush.msrb.mxu2 %v3363_v6  ;;  %v3515_v6 = vld [vmem:[#allocation15] sm:$0xf] }
0x1a06   : > { %4716 = vrcp.f32 %v3288_v28  ;;  %v3497_v28 = vld [vmem:[#allocation14] sm:$0xf] }
0x1a07   : > { %3387 = vmatpush.msrb.mxu2 %v3362_v7 }
0x1a09   : > { %3388 = vmatpush.msrb.mxu2 %v3361_v9 }
0x1a0a   : > { %v4713_v44 = vpop.eup %4712 }
0x1a0b   : > { %v3219_v45 = vmul.f32 %v4713_v44, %v4711_v36  ;;  %v4715_v49 = vpop.eup %4714 }
0x1a0c   : > { %v3148_v47 = vmul.f32 %v4715_v49, %v4705_v29  ;;  %v4717_v54 = vpop.eup %4716 }
0x1a0d   : > { %4401 = vmatmul.msk.f32.vlgmr.msra.gmra.mxu2 %vm737_vm1, %v3219_v45  ;;  %v3290_v56 = vmul.f32 %v4717_v54, %v4707_v8  ;;  %v4427_v8 = vld [vmem:[%s6233_s4 + $0xc0] sm:$0xff] }
0x1a0e   : > { %3483 = vmatpush.msrb.mxu3 %v4427_v8 }
0x1a13   : > { %v3105_v48 = vpop.f32.mrf.mxu2 }
0x1a14   : > { %3108 = vst.msk [vmem:[#allocation3] sm:$0xf] %vm2159_vm15, %v3105_v48 }
0x1a1b   : > { %v3150_v51 = vpop.permute.xlu1 %3149 }
0x1a1c   : > { %3170 = vmatpush.msra.mxu1 %v3150_v51 }
0x1a1d   : > { %4398 = vmatmul.msk.f32.vlgmr.msra.gmra.mxu1 %vm737_vm1, %v3148_v47 }
0x1a1e   : > { %3312 = vmatpush.msrb.mxu1 %v3292_v52 }
0x1a20   : > { %3452 = vmatpush.msra.mxu1 %v4425_v41 }
0x1a22   : > { %3453 = vmatpush.msra.mxu1 %v4424_v53 }
0x1a24   : > { %3454 = vmatpush.msra.mxu1 %v4423_v55 }
0x1a25   : > { %4404 = vmatmul.msk.f32.vlgmr.msrb.gmra.mxu1 %vm737_vm1, %v3290_v56 }
0x1a26   : > { %3455 = vmatpush.msra.mxu1 %v4422_v57  ;;  %v3508_v57 = vld [vmem:[#allocation14] sm:$0xf] }
0x1a2d   : > { %4426 = vmatmul.msk.f32.vlgmr.msra.gmra.mxu1 %vm689_vm0, %v5922_v26 }
0x1a90   : > { %v3243_v58 = vpop.f32.mrf.mxu2 }
0x1a91   : > { %3247 = vrot.lane.b32.xlu1 %v3243_v58, %s6310_s23 }
0x1a9a   : > { %v3172_v59 = vpop.f32.mrf.mxu1 }
0x1a9b   : > { %3176 = vrot.lane.b32.xlu0 %v3172_v59, %s6308_s14 }
0x1aa2   : > { %v3314_v60 = vpop.f32.mrf.mxu1 }
0x1aa3   : > { %3318 = vrot.lane.b32.xlu2 %v3314_v60, %s6309_s18 }
0x1aaa   : > { %v3457_v38 = vpop.f32.mrf.mxu1 }
0x1afd   : > { %v3319_v50 = vpop.permute.xlu2 %3318 }
0x1b03   : > { %v3248_v3 = vpop.permute.xlu1 %3247 }
0x1b0d   : > { %v3177_v1 = vpop.permute.xlu0 %3176 }
0x1b0e   : > { %3179 = vst.msk [vmem:[#allocation3] sm:$0xf] %vm2231_vm11, %v3177_v1 }
0x1b0f   : > { %3250 = vst.msk [vmem:[#allocation3] sm:$0xf] %vm2303_vm10, %v3248_v3 }
0x1b10   : > { %3321 = vst.msk [vmem:[#allocation3] sm:$0xf] %vm2375_vm14, %v3319_v50 }
0x1b17   : > { %v3322_v4 = vld [vmem:[#allocation3] sm:$0xf] }
0x1b18   : > { %4409 = vmatmul.msk.f32.vlgmr.msra.gmra.mxu3 %vm689_vm0, %v3322_v4 }
0x1b9b   : > { %v3353_v16 = vpop.f32.mrf.mxu3 }
0x1b9c   : > { %v3354_v35 = vadd.f32 %v4616_v15, %v3353_v16 }
0x1b9e   : > { %v3358_v18 = vmul.f32 %v3357_v17, %v3354_v35 }
0x1ba0   : > { %v3359_v20 = vadd.f32 %v3358_v18, %v5816_v46 }
0x1ba2   : > { %4411 = vmatmul.msk.f32.vlgmr.msrb.gmra.mxu2 %vm689_vm0, %v3359_v20 }
0x1c25   : > { %v3390_v46 = vpop.f32.mrf.mxu2 }
0x1c26   : > { %v3391_v27 = vadd.f32 %v4617_v25, %v3390_v46 }
0x1c28   : > { %v3393_v29 = vmax.f32 %v3391_v27, 0.0 }
0x1c2a   : > { %4420 = vmatmul.msk.f32.vlgmr.msra.gmra.mxu0 %vm1099_vm5, %v3393_v29 }
0x1ca7   : > { %v3428_v33 = vpop.f32.mrf.mxu0 }
0x1ca8   : > { %v3429_v19 = vadd.f32 %v4618_v32, %v3428_v33 }
0x1caa   : > { %v3433_v2 = vmul.f32 %v3432_v34, %v3429_v19 }
0x1cac   : > { %v3434_v36 = vadd.f32 %v3433_v2, %v3359_v20 }
0x1cae   : > { %4431 = vmatmul.msk.f32.vlgmr.msrb.gmra.mxu3 %vm689_vm0, %v3434_v36  ;;  %3915 = vst.msk [vmem:[%s6079_s0] sm:$0xf] %vm3914_vm7, %v3434_v36 }
0x1d31   : > { %v6082_v37 = vpop.f32.mrf.mxu3 }
0x1d32   : > { %3493 = vrot.lane.b32.xlu1 %v6082_v37, %s6310_s23  ;;  %3489 = vrot.lane.b32.xlu0 %v6082_v37, %s6312_s19  ;;  %v3498_v44 = vmul.f32 %v3497_v28, %v6082_v37 }
0x1d3a   : > { %3588 = vrot.lane.b32.xlu0 %v3457_v38, %s6311_s29 }
0x1da4   : > { %v3494_v39 = vpop.permute.xlu1 %3493  ;;  %v3490_v40 = vpop.permute.xlu0 %3489 }
0x1da5   : > { %3492 = vst.msk [vmem:[#allocation2] sm:$0xf] %vm2081_vm12, %v3490_v40 }
0x1da6   : > { %3496 = vst.msk [vmem:[#allocation2] sm:$0xf] %vm2086_vm13, %v3494_v39 }
0x1dac   : > { %v3589_v47 = vpop.permute.xlu0 %3588 }
0x1dad   : > { %v3499_v43 = vld [vmem:[#allocation2] sm:$0xf] }
0x1dae   : > { %v3501_v45 = vmul.f32 %v3500_v42, %v3499_v43 }
0x1db0   : > { %v3502_v48 = vadd.f32 %v3501_v45, %v3498_v44 }
0x1db2   : > { %3661 = vrot.lane.b32.xlu0 %v3502_v48, %s6312_s19  ;;  %3732 = vrot.lane.b32.xlu1 %v3502_v48, %s6316_s8 }
0x1db3   : > { %3590 = vrot.lane.b32.xlu2 %v3502_v48, %s6311_s29  ;;  %4432 = vmatpush.xpose.msk.msra.mxu2 %vm737_vm1, %v3502_v48  ;;  %s6317_s29 = smov 32  }
0x1db6   : > { %4433 = vmatmul.msk.f32.vlgmr.msra.gmra.mxu2 %vm737_vm1, %v3457_v38 }
0x1dba   : > { %3659 = vrot.lane.b32.xlu1 %v3457_v38, %s6312_s19 }
0x1dbb   : > { %3730 = vrot.lane.b32.xlu2 %v3457_v38, %s6316_s8  ;;  %s4467_s8 = sshll.u32 %s5177_s25, 2 }
0x1dbc   : > { %s3939_s16 = scalar_lea.hbm %s6321_s21, %s4467_s8 }
0x1dbd   : > { %s3943_s6 = sshll.u32 %s3939_s16, 4  ;;  %s3944_s6 = int_to_ptr.hbm [resolvable:$true] %s3943_s6 }
0x1dbe   : > { %s4943_s26 = sshra.s32 %s3944_s6, 4  ;;  %s4944_s26 = int_to_ptr.hbm [resolvable:$true] %s4943_s26 }
0x1dbf   : > { %s4945_s1 = scalar_lea.hbm %s4944_s26, 4  ;;  %p4950_p3 = scmp.lt.s32.totalorder %s4944_s26, %s6322_s10 }
0x1dc0   : > { %p4946_p0 = scmp.ne.s32.totalorder %s4944_s26, %s4945_s1 }
0x1dc2   : > { %p4947_p1 = pnand %p4946_p0, %p5194_p5 }
0x1dc3   : > { %3503 = vrot.lane.b32.xlu2 %v6082_v37, %s6307_s30 }
0x1dc4   : > { %p4948_p2 = pneg %p4947_p1 }
0x1e0d   : > { %v3591_v49 = vpop.permute.xlu2 %3590 }
0x1e0e   : > { %4436 = vmatpush.xpose.msk.msra.mxu3 %vm737_vm1, %v3591_v49  ;;  %v4451_v49 = vld [vmem:[%s6234_s5 + $0xd8] sm:$0xff] }
0x1e11   : > { %4437 = vmatmul.msk.f32.vlgmr.msra.gmra.mxu3 %vm737_vm1, %v3589_v47  ;;  %v4450_v47 = vld [vmem:[%s6234_s5 + $0xd0] sm:$0xff] }
0x1e15   : > { %v3731_v51 = vpop.permute.xlu2 %3730 }
0x1e1d   : > { %v3504_v41 = vpop.permute.xlu2 %3503 }
0x1e1e   : > { %3506 = vst.msk [vmem:[#allocation2] sm:$0xf] %vm2081_vm12, %v3504_v41  ;;  %v4448_v41 = vld [vmem:[%s6234_s5 + $0xc0] sm:$0xff] }
0x1e1f   : > { %3507 = vst.msk [vmem:[#allocation2] sm:$0xf] %vm2086_vm13, %v3490_v40 }
0x1e24   : > { %v3662_v52 = vpop.permute.xlu0 %3661  ;;  %v3733_v53 = vpop.permute.xlu1 %3732 }
0x1e25   : > { %4440 = vmatpush.xpose.msk.msrb.mxu0 %vm737_vm1, %v3662_v52  ;;  %4444 = vmatpush.xpose.msk.msrb.mxu3 %vm737_vm1, %v3733_v53 }
0x1e26   : > { %v3514_v5 = vld [vmem:[#allocation2] sm:$0xf] }
0x1e27   : > { %v3516_v7 = vmul.f32 %v3515_v6, %v3514_v5 }
0x1e28   : > { %4445 = vmatmul.msk.f32.vlgmr.msrb.gmra.mxu3 %vm737_vm1, %v3731_v51  ;;  %v4449_v51 = vld [vmem:[%s6234_s5 + $0xc8] sm:$0xff] }
0x1e29   : > { %3827 = vmatpush.msra.mxu0 %v4451_v49 }
0x1e2b   : > { %3828 = vmatpush.msra.mxu0 %v4450_v47 }
0x1e2c   : > { %v3660_v54 = vpop.permute.xlu1 %3659 }
0x1e2d   : > { %4441 = vmatmul.msk.f32.vlgmr.msrb.gmra.mxu0 %vm737_vm1, %v3660_v54 }
0x1e2e   : > { %3829 = vmatpush.msra.mxu0 %v4449_v51 }
0x1e30   : > { %3830 = vmatpush.msra.mxu0 %v4448_v41 }
0x1e39   : > { %v3545_v55 = vpop.f32.mrf.mxu2 }
0x1e3a   : > { %v3548_v56 = vsel %vm2619_vm4, %v3545_v55, -inf }
0x1e3b   : > { %3549 = vmax.xlane.f32.xlu1 %v3548_v56  ;;  %v3843_v56 = vld [vmem:[#allocation8 + $0xd8] sm:$0xff] }
0x1e54   : > { %3510 = vrot.lane.b32.xlu1 %v3508_v57, %s6317_s29  ;;  %v3842_v57 = vld [vmem:[#allocation8 + $0xd0] sm:$0xff] }
0x1e94   : > { %v3613_v58 = vpop.f32.mrf.mxu3 }
0x1e95   : > { %v3616_v3 = vsel %vm2619_vm4, %v3613_v58, -inf }
0x1eaa   : > { %v3684_v59 = vpop.f32.mrf.mxu0 }
0x1eab   : > { %v3755_v60 = vpop.f32.mrf.mxu3  ;;  %v3687_v61 = vsel %vm2619_vm4, %v3684_v59, -inf }
0x1eac   : > { %3688 = vmax.xlane.f32.xlu0 %v3687_v61  ;;  %v3758_v62 = vsel %vm2619_vm4, %v3755_v60, -inf  ;;  %v4461_v61 = vld [vmem:[%s6238_s9 + $0x1b0] sm:$0xff] }
0x1ead   : > { %3759 = vmax.xlane.f32.xlu2 %v3758_v62  ;;  %v4460_v62 = vld [vmem:[%s6238_s9 + $0x1a8] sm:$0xff] }
0x1eae   : > { %v3550_v63 = vpop.xlane.xlu1 %3549 }
0x1eaf   : > { %v3551_v0 = vsub.f32 %v3545_v55, %v3550_v63  ;;  %v4459_v63 = vld [vmem:[%s6238_s9 + $0x1a0] sm:$0xff] }
0x1eb1   : > { %v3552_v1 = vmul.f32 1.442695, %v3551_v0  ;;  %v4458_v0 = vld [vmem:[%s6238_s9 + $0x198] sm:$0xff] }
0x1eb3   : > { %4718 = vpow2.f32 %v3552_v1  ;;  %v4619_v1 = vld [vmem:[#allocation4 + $0x6] ss:$0 sm:$0xff] }
0x1eb4   : > { %3617 = vmax.xlane.f32.xlu0 %v3616_v3 }
0x1eb9   : > { %v4719_v50 = vpop.eup %4718 }
0x1eba   : > { %v3554_v4 = vsel %vm2619_vm4, %v4719_v50, 0.0 }
0x1ebc   : > { %3555 = vadd.xlane.f32.xlu0 %v3554_v4 }
0x1ec5   : > { %3518 = vrot.lane.b32.xlu2 %v3516_v7, %s6317_s29  ;;  %s4453_s29 = sld [smem:[#allocation13 + $0x300]]  ;;  %v4457_v7 = vld [vmem:[%s6238_s9 + $0x190] sm:$0xff] }
0x1ec6   : > { %v3511_v13 = vpop.permute.xlu1 %3510 }
0x1ec7   : > { %v3513_v14 = vmul.f32 %v3511_v13, %v6082_v37 }
0x1f1f   : > { %v3689_v9 = vpop.xlane.xlu0 %3688 }
0x1f20   : > { %v3690_v10 = vsub.f32 %v3684_v59, %v3689_v9  ;;  %v3760_v11 = vpop.xlane.xlu2 %3759  ;;  %v3840_v59 = vld [vmem:[#allocation8 + $0xc0] sm:$0xff]  ;;  %v4456_v9 = vld [vmem:[%s6238_s9 + $0x188] sm:$0xff] }
0x1f21   : > { %v3761_v20 = vsub.f32 %v3755_v60, %v3760_v11  ;;  %v4462_v60 = vld [vmem:[%s6238_s9 + $0x1b8] sm:$0xff] }
0x1f22   : > { %v3691_v12 = vmul.f32 1.442695, %v3690_v10  ;;  %3898 = vmatpush.msra.mxu3 %v4462_v60  ;;  %v4455_v10 = vld [vmem:[%s6238_s9 + $0x180] sm:$0xff]  ;;  %v4620_v11 = vld [vmem:[#allocation10 + $0x6] ss:$0 sm:$0xff] }
0x1f23   : > { %v3762_v23 = vmul.f32 1.442695, %v3761_v20 }
0x1f24   : > { %4720 = vpow2.f32 %v3691_v12  ;;  %3899 = vmatpush.msra.mxu3 %v4461_v61 }
0x1f26   : > { %3900 = vmatpush.msra.mxu3 %v4460_v62 }
0x1f27   : > { %v3618_v15 = vpop.xlane.xlu0 %3617 }
0x1f28   : > { %v3619_v16 = vsub.f32 %v3613_v58, %v3618_v15  ;;  %v3519_v17 = vpop.permute.xlu2 %3518  ;;  %v3841_v58 = vld [vmem:[#allocation8 + $0xc8] sm:$0xff]  ;;  %3901 = vmatpush.msra.mxu3 %v4459_v63 }
0x1f29   : > { %v3521_v35 = vadd.f32 %v3519_v17, %v3513_v14 }
0x1f2a   : > { %v4721_v18 = vpop.eup %4720  ;;  %v3620_v21 = vmul.f32 1.442695, %v3619_v16  ;;  %3902 = vmatpush.msra.mxu3 %v4458_v0 }
0x1f2b   : > { %3627 = vrot.lane.b32.xlu1 %v3521_v35, %s6306_s24  ;;  %v3693_v22 = vsel %vm2619_vm4, %v4721_v18, 0.0 }
0x1f2c   : > { %4722 = vpow2.f32 %v3620_v21  ;;  %3694 = vadd.xlane.f32.xlu2 %v3693_v22  ;;  %3903 = vmatpush.msra.mxu3 %v4457_v7 }
0x1f2d   : > { %4724 = vpow2.f32 %v3762_v23 }
0x1f2e   : > { %3904 = vmatpush.msra.mxu3 %v4456_v9 }
0x1f2f   : > { %v3556_v30 = vpop.xlane.xlu0 %3555 }
0x1f30   : > { %3905 = vmatpush.msra.mxu3 %v4455_v10 }
0x1f32   : > { %v4723_v25 = vpop.eup %4722 }
0x1f33   : > { %3769 = vrot.lane.b32.xlu1 %v3521_v35, %s6313_s28  ;;  %v3622_v46 = vsel %vm2619_vm4, %v4723_v25, 0.0  ;;  %v4725_v27 = vpop.eup %4724 }
0x1f34   : > { %3623 = vadd.xlane.f32.xlu0 %v3622_v46  ;;  %v3764_v29 = vsel %vm2619_vm4, %v4725_v27, 0.0 }
0x1f3b   : > { %3698 = vrot.lane.b32.xlu1 %v3521_v35, %s6307_s30  ;;  %s4949_s30 = scalar_lea.hbm %s6322_s10, 8 }
0x1f3c   : > { %3765 = vadd.xlane.f32.xlu0 %v3764_v29  ;;  %p4951_p4 = scmp.lt.s32.totalorder %s4949_s30, %s4945_s1 }
0x1f3e   : > { %p4952_p7 = por %p4951_p4, %p4950_p3 }
0x1f40   : > { %p4953_p8 = pnand %p4952_p7, %p4948_p2 }
0x1f50   : > { %3560 = vrot.lane.b32.xlu0 %v3521_v35, %s6314_s7 }
0x1f9d   : > { %v3628_v24 = vpop.permute.xlu1 %3627 }
0x1f9e   : > { %4438 = vmatpush.msk.msrb.mxu2 %vm2623_vm3, %v3628_v24 }
0x1f9f   : > { %v3695_v36 = vpop.xlane.xlu2 %3694 }
0x1fa5   : > { %v3770_v31 = vpop.permute.xlu1 %3769 }
0x1fa6   : > { %4446 = vmatpush.msk.msra.mxu2 %vm2623_vm3, %v3770_v31 }
0x1fa7   : > { %v3624_v8 = vpop.xlane.xlu0 %3623 }
0x1fa8   : > { %4726 = vrcp.f32 %v3624_v8 }
0x1fad   : > { %v3699_v40 = vpop.permute.xlu1 %3698 }
0x1fae   : > { %v4727_v32 = vpop.eup %4726 }
0x1faf   : > { %v3626_v33 = vmul.f32 %v4727_v32, %v4723_v25  ;;  %v3766_v34 = vpop.xlane.xlu0 %3765 }
0x1fb0   : > { %4728 = vrcp.f32 %v3766_v34 }
0x1fb1   : > { %4439 = vmatmul.msk.f32.vlgmr.msrb.gmra.mxu2 %vm2619_vm4, %v3626_v33  ;;  %4730 = vrcp.f32 %v3556_v30 }
0x1fb2   : > { %4732 = vrcp.f32 %v3695_v36 }
0x1fb6   : > { %v4729_v19 = vpop.eup %4728 }
0x1fb7   : > { %v3768_v2 = vmul.f32 %v4729_v19, %v4725_v27  ;;  %v4731_v37 = vpop.eup %4730 }
0x1fb8   : > { %v3558_v38 = vmul.f32 %v4731_v37, %v4719_v50  ;;  %v4733_v28 = vpop.eup %4732  ;;  %v3836_v50 = vstv %s4453_s29 }
0x1fb9   : > { %4447 = vmatmul.msk.f32.vlgmr.msra.gmra.mxu2 %vm2619_vm4, %v3768_v2  ;;  %v3697_v42 = vmul.f32 %v4733_v28, %v4721_v18 }
0x1fc2   : > { %v3561_v39 = vpop.permute.xlu0 %3560 }
0x1fc3   : > { %4434 = vmatpush.msk.msrb.mxu1 %vm2623_vm3, %v3561_v39 }
0x1fc4   : > { %4435 = vmatmul.msk.f32.vlgmr.msrb.gmra.mxu1 %vm2619_vm4, %v3558_v38 }
0x1fc5   : > { %4442 = vmatpush.msk.msra.mxu1 %vm2623_vm3, %v3699_v40  ;;  %vm6319_vm3 = vcmask 261312  }
0x1fc7   : > { %3864 = vmatpush.msrb.mxu1 %v3843_v56 }
0x1fc9   : > { %3865 = vmatpush.msrb.mxu1 %v3842_v57 }
0x1fcb   : > { %3866 = vmatpush.msrb.mxu1 %v3841_v58 }
0x1fcc   : > { %4443 = vmatmul.msk.f32.vlgmr.msra.gmra.mxu1 %vm2619_vm4, %v3697_v42 }
0x1fcd   : > { %3867 = vmatpush.msrb.mxu1 %v3840_v59 }
0x2034   : > { %v3651_v43 = vpop.f32.mrf.mxu2 }
0x2035   : > { %3655 = vrot.lane.b32.xlu1 %v3651_v43, %s6308_s14 }
0x203c   : > { %v3793_v44 = vpop.f32.mrf.mxu2 }
0x203d   : > { %3797 = vrot.lane.b32.xlu1 %v3793_v44, %s6309_s18 }
0x2041   : > { %v3584_v45 = vpop.f32.mrf.mxu1 }
0x2042   : > { %3587 = vst.msk [vmem:[#allocation3] sm:$0xff] %vm737_vm1, %v3584_v45  ;;  %vm6318_vm1 = vcmask 195712  }
0x2049   : > { %v3722_v48 = vpop.f32.mrf.mxu1 }
0x204a   : > { %3726 = vrot.lane.b32.xlu0 %v3722_v48, %s6310_s23 }
0x20a7   : > { %v3656_v52 = vpop.permute.xlu1 %3655 }
0x20a8   : > { %3658 = vst.msk [vmem:[#allocation3] sm:$0xff] %vm873_vm2, %v3656_v52 }
0x20af   : > { %v3798_v54 = vpop.permute.xlu1 %3797 }
0x20bc   : > { %v3727_v53 = vpop.permute.xlu0 %3726 }
0x20bd   : > { %3729 = vst.msk [vmem:[#allocation3] sm:$0xff] %vm6318_vm1, %v3727_v53 }
0x20be   : > { %3800 = vst.msk [vmem:[#allocation3] sm:$0xff] %vm6319_vm3, %v3798_v54 }
0x20c5   : > { %v3801_v55 = vld [vmem:[#allocation3] sm:$0xff] }
0x20c6   : > { %4452 = vmatmul.msk.f32.vlgmr.msra.gmra.mxu0 %vm689_vm0, %v3801_v55 }
0x2143   : > { %v3832_v3 = vpop.f32.mrf.mxu0 }
0x2144   : > { %v3833_v4 = vadd.f32 %v4619_v1, %v3832_v3 }
0x2146   : > { %v3837_v5 = vmul.f32 %v3836_v50, %v3833_v4 }
0x2148   : > { %v3838_v6 = vadd.f32 %v3837_v5, %v5922_v26 }
0x214a   : > { %4454 = vmatmul.msk.f32.vlgmr.msrb.gmra.mxu1 %vm689_vm0, %v3838_v6 }
0x21c7   : > { %v3869_v26 = vpop.f32.mrf.mxu1 }
0x21c8   : > { %v3870_v12 = vadd.f32 %v4620_v11, %v3869_v26 }
0x21ca   : > { %v3872_v13 = vmax.f32 %v3870_v12, 0.0 }
0x21cc   : > { %4463 = vmatmul.msk.f32.vlgmr.msra.gmra.mxu3 %vm1099_vm5, %v3872_v13 }
0x21cd   : > { %4956 = shalt.err (!%p4953_p8)
}
0x21ce   : > { %4499 = dma.vmem_to_hbm [thread:$0]  (%p5194_p5), %s3942_s2, 64, %s3944_s6, %s3920_s27   ;;  %v4621_v14 = vld [vmem:[#allocation11 + $0x6] ss:$0 sm:$0xff] }
0x21cf   : > { %s4464_s0 = sld [smem:[#allocation13 + $0x301]]  ;;  %s4192_s7 = sshll.u32 %s6075_s17, 3 }
0x21d0   : > { %s4468_s14 = sshll.u32 %s5177_s25, 3  ;;  %s6323_s20 = sld [smem:[#allocation43_spill]] }
0x21d1   : > { %s665_s16 = scalar_lea.vmem [#allocation18], %s4192_s7  ;;  %s3929_s2 = scalar_lea.sflag [#allocation19], %s6075_s17 }
0x21d2   : > { %s3958_s26 = sshll.u32 %s665_s16, 4  ;;  %s3959_s26 = int_to_ptr.vmem [resolvable:$true] %s3958_s26 }
0x21d5   : > { %v3911_v16 = vstv %s4464_s0 }
0x21d6   : > { %s3956_s21 = scalar_lea.hbm %s6323_s20, %s4468_s14  ;;  %s4977_s24 = scalar_lea.hbm %s6323_s20, 16 }
0x21d7   : > { %s3960_s1 = sshll.u32 %s3956_s21, 4  ;;  %s3961_s1 = int_to_ptr.hbm [resolvable:$true] %s3960_s1 }
0x21d8   : > { %s4971_s25 = sshra.s32 %s3961_s1, 4  ;;  %s4972_s25 = int_to_ptr.hbm [resolvable:$true] %s4971_s25 }
0x21d9   : > { %s4973_s6 = scalar_lea.hbm %s4972_s25, 8  ;;  %p4978_p12 = scmp.lt.s32.totalorder %s4972_s25, %s6323_s20 }
0x21da   : > { %p4974_p9 = scmp.ne.s32.totalorder %s4972_s25, %s4973_s6  ;;  %p4979_p13 = scmp.lt.s32.totalorder %s4977_s24, %s4973_s6 }
0x21dc   : > { %p4975_p10 = pnand %p4974_p9, %p5194_p5  ;;  %p4980_p0 = por %p4979_p13, %p4978_p12 }
0x21de   : > { %p4976_p11 = pneg %p4975_p10 }
0x21e0   : > { %p4981_p1 = pnand %p4980_p0, %p4976_p11 }
0x224f   : > { %v3907_v15 = vpop.f32.mrf.mxu3 }
0x2250   : > { %v3908_v17 = vadd.f32 %v4621_v14, %v3907_v15 }
0x2252   : > { %v3912_v35 = vmul.f32 %v3911_v16, %v3908_v17 }
0x2254   : > { %v3913_v18 = vadd.f32 %v3912_v35, %v3838_v6 }
0x2256   : > { %3918 = vst.msk [vmem:[%s665_s16] sm:$0xff] %vm689_vm0, %v3913_v18 }
0x2257   : > { %4984 = shalt.err (!%p4981_p1)
}
0x2258   : > { %4500 = dma.vmem_to_hbm [thread:$0]  (%p5194_p5), %s3959_s26, 128, %s3961_s1, %s3929_s2  }
0x2259 PF: > { %s6324_s17 = sld [smem:[#allocation30_spill]] }
0x225a   : > { %s6325_s28 = sld [smem:[#allocation28_spill]] }
0x225f   : > { %p4546_p2 = scmp.ge.s32.totalorder %s6324_s17, 2 }
0x2260   : > { %s3972_s7 = sand.u32 1, %s6325_s28  }
0x2261   : > { %p4526_p3 = pnand %p4546_p2, %p5198_p6  ;;  %s3973_s14 = scalar_lea.sflag [#allocation6], %s3972_s7 }
0x2263   : > { %p4527_p4 = pneg %p4526_p3 }
0x2265   : > { %5026 = dma.done.wait (%p4527_p4), %s3973_s14, 64  }
0x2266   : > { %5028 = vsyncadd (%p4527_p4), %s3973_s14, 4294967232  ;;  %s3990_s8 = scalar_lea.sflag [#allocation19], %s3972_s7 }
0x2267   : > { %5030 = dma.done.wait (%p4527_p4), %s3990_s8, 128  }
0x2268   : > { %5032 = vsyncadd (%p4527_p4), %s3990_s8, 4294967168  ;;  %s6327_s24 = sld [smem:[#allocation31_spill]]  ;;  %s6330_s21 = smov %s5039_s22 }
0x2269   : > { %s6328_s23 = sld [smem:[#allocation29_spill]] }
0x226a   : > { %s6329_s18 = sld [smem:[#allocation32_spill]] }
0x226e   : > { %p35_p5 = scmp.ge.s32.totalorder %s6327_s24, 4  }
0x226f   : > { %s6331_s22 = smov %s6328_s23 }
0x2270   : > { %s6332_s23 = smov %s6329_s18  ;;  %37 = sbr.rel (!%p35_p5) target bundleno = 20 (0x14), region = 224 }
0x2275   :  { %3996 = vsyncpa [#allocation5], 1 }
0x2276   :  { %3998 = vsyncpa [#allocation5 + $0x1], 1 }
0x2277   :  { %3999 = vsyncpa [#allocation9], 1 }
0x2278   :  { %4000 = vsyncpa [#allocation12], 1 }
0x2279   :  { %4001 = vsyncpa [#allocation16], 1 }
0x227a   :  { %4002 = vsyncpa [#allocation6], 1 }
0x227b   :  { %4004 = vsyncpa [#allocation6 + $0x1], 1 }
0x227c   :  { %4005 = vsyncpa [#allocation19], 1 }
0x227d   :  { %4007 = vsyncpa [#allocation19 + $0x1], 1 }
0x227e   :  { %4008 = vsyncpa [#allocation7], 1 }
0x227f   :  { %4010 = vsyncpa [#allocation7 + $0x1], 1 }

</bundles_post_ra>
